<compile_context>
chip_gen: v7x
topology: tpu7x:2x2x1
jax: 0.10.0
libtpu: 0.0.40
codegen_flags: <defaults>
</compile_context>

<pallas_src>
import functools

import jax
import jax.numpy as jnp
from jax.experimental import pallas as pl
from jax.experimental.pallas import tpu as pltpu


# ----------------------------------------------------------------------------
# Pallas kernels
# ----------------------------------------------------------------------------
def _bias_relu_pool_store(acc, b_ref, o_ref, rows, cols, cout):
    """bias + ReLU (f32), cast to bf16, 2x2 max-pool, lane-dense store.

    acc   : (rows*cols, cout) f32
    b_ref : (1, cout)         f32
    o_ref : (rows//2, (cols//2)*cout) bf16
    """
    acc = jnp.maximum(acc + b_ref[...], 0.0).astype(jnp.bfloat16)
    y = acc.reshape(rows // 2, 2, cols // 2, 2, cout)
    y = jnp.maximum(y[:, 0], y[:, 1])            # max over row parity
    y = jnp.maximum(y[:, :, 0], y[:, :, 1])      # max over col parity
    o_ref[...] = y.reshape(rows // 2, (cols // 2) * cout)


def _conv1_relu_pool_kernel(p_ref, w_ref, b_ref, o_ref, *, th, w, cout):
    """conv1 on pre-built 27-wide patches: a single K=27 MXU dot per row tile.

    p_ref : (th, w, 27)  bf16 patches (3x3 taps folded into K by the wrapper)
    w_ref : (27, cout)   bf16
    b_ref : (1, cout)    f32
    o_ref : (th//2, (w//2)*cout) bf16, lane-dense
    """
    k = p_ref.shape[-1]
    lhs = p_ref[...].reshape(th * w, k)
    acc = jnp.dot(lhs, w_ref[...], preferred_element_type=jnp.float32)
    _bias_relu_pool_store(acc, b_ref, o_ref, th, w, cout)


def _conv2_relu_pool_kernel(x_ref, w_ref, b_ref, o_ref, *, h, w, cin, cout):
    """conv2 on one halo'd image: kw folded into K -> 3 dots with K = 3*cin.

    x_ref : (h+2, w+2, cin)  bf16 zero-padded image
    w_ref : (3, 3*cin, cout) bf16, row-within-kh index = kw*cin + c
    b_ref : (1, cout)        f32
    o_ref : (h//2, (w//2)*cout) bf16, lane-dense
    """
    x = x_ref[...]
    acc = jnp.zeros((h * w, cout), jnp.float32)
    for kh in range(3):
        lhs = jnp.concatenate(
            [x[kh:kh + h, kw:kw + w, :] for kw in range(3)], axis=-1)
        acc = acc + jnp.dot(lhs.reshape(h * w, 3 * cin), w_ref[kh],
                            preferred_element_type=jnp.float32)
    _bias_relu_pool_store(acc, b_ref, o_ref, h, w, cout)


def _decoder_kernel(y_ref, w1_ref, b1_ref, w2_ref, b2_ref, o_ref):
    """Fused ConvTranspose(64->32,2,2)+ReLU and ConvTranspose(32->nc,2,2).

    Both deconvs have kernel == stride == 2, i.e. per-pixel linears followed by
    a pixel shuffle; the shuffle is pure layout and done outside.

    y_ref : (tm, 64)    bf16, one row per H/4 x W/4 encoder pixel
    w1_ref: (64, 128)   bf16, columns ordered (di, dj, c32)
    b1_ref: (1, 128)    f32
    w2_ref: (128, npad) bf16 block-diagonal, columns (di, dj, ei, ej, q) + pad
    b2_ref: (1, npad)   f32
    o_ref : (tm, npad)  f32 (lane-dense, npad multiple of 128)
    """
    z = jnp.dot(y_ref[...], w1_ref[...], preferred_element_type=jnp.float32)
    z = jnp.maximum(z + b1_ref[...], 0.0)
    out = jnp.dot(z.astype(jnp.bfloat16), w2_ref[...],
                  preferred_element_type=jnp.float32)
    o_ref[...] = out + b2_ref[...]


# ----------------------------------------------------------------------------
# Pallas wrappers
# ----------------------------------------------------------------------------
def _pick_row_tile(rows, *, align=16, target=128):
    """Largest t <= target with t % align == 0 and t | rows; prefer >= 2 steps."""
    cap = min(target, rows // 2 if rows >= 2 * align else rows)
    for t in range(cap, 0, -1):
        if rows % t == 0 and t % align == 0:
            return t
    return rows   # single step; block == full array dim (always legal)


def conv1_relu_pool(x_nhwc, w27, bias):
    """Conv2d(3->Cout,3x3,pad=1)+ReLU+MaxPool(2,2) via wrapper-built 27-wide patches."""
    n, h, w, cin = x_nhwc.shape
    cout = w27.shape[-1]
    xp = jnp.pad(x_nhwc, ((0, 0), (1, 1), (1, 1), (0, 0)))
    patches = jnp.concatenate(
        [xp[:, kh:kh + h, kw:kw + w, :] for kh in range(3) for kw in range(3)],
        axis=-1).reshape(n * h, w, 9 * cin)                     # (N*H, W, 27) bf16
    rows = n * h
    th = _pick_row_tile(rows)
    kern = functools.partial(_conv1_relu_pool_kernel, th=th, w=w, cout=cout)
    out = pl.pallas_call(
        kern,
        out_shape=jax.ShapeDtypeStruct((rows // 2, (w // 2) * cout), jnp.bfloat16),
        grid=(rows // th,),
        in_specs=[
            pl.BlockSpec((th, w, 9 * cin), lambda g: (g, 0, 0)),
            # weights / bias: constant index_map -> resident in VMEM across grid
            pl.BlockSpec((9 * cin, cout), lambda g: (0, 0)),
            pl.BlockSpec((1, cout), lambda g: (0, 0)),
        ],
        out_specs=pl.BlockSpec((th // 2, (w // 2) * cout), lambda g: (g, 0)),
        compiler_params=pltpu.CompilerParams(dimension_semantics=("parallel",)),
    )(patches, w27, bias)
    return out.reshape(n, h // 2, w // 2, cout)


def conv2_relu_pool(x_nhwc, w3, bias):
    """Conv2d(Cin->Cout,3x3,pad=1)+ReLU+MaxPool(2,2); one halo'd image per grid step."""
    n, h, w, cin = x_nhwc.shape
    cout = w3.shape[-1]
    xp = jnp.pad(x_nhwc, ((0, 0), (1, 1), (1, 1), (0, 0)))      # single small pad
    kern = functools.partial(_conv2_relu_pool_kernel, h=h, w=w, cin=cin, cout=cout)
    out = pl.pallas_call(
        kern,
        out_shape=jax.ShapeDtypeStruct((n, h // 2, (w // 2) * cout), jnp.bfloat16),
        grid=(n,),
        in_specs=[
            pl.BlockSpec((None, h + 2, w + 2, cin), lambda g: (g, 0, 0, 0)),
            pl.BlockSpec((3, 3 * cin, cout), lambda g: (0, 0, 0)),
            pl.BlockSpec((1, cout), lambda g: (0, 0)),
        ],
        out_specs=pl.BlockSpec((None, h // 2, (w // 2) * cout), lambda g: (g, 0, 0)),
        compiler_params=pltpu.CompilerParams(dimension_semantics=("parallel",)),
    )(xp, w3, bias)
    # TODO(synk): add an H/W-tiled halo-DMA variant for very large images so the
    # per-step footprint stays within v7x's 64 MiB VMEM (<=256x256 inputs are ~1 MiB).
    return out.reshape(n, h // 2, w // 2, cout)


def decoder_matmul(y, w1, b1, w2, b2, *, tile_m=4096):
    """(M,64) x fused decoder weights -> (M, npad) f32, large-tile pipelined."""
    m, k = y.shape
    n1 = w1.shape[1]
    npad = w2.shape[1]
    # Big tiles (the decoder is grid-step-overhead bound at small tiles) but keep
    # >= 2 grid steps so both v7x TensorCores get work.
    tm = min(tile_m, max(8, 8 * ((m + 15) // 16)))
    m_pad = pl.cdiv(m, tm) * tm
    if m_pad != m:
        y = jnp.pad(y, ((0, m_pad - m), (0, 0)))
    out = pl.pallas_call(
        _decoder_kernel,
        out_shape=jax.ShapeDtypeStruct((m_pad, npad), jnp.float32),
        grid=(m_pad // tm,),
        in_specs=[
            pl.BlockSpec((tm, k), lambda i: (i, 0)),
            pl.BlockSpec((k, n1), lambda i: (0, 0)),
            pl.BlockSpec((1, n1), lambda i: (0, 0)),
            pl.BlockSpec((n1, npad), lambda i: (0, 0)),
            pl.BlockSpec((1, npad), lambda i: (0, 0)),
        ],
        out_specs=pl.BlockSpec((tm, npad), lambda i: (i, 0)),
        compiler_params=pltpu.CompilerParams(dimension_semantics=("parallel",)),
    )(y, w1, b1, w2, b2)
    return out[:m]


# ----------------------------------------------------------------------------
# Weight re-layouts (PyTorch conventions -> kernel layouts)
# ----------------------------------------------------------------------------
def _conv1_w_mat(w):
    """Conv2d weight (Cout,3,3,3) -> (27, Cout), row = (kh*3+kw)*3 + cin."""
    cout, cin, kh, kw = w.shape
    return jnp.transpose(w, (2, 3, 1, 0)).reshape(kh * kw * cin, cout)


def _conv2_w_mats(w):
    """Conv2d weight (Cout,Cin,3,3) -> (3, 3*Cin, Cout), row-within-kh = kw*Cin + c."""
    cout, cin, kh, kw = w.shape
    return jnp.transpose(w, (2, 3, 1, 0)).reshape(kh, kw * cin, cout)


def _deconv1_w_mat(w):
    """ConvTranspose2d weight (Cin,Cout,2,2) -> (Cin, 4*Cout), cols (di,dj,co)."""
    cin, cout, kh, kw = w.shape
    return jnp.transpose(w, (0, 2, 3, 1)).reshape(cin, kh * kw * cout)


def _deconv2_w_blockdiag(w, npad):
    """ConvTranspose2d weight (32,nc,2,2) -> block-diagonal (128, npad).

    Row index    = (di*2 + dj)*32 + c            (matches deconv1 column order)
    Column index = ((di*2 + dj)*2 + ei)*2*nc + ej*nc + q, zero-padded to npad.
    """
    cin, nc, kh, kw = w.shape
    wm = jnp.transpose(w, (0, 2, 3, 1)).reshape(cin, kh * kw * nc)   # (32, 4*nc)
    z = jnp.zeros_like(wm)
    rows = [jnp.concatenate([wm if d == e else z for e in range(4)], axis=1)
            for d in range(4)]
    wbd = jnp.concatenate(rows, axis=0)                              # (128, 16*nc)
    return jnp.pad(wbd, ((0, 0), (0, npad - wbd.shape[1])))


# ----------------------------------------------------------------------------
# Parameters (deterministic, PyTorch shape conventions)
# ----------------------------------------------------------------------------
def init_params(key, num_classes):
    ks = jax.random.split(key, 8)
    scale = 0.1
    return {
        "conv1_w": scale * jax.random.normal(ks[0], (32, 3, 3, 3), jnp.float32),
        "conv1_b": scale * jax.random.normal(ks[1], (32,), jnp.float32),
        "conv2_w": scale * jax.random.normal(ks[2], (64, 32, 3, 3), jnp.float32),
        "conv2_b": scale * jax.random.normal(ks[3], (64,), jnp.float32),
        "deconv1_w": scale * jax.random.normal(ks[4], (64, 32, 2, 2), jnp.float32),
        "deconv1_b": scale * jax.random.normal(ks[5], (32,), jnp.float32),
        "deconv2_w": scale * jax.random.normal(ks[6], (32, num_classes, 2, 2), jnp.float32),
        "deconv2_b": scale * jax.random.normal(ks[7], (num_classes,), jnp.float32),
    }


# ----------------------------------------------------------------------------
# Forward pass (matches SimplerSegmentation.forward, NCHW in / NCHW out)
# ----------------------------------------------------------------------------
def simpler_segmentation_forward(x_nchw, params, num_classes):
    n, _, h, w = x_nchw.shape
    assert h % 4 == 0 and w % 4 == 0, "spatial dims must be divisible by 4"
    nc = num_classes

    x = jnp.transpose(x_nchw, (0, 2, 3, 1)).astype(jnp.bfloat16)     # NHWC bf16

    # ---- encoder ---------------------------------------------------------
    a1 = conv1_relu_pool(
        x,
        _conv1_w_mat(params["conv1_w"]).astype(jnp.bfloat16),
        params["conv1_b"].reshape(1, -1),
    )                                                      # (N, H/2, W/2, 32)
    a2 = conv2_relu_pool(
        a1,
        _conv2_w_mats(params["conv2_w"]).astype(jnp.bfloat16),
        params["conv2_b"].reshape(1, -1),
    )                                                      # (N, H/4, W/4, 64)

    # ---- decoder (both deconvs fused, lane-dense padded output) ----------
    npad = max(128, ((16 * nc + 127) // 128) * 128)
    w1 = _deconv1_w_mat(params["deconv1_w"]).astype(jnp.bfloat16)        # (64,128)
    b1 = jnp.tile(params["deconv1_b"], 4).reshape(1, -1)                 # (1,128)
    w2 = _deconv2_w_blockdiag(params["deconv2_w"], npad).astype(jnp.bfloat16)
    b2 = jnp.pad(jnp.tile(params["deconv2_b"], 16),
                 (0, npad - 16 * nc)).reshape(1, -1)                     # (1,npad)

    h4, w4 = h // 4, w // 4
    yd = decoder_matmul(a2.reshape(n * h4 * w4, 64), w1, b1, w2, b2)
    yd = yd[:, :16 * nc].reshape(n, h4, w4, 2, 2, 2, 2, nc)
    # pixel shuffle: (n, i, j, di, dj, ei, ej, q) -> (n, 4i+2di+ei, 4j+2dj+ej, q)
    out = jnp.transpose(yd, (0, 1, 3, 5, 2, 4, 6, 7)).reshape(n, h, w, nc)
    return jnp.transpose(out, (0, 3, 1, 2))                # NCHW, f32


# ----------------------------------------------------------------------------
# Pure-JAX reference (independent formulation, f32) for a sanity check
# ----------------------------------------------------------------------------
def reference_forward(x_nchw, params, num_classes):
    x = jnp.transpose(x_nchw, (0, 2, 3, 1))                 # NHWC f32

    def conv(x, w, b):
        y = jax.lax.conv_general_dilated(
            x, jnp.transpose(w, (2, 3, 1, 0)), (1, 1), "SAME",
            dimension_numbers=("NHWC", "HWIO", "NHWC"))
        return jnp.maximum(y + b, 0.0)

    def pool(x):
        return jax.lax.reduce_window(x, -jnp.inf, jax.lax.max,
                                     (1, 2, 2, 1), (1, 2, 2, 1), "VALID")

    def deconv(x, w, b):
        nb, hh, ww, _ = x.shape
        cout = w.shape[1]
        t = jnp.einsum("nijc,copq->nipjqo", x, w)
        return t.reshape(nb, 2 * hh, 2 * ww, cout) + b

    y = pool(conv(x, params["conv1_w"], params["conv1_b"]))
    y = pool(conv(y, params["conv2_w"], params["conv2_b"]))
    y = jnp.maximum(deconv(y, params["deconv1_w"], params["deconv1_b"]), 0.0)
    y = deconv(y, params["deconv2_w"], params["deconv2_b"])
    return jnp.transpose(y, (0, 3, 1, 2))


# ----------------------------------------------------------------------------
if __name__ == "__main__":
    num_classes = 4
    batch, in_ch, hw = 2, 3, 16

    key = jax.random.PRNGKey(0)
    k_x, k_p = jax.random.split(key)
    x = jax.random.normal(k_x, (batch, in_ch, hw, hw), jnp.float32)
    params = init_params(k_p, num_classes)

    fwd = jax.jit(functools.partial(simpler_segmentation_forward,
                                    num_classes=num_classes))
    out = jax.block_until_ready(fwd(x, params))

    assert out.shape == (batch, num_classes, hw, hw), out.shape
    assert out.dtype == jnp.float32

    ref = reference_forward(x, params, num_classes)
    err = float(jnp.max(jnp.abs(out - ref)))
    assert err < 5e-2, f"max abs err vs reference: {err}"  # bf16 MXU tolerance
    print("KERNEL_OK")
</pallas_src>

<mosaic_0001>
module attributes {stable_mosaic.version = 11 : i64} {
  func.func @_conv1_relu_pool_kernel(%arg0: i32, %arg1: memref<16x16x27xbf16, #tpu.memory_space<vmem>>, %arg2: memref<27x32xbf16, #tpu.memory_space<vmem>>, %arg3: memref<1x32xf32, #tpu.memory_space<vmem>>, %arg4: memref<8x256xbf16, #tpu.memory_space<vmem>>) attributes {dimension_semantics = [#tpu.dimension_semantics<parallel>], iteration_bounds = array<i64: 2>, scalar_prefetch = 0 : i64, scratch_operands = 0 : i64, tpu.core_type = #tpu.core_type<tc>, window_params = [{transform_indices = @transform_0, window_bounds = array<i64: 16, 16, 27>}, {pipeline_mode = #tpu.pipeline_mode<synchronous>, transform_indices = @transform_1, window_bounds = array<i64: 27, 32>}, {pipeline_mode = #tpu.pipeline_mode<synchronous>, transform_indices = @transform_2, window_bounds = array<i64: 1, 32>}, {transform_indices = @transform_3, window_bounds = array<i64: 8, 256>}]} {
    %c0 = arith.constant 0 : index
    %c0_0 = arith.constant 0 : index
    %c0_1 = arith.constant 0 : index
    %0 = vector.load %arg1[%c0, %c0_0, %c0_1] : memref<16x16x27xbf16, #tpu.memory_space<vmem>>, vector<16x16x27xbf16>
    %1 = vector.shape_cast %0 : vector<16x16x27xbf16> to vector<256x27xbf16>
    %c0_2 = arith.constant 0 : index
    %c0_3 = arith.constant 0 : index
    %2 = vector.load %arg2[%c0_2, %c0_3] : memref<27x32xbf16, #tpu.memory_space<vmem>>, vector<27x32xbf16>
    %cst = arith.constant dense<0.000000e+00> : vector<256x32xf32>
    %3 = tpu.matmul %1, %2, %cst {dimension_numbers = #tpu.dot_dimension_numbers<[1], [0], [0], [1], [0, 0, 1, 1], [], []>} : vector<256x27xbf16>, vector<27x32xbf16>, vector<256x32xf32> -> vector<256x32xf32>
    %c0_4 = arith.constant 0 : index
    %c0_5 = arith.constant 0 : index
    %4 = vector.load %arg3[%c0_4, %c0_5] : memref<1x32xf32, #tpu.memory_space<vmem>>, vector<1x32xf32>
    %5 = vector.broadcast %4 : vector<1x32xf32> to vector<256x32xf32>
    %6 = arith.addf %3, %5 : vector<256x32xf32>
    %cst_6 = arith.constant 0.000000e+00 : f32
    %7 = vector.broadcast %cst_6 : f32 to vector<256x32xf32>
    %8 = arith.maximumf %6, %7 : vector<256x32xf32>
    %9 = arith.truncf %8 : vector<256x32xf32> to vector<256x32xbf16>
    %10 = vector.shape_cast %9 : vector<256x32xbf16> to vector<8x2x8x2x32xbf16>
    %11 = vector.extract_strided_slice %10 {offsets = [0, 0, 0, 0, 0], sizes = [8, 1, 8, 2, 32], strides = [1, 1, 1, 1, 1]} : vector<8x2x8x2x32xbf16> to vector<8x1x8x2x32xbf16>
    %12 = vector.shape_cast %11 : vector<8x1x8x2x32xbf16> to vector<8x8x2x32xbf16>
    %13 = vector.extract_strided_slice %10 {offsets = [0, 1, 0, 0, 0], sizes = [8, 1, 8, 2, 32], strides = [1, 1, 1, 1, 1]} : vector<8x2x8x2x32xbf16> to vector<8x1x8x2x32xbf16>
    %14 = vector.shape_cast %13 : vector<8x1x8x2x32xbf16> to vector<8x8x2x32xbf16>
    %15 = arith.maximumf %12, %14 : vector<8x8x2x32xbf16>
    %16 = vector.extract_strided_slice %15 {offsets = [0, 0, 0, 0], sizes = [8, 8, 1, 32], strides = [1, 1, 1, 1]} : vector<8x8x2x32xbf16> to vector<8x8x1x32xbf16>
    %17 = vector.shape_cast %16 : vector<8x8x1x32xbf16> to vector<8x8x32xbf16>
    %18 = vector.extract_strided_slice %15 {offsets = [0, 0, 1, 0], sizes = [8, 8, 1, 32], strides = [1, 1, 1, 1]} : vector<8x8x2x32xbf16> to vector<8x8x1x32xbf16>
    %19 = vector.shape_cast %18 : vector<8x8x1x32xbf16> to vector<8x8x32xbf16>
    %20 = arith.maximumf %17, %19 : vector<8x8x32xbf16>
    %21 = vector.shape_cast %20 : vector<8x8x32xbf16> to vector<8x256xbf16>
    %c0_7 = arith.constant 0 : index
    %c0_8 = arith.constant 0 : index
    %22 = vector.load %arg4[%c0_7, %c0_8] : memref<8x256xbf16, #tpu.memory_space<vmem>>, vector<8x256xbf16>
    tpu.vector_store %arg4[%c0_7, %c0_8], %21 {strides = array<i32>} : memref<8x256xbf16, #tpu.memory_space<vmem>>, vector<8x256xbf16>,
    return
  }
  func.func @transform_0(%arg0: i32) -> (i32, i32, i32) {
    %c0_i32 = arith.constant 0 : i32
    %c0_i32_0 = arith.constant 0 : i32
    %c0_i32_1 = arith.constant 0 : i32
    return %arg0, %c0_i32, %c0_i32_0 : i32, i32, i32
  }
  func.func @transform_1(%arg0: i32) -> (i32, i32) {
    %c0_i32 = arith.constant 0 : i32
    %c0_i32_0 = arith.constant 0 : i32
    %c0_i32_1 = arith.constant 0 : i32
    return %c0_i32, %c0_i32_0 : i32, i32
  }
  func.func @transform_2(%arg0: i32) -> (i32, i32) {
    %c0_i32 = arith.constant 0 : i32
    %c0_i32_0 = arith.constant 0 : i32
    %c0_i32_1 = arith.constant 0 : i32
    return %c0_i32, %c0_i32_0 : i32, i32
  }
  func.func @transform_3(%arg0: i32) -> (i32, i32) {
    %c0_i32 = arith.constant 0 : i32
    %c0_i32_0 = arith.constant 0 : i32
    return %arg0, %c0_i32 : i32, i32
  }
}

module attributes {stable_mosaic.version = 11 : i64} {
  func.func @_conv2_relu_pool_kernel(%arg0: i32, %arg1: memref<1x10x10x32xbf16, #tpu.memory_space<vmem>>, %arg2: memref<3x96x64xbf16, #tpu.memory_space<vmem>>, %arg3: memref<1x64xf32, #tpu.memory_space<vmem>>, %arg4: memref<1x4x256xbf16, #tpu.memory_space<vmem>>) attributes {dimension_semantics = [#tpu.dimension_semantics<parallel>], iteration_bounds = array<i64: 2>, scalar_prefetch = 0 : i64, scratch_operands = 0 : i64, tpu.core_type = #tpu.core_type<tc>, window_params = [{transform_indices = @transform_0, window_bounds = array<i64: 1, 10, 10, 32>}, {pipeline_mode = #tpu.pipeline_mode<synchronous>, transform_indices = @transform_1, window_bounds = array<i64: 3, 96, 64>}, {pipeline_mode = #tpu.pipeline_mode<synchronous>, transform_indices = @transform_2, window_bounds = array<i64: 1, 64>}, {transform_indices = @transform_3, window_bounds = array<i64: 1, 4, 256>}]} {
    %c0 = arith.constant 0 : index
    %c0_0 = arith.constant 0 : index
    %c0_1 = arith.constant 0 : index
    %c0_2 = arith.constant 0 : index
    %0 = vector.load %arg1[%c0, %c0_0, %c0_1, %c0_2] : memref<1x10x10x32xbf16, #tpu.memory_space<vmem>>, vector<1x10x10x32xbf16>
    %1 = vector.shape_cast %0 : vector<1x10x10x32xbf16> to vector<10x10x32xbf16>
    %cst = arith.constant 0.000000e+00 : f32
    %2 = vector.broadcast %cst : f32 to vector<64x64xf32>
    %3 = vector.extract_strided_slice %1 {offsets = [0, 0, 0], sizes = [8, 8, 32], strides = [1, 1, 1]} : vector<10x10x32xbf16> to vector<8x8x32xbf16>
    %4 = vector.extract_strided_slice %1 {offsets = [0, 1, 0], sizes = [8, 8, 32], strides = [1, 1, 1]} : vector<10x10x32xbf16> to vector<8x8x32xbf16>
    %5 = vector.extract_strided_slice %1 {offsets = [0, 2, 0], sizes = [8, 8, 32], strides = [1, 1, 1]} : vector<10x10x32xbf16> to vector<8x8x32xbf16>
    %6 = tpu.concatenate %3, %4, %5 in 2 : vector<8x8x32xbf16>, vector<8x8x32xbf16>, vector<8x8x32xbf16> -> vector<8x8x96xbf16>
    %7 = vector.shape_cast %6 : vector<8x8x96xbf16> to vector<64x96xbf16>
    %c0_3 = arith.constant 0 : index
    %c0_4 = arith.constant 0 : index
    %c0_5 = arith.constant 0 : index
    %8 = vector.load %arg2[%c0_3, %c0_4, %c0_5] : memref<3x96x64xbf16, #tpu.memory_space<vmem>>, vector<1x96x64xbf16>
    %9 = vector.shape_cast %8 : vector<1x96x64xbf16> to vector<96x64xbf16>
    %cst_6 = arith.constant dense<0.000000e+00> : vector<64x64xf32>
    %10 = tpu.matmul %7, %9, %cst_6 {dimension_numbers = #tpu.dot_dimension_numbers<[1], [0], [0], [1], [0, 0, 1, 1], [], []>} : vector<64x96xbf16>, vector<96x64xbf16>, vector<64x64xf32> -> vector<64x64xf32>
    %11 = arith.addf %2, %10 : vector<64x64xf32>
    %12 = vector.extract_strided_slice %1 {offsets = [1, 0, 0], sizes = [8, 8, 32], strides = [1, 1, 1]} : vector<10x10x32xbf16> to vector<8x8x32xbf16>
    %13 = vector.extract_strided_slice %1 {offsets = [1, 1, 0], sizes = [8, 8, 32], strides = [1, 1, 1]} : vector<10x10x32xbf16> to vector<8x8x32xbf16>
    %14 = vector.extract_strided_slice %1 {offsets = [1, 2, 0], sizes = [8, 8, 32], strides = [1, 1, 1]} : vector<10x10x32xbf16> to vector<8x8x32xbf16>
    %15 = tpu.concatenate %12, %13, %14 in 2 : vector<8x8x32xbf16>, vector<8x8x32xbf16>, vector<8x8x32xbf16> -> vector<8x8x96xbf16>
    %16 = vector.shape_cast %15 : vector<8x8x96xbf16> to vector<64x96xbf16>
    %c1 = arith.constant 1 : index
    %c0_7 = arith.constant 0 : index
    %c0_8 = arith.constant 0 : index
    %17 = vector.load %arg2[%c1, %c0_7, %c0_8] : memref<3x96x64xbf16, #tpu.memory_space<vmem>>, vector<1x96x64xbf16>
    %18 = vector.shape_cast %17 : vector<1x96x64xbf16> to vector<96x64xbf16>
    %cst_9 = arith.constant dense<0.000000e+00> : vector<64x64xf32>
    %19 = tpu.matmul %16, %18, %cst_9 {dimension_numbers = #tpu.dot_dimension_numbers<[1], [0], [0], [1], [0, 0, 1, 1], [], []>} : vector<64x96xbf16>, vector<96x64xbf16>, vector<64x64xf32> -> vector<64x64xf32>
    %20 = arith.addf %11, %19 : vector<64x64xf32>
    %21 = vector.extract_strided_slice %1 {offsets = [2, 0, 0], sizes = [8, 8, 32], strides = [1, 1, 1]} : vector<10x10x32xbf16> to vector<8x8x32xbf16>
    %22 = vector.extract_strided_slice %1 {offsets = [2, 1, 0], sizes = [8, 8, 32], strides = [1, 1, 1]} : vector<10x10x32xbf16> to vector<8x8x32xbf16>
    %23 = vector.extract_strided_slice %1 {offsets = [2, 2, 0], sizes = [8, 8, 32], strides = [1, 1, 1]} : vector<10x10x32xbf16> to vector<8x8x32xbf16>
    %24 = tpu.concatenate %21, %22, %23 in 2 : vector<8x8x32xbf16>, vector<8x8x32xbf16>, vector<8x8x32xbf16> -> vector<8x8x96xbf16>
    %25 = vector.shape_cast %24 : vector<8x8x96xbf16> to vector<64x96xbf16>
    %c2 = arith.constant 2 : index
    %c0_10 = arith.constant 0 : index
    %c0_11 = arith.constant 0 : index
    %26 = vector.load %arg2[%c2, %c0_10, %c0_11] : memref<3x96x64xbf16, #tpu.memory_space<vmem>>, vector<1x96x64xbf16>
    %27 = vector.shape_cast %26 : vector<1x96x64xbf16> to vector<96x64xbf16>
    %cst_12 = arith.constant dense<0.000000e+00> : vector<64x64xf32>
    %28 = tpu.matmul %25, %27, %cst_12 {dimension_numbers = #tpu.dot_dimension_numbers<[1], [0], [0], [1], [0, 0, 1, 1], [], []>} : vector<64x96xbf16>, vector<96x64xbf16>, vector<64x64xf32> -> vector<64x64xf32>
    %29 = arith.addf %20, %28 : vector<64x64xf32>
    %c0_13 = arith.constant 0 : index
    %c0_14 = arith.constant 0 : index
    %30 = vector.load %arg3[%c0_13, %c0_14] : memref<1x64xf32, #tpu.memory_space<vmem>>, vector<1x64xf32>
    %31 = vector.broadcast %30 : vector<1x64xf32> to vector<64x64xf32>
    %32 = arith.addf %29, %31 : vector<64x64xf32>
    %cst_15 = arith.constant 0.000000e+00 : f32
    %33 = vector.broadcast %cst_15 : f32 to vector<64x64xf32>
    %34 = arith.maximumf %32, %33 : vector<64x64xf32>
    %35 = arith.truncf %34 : vector<64x64xf32> to vector<64x64xbf16>
    %36 = vector.shape_cast %35 : vector<64x64xbf16> to vector<4x2x4x2x64xbf16>
    %37 = vector.extract_strided_slice %36 {offsets = [0, 0, 0, 0, 0], sizes = [4, 1, 4, 2, 64], strides = [1, 1, 1, 1, 1]} : vector<4x2x4x2x64xbf16> to vector<4x1x4x2x64xbf16>
    %38 = vector.shape_cast %37 : vector<4x1x4x2x64xbf16> to vector<4x4x2x64xbf16>
    %39 = vector.extract_strided_slice %36 {offsets = [0, 1, 0, 0, 0], sizes = [4, 1, 4, 2, 64], strides = [1, 1, 1, 1, 1]} : vector<4x2x4x2x64xbf16> to vector<4x1x4x2x64xbf16>
    %40 = vector.shape_cast %39 : vector<4x1x4x2x64xbf16> to vector<4x4x2x64xbf16>
    %41 = arith.maximumf %38, %40 : vector<4x4x2x64xbf16>
    %42 = vector.extract_strided_slice %41 {offsets = [0, 0, 0, 0], sizes = [4, 4, 1, 64], strides = [1, 1, 1, 1]} : vector<4x4x2x64xbf16> to vector<4x4x1x64xbf16>
    %43 = vector.shape_cast %42 : vector<4x4x1x64xbf16> to vector<4x4x64xbf16>
    %44 = vector.extract_strided_slice %41 {offsets = [0, 0, 1, 0], sizes = [4, 4, 1, 64], strides = [1, 1, 1, 1]} : vector<4x4x2x64xbf16> to vector<4x4x1x64xbf16>
    %45 = vector.shape_cast %44 : vector<4x4x1x64xbf16> to vector<4x4x64xbf16>
    %46 = arith.maximumf %43, %45 : vector<4x4x64xbf16>
    %47 = vector.shape_cast %46 : vector<4x4x64xbf16> to vector<4x256xbf16>
    %c0_16 = arith.constant 0 : index
    %c0_17 = arith.constant 0 : index
    %c0_18 = arith.constant 0 : index
    %48 = vector.load %arg4[%c0_16, %c0_17, %c0_18] : memref<1x4x256xbf16, #tpu.memory_space<vmem>>, vector<1x4x256xbf16>
    %49 = vector.shape_cast %48 : vector<1x4x256xbf16> to vector<4x256xbf16>
    %50 = vector.shape_cast %47 : vector<4x256xbf16> to vector<1x4x256xbf16>
    tpu.vector_store %arg4[%c0_16, %c0_17, %c0_18], %50 {strides = array<i32>} : memref<1x4x256xbf16, #tpu.memory_space<vmem>>, vector<1x4x256xbf16>,
    return
  }
  func.func @transform_0(%arg0: i32) -> (i32, i32, i32, i32) {
    %c0_i32 = arith.constant 0 : i32
    %c0_i32_0 = arith.constant 0 : i32
    %c0_i32_1 = arith.constant 0 : i32
    %c0_i32_2 = arith.constant 0 : i32
    return %arg0, %c0_i32, %c0_i32_0, %c0_i32_1 : i32, i32, i32, i32
  }
  func.func @transform_1(%arg0: i32) -> (i32, i32, i32) {
    %c0_i32 = arith.constant 0 : i32
    %c0_i32_0 = arith.constant 0 : i32
    %c0_i32_1 = arith.constant 0 : i32
    %c0_i32_2 = arith.constant 0 : i32
    return %c0_i32, %c0_i32_0, %c0_i32_1 : i32, i32, i32
  }
  func.func @transform_2(%arg0: i32) -> (i32, i32) {
    %c0_i32 = arith.constant 0 : i32
    %c0_i32_0 = arith.constant 0 : i32
    %c0_i32_1 = arith.constant 0 : i32
    return %c0_i32, %c0_i32_0 : i32, i32
  }
  func.func @transform_3(%arg0: i32) -> (i32, i32, i32) {
    %c0_i32 = arith.constant 0 : i32
    %c0_i32_0 = arith.constant 0 : i32
    %c0_i32_1 = arith.constant 0 : i32
    return %arg0, %c0_i32, %c0_i32_0 : i32, i32, i32
  }
}

module attributes {stable_mosaic.version = 11 : i64} {
  func.func @_decoder_kernel(%arg0: i32, %arg1: memref<16x64xbf16, #tpu.memory_space<vmem>>, %arg2: memref<64x128xbf16, #tpu.memory_space<vmem>>, %arg3: memref<1x128xf32, #tpu.memory_space<vmem>>, %arg4: memref<128x128xbf16, #tpu.memory_space<vmem>>, %arg5: memref<1x128xf32, #tpu.memory_space<vmem>>, %arg6: memref<16x128xf32, #tpu.memory_space<vmem>>) attributes {dimension_semantics = [#tpu.dimension_semantics<parallel>], iteration_bounds = array<i64: 2>, scalar_prefetch = 0 : i64, scratch_operands = 0 : i64, tpu.core_type = #tpu.core_type<tc>, window_params = [{transform_indices = @transform_0, window_bounds = array<i64: 16, 64>}, {pipeline_mode = #tpu.pipeline_mode<synchronous>, transform_indices = @transform_1, window_bounds = array<i64: 64, 128>}, {pipeline_mode = #tpu.pipeline_mode<synchronous>, transform_indices = @transform_2, window_bounds = array<i64: 1, 128>}, {pipeline_mode = #tpu.pipeline_mode<synchronous>, transform_indices = @transform_3, window_bounds = array<i64: 128, 128>}, {pipeline_mode = #tpu.pipeline_mode<synchronous>, transform_indices = @transform_4, window_bounds = array<i64: 1, 128>}, {transform_indices = @transform_5, window_bounds = array<i64: 16, 128>}]} {
    %c0 = arith.constant 0 : index
    %c0_0 = arith.constant 0 : index
    %0 = vector.load %arg1[%c0, %c0_0] : memref<16x64xbf16, #tpu.memory_space<vmem>>, vector<16x64xbf16>
    %c0_1 = arith.constant 0 : index
    %c0_2 = arith.constant 0 : index
    %1 = vector.load %arg2[%c0_1, %c0_2] : memref<64x128xbf16, #tpu.memory_space<vmem>>, vector<64x128xbf16>
    %cst = arith.constant dense<0.000000e+00> : vector<16x128xf32>
    %2 = tpu.matmul %0, %1, %cst {dimension_numbers = #tpu.dot_dimension_numbers<[1], [0], [0], [1], [0, 0, 1, 1], [], []>} : vector<16x64xbf16>, vector<64x128xbf16>, vector<16x128xf32> -> vector<16x128xf32>
    %c0_3 = arith.constant 0 : index
    %c0_4 = arith.constant 0 : index
    %3 = vector.load %arg3[%c0_3, %c0_4] : memref<1x128xf32, #tpu.memory_space<vmem>>, vector<1x128xf32>
    %4 = vector.broadcast %3 : vector<1x128xf32> to vector<16x128xf32>
    %5 = arith.addf %2, %4 : vector<16x128xf32>
    %cst_5 = arith.constant 0.000000e+00 : f32
    %6 = vector.broadcast %cst_5 : f32 to vector<16x128xf32>
    %7 = arith.maximumf %5, %6 : vector<16x128xf32>
    %8 = arith.truncf %7 : vector<16x128xf32> to vector<16x128xbf16>
    %c0_6 = arith.constant 0 : index
    %c0_7 = arith.constant 0 : index
    %9 = vector.load %arg4[%c0_6, %c0_7] : memref<128x128xbf16, #tpu.memory_space<vmem>>, vector<128x128xbf16>
    %cst_8 = arith.constant dense<0.000000e+00> : vector<16x128xf32>
    %10 = tpu.matmul %8, %9, %cst_8 {dimension_numbers = #tpu.dot_dimension_numbers<[1], [0], [0], [1], [0, 0, 1, 1], [], []>} : vector<16x128xbf16>, vector<128x128xbf16>, vector<16x128xf32> -> vector<16x128xf32>
    %c0_9 = arith.constant 0 : index
    %c0_10 = arith.constant 0 : index
    %11 = vector.load %arg5[%c0_9, %c0_10] : memref<1x128xf32, #tpu.memory_space<vmem>>, vector<1x128xf32>
    %12 = vector.broadcast %11 : vector<1x128xf32> to vector<16x128xf32>
    %13 = arith.addf %10, %12 : vector<16x128xf32>
    %c0_11 = arith.constant 0 : index
    %c0_12 = arith.constant 0 : index
    %14 = vector.load %arg6[%c0_11, %c0_12] : memref<16x128xf32, #tpu.memory_space<vmem>>, vector<16x128xf32>
    tpu.vector_store %arg6[%c0_11, %c0_12], %13 {strides = array<i32>} : memref<16x128xf32, #tpu.memory_space<vmem>>, vector<16x128xf32>,
    return
  }
  func.func @transform_0(%arg0: i32) -> (i32, i32) {
    %c0_i32 = arith.constant 0 : i32
    %c0_i32_0 = arith.constant 0 : i32
    return %arg0, %c0_i32 : i32, i32
  }
  func.func @transform_1(%arg0: i32) -> (i32, i32) {
    %c0_i32 = arith.constant 0 : i32
    %c0_i32_0 = arith.constant 0 : i32
    %c0_i32_1 = arith.constant 0 : i32
    return %c0_i32, %c0_i32_0 : i32, i32
  }
  func.func @transform_2(%arg0: i32) -> (i32, i32) {
    %c0_i32 = arith.constant 0 : i32
    %c0_i32_0 = arith.constant 0 : i32
    %c0_i32_1 = arith.constant 0 : i32
    return %c0_i32, %c0_i32_0 : i32, i32
  }
  func.func @transform_3(%arg0: i32) -> (i32, i32) {
    %c0_i32 = arith.constant 0 : i32
    %c0_i32_0 = arith.constant 0 : i32
    %c0_i32_1 = arith.constant 0 : i32
    return %c0_i32, %c0_i32_0 : i32, i32
  }
  func.func @transform_4(%arg0: i32) -> (i32, i32) {
    %c0_i32 = arith.constant 0 : i32
    %c0_i32_0 = arith.constant 0 : i32
    %c0_i32_1 = arith.constant 0 : i32
    return %c0_i32, %c0_i32_0 : i32, i32
  }
  func.func @transform_5(%arg0: i32) -> (i32, i32) {
    %c0_i32 = arith.constant 0 : i32
    %c0_i32_0 = arith.constant 0 : i32
    return %arg0, %c0_i32 : i32, i32
  }
}

</mosaic_0001>

<bundles_post_ra>
// kernel: tile.18
= control target key start
LH: loop header
LB: loop body
LE: loop exit
PB: predicated region body
PF: predicated region fallthrough
CT: control target
= control target key end

     0   :  { %s28_s0 = inlined_call_operand.vmem [shape: f32[4], index: 0, kind: input, shape index: {}]   ;;  %s29_s1 = inlined_call_operand.vmem [shape: f32[16,4], index: 1, kind: output, shape index: {}]  }
   0x1   :  { %v4_v0 = vld [vmem:[%s28_s0] ss:$0 sm:$0xff] }
   0x2   :  { %5 = vst [vmem:[%s29_s1] sm:$0xff] %v4_v0  ;;  %8 = vst [vmem:[%s29_s1 + $0x8] sm:$0xff] %v4_v0 }

// kernel: tile.19
= control target key start
LH: loop header
LB: loop body
LE: loop exit
PB: predicated region body
PF: predicated region fallthrough
CT: control target
= control target key end

     0   :  { %s131_s10 = smov 60   ;;  %s132_s11 = smov 52   ;;  %vm3_vm0 = vcmask 31744   ;;  %vm9_vm1 = vcmask 523744   ;;  %vm15_vm2 = vcmask 490944   ;;  %vm21_vm3 = vcmask 458144   ;;  %s207_s0 = inlined_call_operand.vmem [shape: f32[16,4], index: 0, kind: input, shape index: {}]   ;;  %s208_s1 = inlined_call_operand.vmem [shape: f32[64], index: 1, kind: output, shape index: {}]  }
   0x1   :  { %v101_v0 = vld [vmem:[%s207_s0 + $0xf] sm:$0x1]   ;;  %v103_v1 = vld [vmem:[%s207_s0 + $0xd] sm:$0x1]   ;;  %v102_v2 = vld [vmem:[%s207_s0 + $0xe] sm:$0x1]  }
   0x2   :  { %7 = vrot.lane.b32.xlu0 %v101_v0, %s131_s10  ;;  %19 = vrot.lane.b32.xlu1 %v103_v1, %s132_s11  ;;  %v104_v3 = vld [vmem:[%s207_s0 + $0xc] sm:$0x1]   ;;  %s133_s16 = smov 56   ;;  %s134_s17 = smov 48   ;;  %v105_v4 = vld [vmem:[%s207_s0 + $0xb] sm:$0x1]  }
   0x3   :  { %v106_v5 = vld [vmem:[%s207_s0 + $0xa] sm:$0x1]   ;;  %v2_v6 = vld [vmem:[%s207_s0] sm:$0x1]   ;;  %s135_s24 = smov 44   ;;  %s136_s25 = smov 40  }
   0x4   :  { %4 = vst.msk [vmem:[#allocation0] sm:$0x1] %vm3_vm0, %v2_v6   ;;  %v107_v7 = vld [vmem:[%s207_s0 + $0x9] sm:$0x1]   ;;  %v108_v8 = vld [vmem:[%s207_s0 + $0x8] sm:$0x1]  }
   0x5   :  { %s137_s30 = smov 36   ;;  %s138_s2 = smov 32   ;;  %v109_v9 = vld [vmem:[%s207_s0 + $0x7] sm:$0x1]   ;;  %v110_v10 = vld [vmem:[%s207_s0 + $0x6] sm:$0x1]  }
   0x6   :  { %13 = vrot.lane.b32.xlu0 %v102_v2, %s133_s16  ;;  %25 = vrot.lane.b32.xlu1 %v104_v3, %s134_s17  ;;  %s139_s7 = smov 28   ;;  %s140_s8 = smov 24   ;;  %v111_v11 = vld [vmem:[%s207_s0 + $0x5] sm:$0x1]   ;;  %v112_v12 = vld [vmem:[%s207_s0 + $0x4] sm:$0x1]  }
   0x7   :  { %s141_s13 = smov 20   ;;  %s142_s14 = smov 16   ;;  %v113_v13 = vld [vmem:[%s207_s0 + $0x3] sm:$0x1]   ;;  %v114_v14 = vld [vmem:[%s207_s0 + $0x2] sm:$0x1]  }
   0x8   :  { %s143_s19 = smov 12   ;;  %s144_s20 = smov 8   ;;  %v115_v15 = vld [vmem:[%s207_s0 + $0x1] sm:$0x1]   ;;  %vm27_vm4 = vcmask 425344   ;;  %vm33_vm5 = vcmask 392544  }
   0x9   :  { %s145_s0 = smov 4   ;;  %vm39_vm6 = vcmask 359744   ;;  %vm45_vm7 = vcmask 326944   ;;  %vm51_vm8 = vcmask 294144   ;;  %vm57_vm9 = vcmask 261344  }
   0xa   :  { %31 = vrot.lane.b32.xlu0 %v105_v4, %s135_s24  ;;  %37 = vrot.lane.b32.xlu1 %v106_v5, %s136_s25  ;;  %vm63_vm10 = vcmask 228544   ;;  %vm69_vm11 = vcmask 195744   ;;  %vm75_vm12 = vcmask 162944   ;;  %vm81_vm13 = vcmask 130144  }
   0xb   :  { %vm87_vm14 = vcmask 97344   ;;  %vm93_vm15 = vcmask 64544  }
   0xe   :  { %43 = vrot.lane.b32.xlu0 %v107_v7, %s137_s30  ;;  %49 = vrot.lane.b32.xlu1 %v108_v8, %s138_s2 }
  0x12   :  { %55 = vrot.lane.b32.xlu0 %v109_v9, %s139_s7  ;;  %61 = vrot.lane.b32.xlu1 %v110_v10, %s140_s8 }
  0x16   :  { %67 = vrot.lane.b32.xlu0 %v111_v11, %s141_s13  ;;  %73 = vrot.lane.b32.xlu1 %v112_v12, %s142_s14 }
  0x1a   :  { %79 = vrot.lane.b32.xlu0 %v113_v13, %s143_s19  ;;  %85 = vrot.lane.b32.xlu1 %v114_v14, %s144_s20 }
  0x1e   :  { %91 = vrot.lane.b32.xlu0 %v115_v15, %s145_s0 }
  0x74   :  { %v8_v16 = vpop.permute.xlu0 %7   ;;  %v20_v17 = vpop.permute.xlu1 %19  }
  0x75   :  { %10 = vst.msk [vmem:[#allocation0] sm:$0x1] %vm9_vm1, %v8_v16  }
  0x78   :  { %v14_v18 = vpop.permute.xlu0 %13   ;;  %v26_v19 = vpop.permute.xlu1 %25  }
  0x79   :  { %16 = vst.msk [vmem:[#allocation0] sm:$0x1] %vm15_vm2, %v14_v18  }
  0x7a   :  { %22 = vst.msk [vmem:[#allocation0] sm:$0x1] %vm21_vm3, %v20_v17  }
  0x7b   :  { %28 = vst.msk [vmem:[#allocation0] sm:$0x1] %vm27_vm4, %v26_v19  }
  0x7c   :  { %v32_v20 = vpop.permute.xlu0 %31   ;;  %v38_v21 = vpop.permute.xlu1 %37  }
  0x7d   :  { %34 = vst.msk [vmem:[#allocation0] sm:$0x1] %vm33_vm5, %v32_v20  }
  0x7e   :  { %40 = vst.msk [vmem:[#allocation0] sm:$0x1] %vm39_vm6, %v38_v21  }
  0x80   :  { %v44_v22 = vpop.permute.xlu0 %43   ;;  %v50_v23 = vpop.permute.xlu1 %49  }
  0x81   :  { %46 = vst.msk [vmem:[#allocation0] sm:$0x1] %vm45_vm7, %v44_v22  }
  0x82   :  { %52 = vst.msk [vmem:[#allocation0] sm:$0x1] %vm51_vm8, %v50_v23  }
  0x84   :  { %v56_v24 = vpop.permute.xlu0 %55   ;;  %v62_v25 = vpop.permute.xlu1 %61  }
  0x85   :  { %58 = vst.msk [vmem:[#allocation0] sm:$0x1] %vm57_vm9, %v56_v24  }
  0x86   :  { %64 = vst.msk [vmem:[#allocation0] sm:$0x1] %vm63_vm10, %v62_v25  }
  0x88   :  { %v68_v26 = vpop.permute.xlu0 %67   ;;  %v74_v27 = vpop.permute.xlu1 %73  }
  0x89   :  { %70 = vst.msk [vmem:[#allocation0] sm:$0x1] %vm69_vm11, %v68_v26  }
  0x8a   :  { %76 = vst.msk [vmem:[#allocation0] sm:$0x1] %vm75_vm12, %v74_v27  }
  0x8c   :  { %v80_v28 = vpop.permute.xlu0 %79   ;;  %v86_v29 = vpop.permute.xlu1 %85  }
  0x8d   :  { %82 = vst.msk [vmem:[#allocation0] sm:$0x1] %vm81_vm13, %v80_v28  }
  0x8e   :  { %88 = vst.msk [vmem:[#allocation0] sm:$0x1] %vm87_vm14, %v86_v29  }
  0x90   :  { %v92_v30 = vpop.permute.xlu0 %91  }
  0x91   :  { %94 = vst.msk [vmem:[#allocation0] sm:$0x1] %vm93_vm15, %v92_v30  }
  0x98   :  { %v98_v31 = vld [vmem:[#allocation0] sm:$0x1] }
  0x99   :  { %100 = vst [vmem:[%s208_s1] sm:$0x1] %v98_v31 }

// kernel: tile.13
= control target key start
LH: loop header
LB: loop body
LE: loop exit
PB: predicated region body
PF: predicated region fallthrough
CT: control target
= control target key end

     0   :  { %s22_s0 = inlined_call_operand.vmem [shape: f32[32], index: 0, kind: input, shape index: {}]   ;;  %s23_s1 = inlined_call_operand.vmem [shape: f32[4,32], index: 1, kind: output, shape index: {}]  }
   0x1   :  { %v4_v0 = vld [vmem:[%s22_s0] ss:$0 sm:$0xff] }
   0x2   :  { %5 = vst [vmem:[%s23_s1] sm:$0xf] %v4_v0 }

// kernel: tile.14
= control target key start
LH: loop header
LB: loop body
LE: loop exit
PB: predicated region body
PF: predicated region fallthrough
CT: control target
= control target key end

     0   :  { %vm7_vm0 = vcmask 261120   ;;  %s37_s8 = smov 32   ;;  %s38_s9 = smov 64   ;;  %vm13_vm1 = vcmask 1048320   ;;  %vm19_vm2 = vcmask 785920   ;;  %vm25_vm3 = vcmask 523520   ;;  %s55_s0 = inlined_call_operand.vmem [shape: f32[4,32], index: 0, kind: input, shape index: {}]   ;;  %s56_s1 = inlined_call_operand.vmem [shape: f32[1,128], index: 1, kind: output, shape index: {}]  }
   0x1   :  { %v4_v0 = vld [vmem:[%s55_s0] sm:$0xf]  ;;  %s36_s0 = smov 96  }
   0x2   :  { %5 = vst [vmem:[#allocation1] sm:$0xf] %v4_v0 }
   0x9   :  { %v10_v1 = vld [vmem:[#allocation1 + $0x3] sm:$0x1]   ;;  %v22_v2 = vld [vmem:[#allocation1 + $0x1] sm:$0x1]   ;;  %v6_v3 = vld [vmem:[#allocation1] sm:$0x1]  }
   0xa   :  { %11 = vrot.lane.b32.xlu0 %v10_v1, %s36_s0  ;;  %23 = vrot.lane.b32.xlu1 %v22_v2, %s37_s8  ;;  %v16_v4 = vld [vmem:[#allocation1 + $0x2] sm:$0x1]   ;;  %8 = vst.msk [vmem:[#allocation0] sm:$0x1] %vm7_vm0, %v6_v3  }
   0xe   :  { %17 = vrot.lane.b32.xlu0 %v16_v4, %s38_s9 }
  0x7c   :  { %v12_v5 = vpop.permute.xlu0 %11   ;;  %v24_v6 = vpop.permute.xlu1 %23  }
  0x7d   :  { %14 = vst.msk [vmem:[#allocation0] sm:$0x1] %vm13_vm1, %v12_v5  }
  0x80   :  { %v18_v7 = vpop.permute.xlu0 %17  }
  0x81   :  { %20 = vst.msk [vmem:[#allocation0] sm:$0x1] %vm19_vm2, %v18_v7  }
  0x82   :  { %26 = vst.msk [vmem:[#allocation0] sm:$0x1] %vm25_vm3, %v24_v6  }
  0x89   :  { %v30_v8 = vld [vmem:[#allocation0] sm:$0x1] }
  0x8a   :  { %32 = vst [vmem:[%s56_s1] sm:$0x1] %v30_v8 }

// kernel: simpler_segmentation_forward.4
= control target key start
LH: loop header
LB: loop body
LE: loop exit
PB: predicated region body
PF: predicated region fallthrough
CT: control target
= control target key end

     0   :  { %s2040_s12 = smov 0   ;;  %s2389_s0 = inlined_call_operand.vmem [shape: bf16[2,10,10,32], index: 0, kind: input, shape index: {}]   ;;  %s2390_s1 = inlined_call_operand.vmem [shape: bf16[3,96,64], index: 1, kind: input, shape index: {}]   ;;  %s2391_s2 = inlined_call_operand.vmem [shape: f32[1,64], index: 2, kind: input, shape index: {}]   ;;  %s2392_s3 = inlined_call_operand.vmem [shape: bf16[2,4,256], index: 3, kind: output, shape index: {}]  }
   0x1 LB: > { %s1743_s13 = sadd.s32 4294967295, %s2014_s12   ;;  %p1747_p0 = scmp.ge.s32.totalorder %s2014_s12, 1  ;;  %s2014_s12 = sphi %s2040_s12, %s13_s12  }
   0x2   : > { %p137_p1 = scmp.lt.s32.totalorder %s2014_s12, 3 }
   0x4   : > { %p138_p2 = pnand %p1747_p0, %p137_p1 }
   0x5   : > { %p161_p3 = scmp.lt.s32.totalorder (!%p138_p2), %s1743_s13, 1  ;;  %v1990_v0 = vld [vmem:[%s2390_s1 + $0x30] sm:$0xff] (!%p138_p2)   ;;  %v1991_v1 = vld [vmem:[%s2390_s1] sm:$0xff] (!%p138_p2)   ;;  %v1992_v2 = vld [vmem:[%s2390_s1 + $0x38] sm:$0xff] (!%p138_p2)   ;;  %s2016_s7 = smov (!%p138_p2), 64   ;;  %vm328_vm0 = vcmask (!%p138_p2), 261120  }
   0x6   : > { %141 = sbr.rel (%p138_p2) target bundleno = 587 (0x24b), region = 32  ;;  %1879 = vmatprep.subr.bf16.mxu1 (!%p138_p2), %v1990_v0  ;;  %1899 = vmatprep.subr.bf16.mxu0 (!%p138_p2), %v1991_v1  ;;  %v1993_v3 = vld [vmem:[%s2390_s1 + $0x8] sm:$0xff] (!%p138_p2)   ;;  %v1994_v4 = vld [vmem:[%s2390_s1 + $0x40] sm:$0xff] (!%p138_p2)   ;;  %v1995_v5 = vld [vmem:[%s2390_s1 + $0x10] sm:$0xff] (!%p138_p2)   ;;  %s2017_s18 = smov (!%p138_p2), 32   ;;  %vm353_vm1 = vcmask (!%p138_p2), 523264  }
   0x7   : > { %1880 = vmatpush3.bf16.msra.mxu1 (!%p138_p2), %v1990_v0  ;;  %1900 = vmatpush3.bf16.msra.mxu0 (!%p138_p2), %v1991_v1  ;;  %v1996_v21 = vld [vmem:[%s2390_s1 + $0x48] sm:$0xff] (!%p138_p2)   ;;  %v1997_v24 = vld [vmem:[%s2390_s1 + $0x18] sm:$0xff] (!%p138_p2)   ;;  %v1998_v39 = vld [vmem:[%s2390_s1 + $0x50] sm:$0xff] (!%p138_p2)   ;;  %vm473_vm2 = vcmask (!%p138_p2), 785408   ;;  %vm1464_vm3 = vcmask (!%p138_p2), 1041409   ;;  %vm1467_vm4 = vcmask (!%p138_p2), 1042434  }
   0x8   : > { %1881 = vmatprep.subr.bf16.mxu1 (!%p138_p2), %v1992_v2  ;;  %1901 = vmatprep.subr.bf16.mxu0 (!%p138_p2), %v1993_v3  ;;  %v1999_v44 = vld [vmem:[%s2390_s1 + $0x20] sm:$0xff] (!%p138_p2)   ;;  %v2000_v50 = vld [vmem:[%s2390_s1 + $0x58] sm:$0xff] (!%p138_p2)   ;;  %v2001_v51 = vld [vmem:[%s2390_s1 + $0x28] sm:$0xff] (!%p138_p2)   ;;  %vm1470_vm5 = vcmask (!%p138_p2), 1043459  }
   0x9   : > { %v2163_v63 = vld [vmem:[%s2390_s1 + $0x60] sm:$0xff] (!%p138_p2)  }
   0xb   : > { %1882 = vmatpush3.bf16.msra.mxu1 (!%p138_p2), %v1992_v2  ;;  %1902 = vmatpush3.bf16.msra.mxu0 (!%p138_p2), %v1993_v3 }
   0xc   : > { %1883 = vmatprep.subr.bf16.mxu1 (!%p138_p2), %v1994_v4  ;;  %1903 = vmatprep.subr.bf16.mxu0 (!%p138_p2), %v1995_v5 }
   0xd   : > { %s2394_s13 = smov (!%p161_p3, %s1743_s13), 1 }
   0xe   : > { %s1967_s20 = smul.u32 80, %s2394_s13  ;;  %s1848_s6 = sshll.u32 %s2394_s13, 2 }
   0xf   : > { %1884 = vmatpush3.bf16.msra.mxu1 %v1994_v4  ;;  %1904 = vmatpush3.bf16.msra.mxu0 %v1995_v5  ;;  %s170_s10 = scalar_lea.vmem %s2392_s3, %s1848_s6 }
  0x10   : > { %s2069_s27 = scalar_lea.vmem %s2389_s0, %s1967_s20  ;;  %1885 = vmatprep.subr.bf16.mxu1 %v1996_v21  ;;  %1905 = vmatprep.subr.bf16.mxu0 %v1997_v24 }
  0x11   : > { %v2075_v6 = vld [vmem:[%s2069_s27 + $0x8] sm:$0xf]  ;;  %v175_v7 = vld [vmem:[%s2069_s27 + $0xc] sm:$0x1]  ;;  %v2079_v8 = vld [vmem:[%s2069_s27] sm:$0xf] }
  0x12   : > { %v2082_v9 = vcombine.low %v2075_v6, %v175_v7  ;;  %v173_v10 = vld [vmem:[%s2069_s27 + $0x4] sm:$0x1]  ;;  %v2086_v11 = vld [vmem:[%s2069_s27 + $0x18] sm:$0xf]  ;;  %v179_v12 = vld [vmem:[%s2069_s27 + $0x1c] sm:$0x1] }
  0x13   : > { %v1751_v13 = vcombine.low %v2079_v8, %v173_v10  ;;  %v2091_v14 = vcombine.low %v2086_v11, %v179_v12  ;;  %v2094_v15 = vld [vmem:[%s2069_s27 + $0x10] sm:$0xf]  ;;  %v177_v16 = vld [vmem:[%s2069_s27 + $0x14] sm:$0x1]  ;;  %v2098_v17 = vld [vmem:[%s2069_s27 + $0x20] sm:$0xf]  ;;  %1886 = vmatpush3.bf16.msra.mxu1 %v1996_v21  ;;  %1906 = vmatpush3.bf16.msra.mxu0 %v1997_v24 }
  0x14   : > { %v305_v18 = vrot.slane %v2082_v9, 1  ;;  %v1753_v19 = vcombine.low %v2094_v15, %v177_v16  ;;  %v181_v20 = vld [vmem:[%s2069_s27 + $0x24] sm:$0x1]  ;;  %v242_v28 = vshll.u32 %v2082_v9, 16  ;;  %v2117_v31 = vld [vmem:[%s2069_s27 + $0x30] sm:$0xf]  ;;  %1887 = vmatprep.subr.bf16.mxu1 %v1998_v39  ;;  %1907 = vmatprep.subr.bf16.mxu0 %v1999_v44 }
  0x15   : > { %v304_v22 = vrot.slane %v1751_v13, 1  ;;  %v2107_v23 = vcombine.low %v2098_v17, %v181_v20  ;;  %v307_v25 = vrot.slane %v2091_v14, 1  ;;  %v233_v26 = vshrl.u32 %v1751_v13, 16  ;;  %v2120_v32 = vld [vmem:[%s2069_s27 + $0x28] sm:$0xf] }
  0x16   : > { %314 = vrot.lane.b32.xlu0 %v305_v18, %s2016_s7  ;;  %v235_v27 = vshll.u32 %v1751_v13, 16  ;;  %v306_v29 = vrot.slane %v1753_v19, 1  ;;  %v249_v30 = vshll.u32 %v1753_v19, 16  ;;  %v185_v34 = vld [vmem:[%s2069_s27 + $0x34] sm:$0x1]  ;;  %v247_v37 = vshrl.u32 %v1753_v19, 16 }
  0x17   : > { %312 = vrot.lane.b32.xlu1 %v304_v22, %s2016_s7  ;;  %v183_v35 = vld [vmem:[%s2069_s27 + $0x2c] sm:$0x1]  ;;  %v308_v36 = vrot.slane %v2107_v23, 1  ;;  %v240_v38 = vshrl.u32 %v2082_v9, 16  ;;  %v244_v41 = vrot.slane %v242_v28, 1  ;;  %v263_v42 = vshll.u32 %v2107_v23, 16  ;;  %1888 = vmatpush3.bf16.msra.mxu1 %v1998_v39 }
  0x18   : > { %v237_v33 = vrot.slane %v235_v27, 1  ;;  %v2132_v43 = vcombine.low %v2120_v32, %v183_v35  ;;  %v251_v45 = vrot.slane %v249_v30, 1  ;;  %v256_v46 = vshll.u32 %v2091_v14, 16  ;;  %v2141_v48 = vld [vmem:[%s2069_s27 + $0x38] sm:$0xf]  ;;  %1908 = vmatpush3.bf16.msra.mxu0 %v1999_v44  ;;  %1889 = vmatprep.subr.bf16.mxu1 %v2000_v50 }
  0x19   : > { %v1757_v47 = vcombine.low %v2117_v31, %v185_v34  ;;  %v187_v49 = vld [vmem:[%s2069_s27 + $0x3c] sm:$0x1]  ;;  %v254_v52 = vshrl.u32 %v2091_v14, 16  ;;  %v261_v53 = vshrl.u32 %v2107_v23, 16  ;;  %v245_v54 = vor.u32 %v244_v41, %v240_v38  ;;  %v2156_v58 = vld [vmem:[%s2069_s27 + $0x40] sm:$0xf]  ;;  %1909 = vmatprep.subr.bf16.mxu0 %v2001_v51 }
  0x1a   : > { %318 = vrot.lane.b32.xlu0 %v307_v25, %s2016_s7  ;;  %v238_v40 = vor.u32 %v237_v33, %v233_v26  ;;  %v265_v55 = vrot.slane %v263_v42, 1  ;;  %v270_v56 = vshll.u32 %v2132_v43, 16  ;;  %v1758_v57 = vcombine.low %v2141_v48, %v187_v49  ;;  %v189_v62 = vld [vmem:[%s2069_s27 + $0x44] sm:$0x1]  ;;  %v2172_v12 = vld [vmem:[%s2069_s27 + $0x48] sm:$0xf] }
  0x1b   : > { %316 = vrot.lane.b32.xlu1 %v306_v29, %s2016_s7  ;;  %v252_v59 = vor.u32 %v251_v45, %v247_v37  ;;  %v258_v60 = vrot.slane %v256_v46, 1  ;;  %v277_v61 = vshll.u32 %v1757_v47, 16  ;;  %v275_v0 = vshrl.u32 %v1757_v47, 16  ;;  %1890 = vmatpush3.bf16.msra.mxu1 %v2000_v50  ;;  %v191_v13 = vld [vmem:[%s2069_s27 + $0x4c] sm:$0x1] }
  0x1c   : > { %v268_v1 = vshrl.u32 %v2132_v43, 16  ;;  %v266_v2 = vor.u32 %v265_v55, %v261_v53  ;;  %v272_v3 = vrot.slane %v270_v56, 1  ;;  %v284_v4 = vshll.u32 %v1758_v57, 16  ;;  %1910 = vmatpush3.bf16.msra.mxu0 %v2001_v51  ;;  %1939 = vmatprep.subr.bf16.mxu1 %v2163_v63 }
  0x1d   : > { %v1759_v5 = vcombine.low %v2156_v58, %v189_v62  ;;  %v259_v7 = vor.u32 %v258_v60, %v254_v52  ;;  %v279_v9 = vrot.slane %v277_v61, 1  ;;  %v282_v10 = vshrl.u32 %v1758_v57, 16  ;;  %1919 = vmatprep.subr.bf16.mxu0 %v2163_v63  ;;  %v2003_v60 = vld [vmem:[%s2390_s1 + $0x68] sm:$0xff]  }
  0x1e   : > { %288 = vrot.lane.b32.xlu0 %v238_v40, %s2017_s18  ;;  %v273_v14 = vor.u32 %v272_v3, %v268_v1  ;;  %v286_v16 = vrot.slane %v284_v4, 1  ;;  %v1800_v21 = vcombine.low %v2172_v12, %v191_v13  ;;  %v309_v22 = vrot.slane %v2132_v43, 1  ;;  %v2005_v4 = vld [vmem:[%s2390_s1 + $0x78] sm:$0xff]  }
  0x1f   : > { %320 = vrot.lane.b32.xlu1 %v308_v36, %s2016_s7  ;;  %v390_v18 = vshll.u32 %v1759_v5, 16  ;;  %v280_v19 = vor.u32 %v279_v9, %v275_v0  ;;  %v388_v23 = vshrl.u32 %v1759_v5, 16  ;;  %v310_v25 = vrot.slane %v1757_v47, 1 }
  0x20   : > { %v287_v20 = vor.u32 %v286_v16, %v282_v10  ;;  %v678_v26 = vshll.u32 %v1800_v21, 16  ;;  %v311_v28 = vrot.slane %v1758_v57, 1  ;;  %v676_v29 = vshrl.u32 %v1800_v21, 16  ;;  %v2006_v10 = vld [vmem:[%s2390_s1 + $0x80] sm:$0xff]  }
  0x21   : > { %v392_v24 = vrot.slane %v390_v18, 1  ;;  %v396_v33 = vrot.slane %v1759_v5, 1  ;;  %v684_v35 = vrot.slane %v1800_v21, 1  ;;  %v2007_v21 = vld [vmem:[%s2390_s1 + $0x88] sm:$0xff]  }
  0x22   : > { %290 = vrot.lane.b32.xlu0 %v245_v54, %s2017_s18  ;;  %v680_v30 = vrot.slane %v678_v26, 1 }
  0x23   : > { %292 = vrot.lane.b32.xlu1 %v252_v59, %s2017_s18  ;;  %v393_v27 = vor.u32 %v392_v24, %v388_v23 }
  0x24   : > { %v681_v34 = vor.u32 %v680_v30, %v676_v29 }
  0x26   : > { %296 = vrot.lane.b32.xlu0 %v266_v2, %s2017_s18 }
  0x27   : > { %294 = vrot.lane.b32.xlu1 %v259_v7, %s2017_s18 }
  0x2a   : > { %298 = vrot.lane.b32.xlu0 %v273_v14, %s2017_s18 }
  0x2b   : > { %300 = vrot.lane.b32.xlu1 %v280_v19, %s2017_s18 }
  0x2e   : > { %302 = vrot.lane.b32.xlu0 %v287_v20, %s2017_s18 }
  0x2f   : > { %322 = vrot.lane.b32.xlu1 %v309_v22, %s2016_s7 }
  0x32   : > { %324 = vrot.lane.b32.xlu0 %v310_v25, %s2016_s7 }
  0x33   : > { %394 = vrot.lane.b32.xlu1 %v393_v27, %s2017_s18 }
  0x36   : > { %326 = vrot.lane.b32.xlu0 %v311_v28, %s2016_s7 }
  0x37   : > { %397 = vrot.lane.b32.xlu1 %v396_v33, %s2016_s7 }
  0x3a   : > { %682 = vrot.lane.b32.xlu0 %v681_v34, %s2017_s18 }
  0x3b   : > { %685 = vrot.lane.b32.xlu1 %v684_v35, %s2016_s7 }
  0x88   : > { %v315_v36 = vpop.permute.xlu0 %314 }
  0x89   : > { %v313_v37 = vpop.permute.xlu1 %312 }
  0x8c   : > { %v319_v38 = vpop.permute.xlu0 %318 }
  0x8d   : > { %v317_v39 = vpop.permute.xlu1 %316 }
  0x90   : > { %v289_v40 = vpop.permute.xlu0 %288 }
  0x91   : > { %v321_v41 = vpop.permute.xlu1 %320  ;;  %v331_v42 = vsel %vm328_vm0, %v2079_v8, %v289_v40 }
  0x92   : > { %v355_v49 = vsel %vm353_vm1, %v331_v42, %v313_v37  ;;  %v2018_v42 = vmov 1966171168  }
  0x94   : > { %v291_v43 = vpop.permute.xlu0 %290 }
  0x95   : > { %v293_v44 = vpop.permute.xlu1 %292  ;;  %v334_v45 = vsel %vm328_vm0, %v2075_v6, %v291_v43  ;;  %v853_v43 = vunpack.c.l.s4 %v2018_v42 }
  0x96   : > { %v337_v46 = vsel %vm328_vm0, %v2094_v15, %v293_v44  ;;  %v357_v47 = vsel %vm353_vm1, %v334_v45, %v315_v36  ;;  %v855_v44 = vlaneseq  ;;  %v2019_v45 = vmov 1935823168  }
  0x97   : > { %v359_v50 = vsel %vm353_vm1, %v337_v46, %v317_v39  ;;  %v1786_v51 = vcombine.low %v355_v49, %v357_v47  ;;  %v1224_v46 = vunpack.c.l.s4 %v2019_v45  ;;  %v1824_v49 = vld [vmem:[%s2391_s2] ss:$0 sm:$0xff] }
  0x98   : > { %v297_v52 = vpop.permute.xlu0 %296  ;;  %v1772_v53 = vcombine.low %v357_v47, %v359_v50 }
  0x99   : > { %v295_v8 = vpop.permute.xlu1 %294  ;;  %v343_v54 = vsel %vm328_vm0, %v2098_v17, %v297_v52  ;;  %1911 = vmatprep.mubr.msk.bf16.mxu0 %vm473_vm2, %v1786_v51  ;;  %v2004_v17 = vld [vmem:[%s2390_s1 + $0x70] sm:$0xff]  }
  0x9a   : > { %v340_v6 = vsel %vm328_vm0, %v2086_v11, %v295_v8  ;;  %v363_v15 = vsel %vm353_vm1, %v343_v54, %v321_v41  ;;  %1891 = vmatprep.mubr.msk.bf16.mxu1 %vm473_vm2, %v1772_v53  ;;  %v854_v54 = vunpack.c.0.s8 %v853_v43 }
  0x9b   : > { %v361_v55 = vsel %vm353_vm1, %v340_v6, %v319_v38 }
  0x9c   : > { %v1773_v56 = vcombine.low %v361_v55, %v363_v15  ;;  %v1787_v57 = vcombine.low %v359_v50, %v361_v55  ;;  %v299_v59 = vpop.permute.xlu0 %298 }
  0x9d   : > { %v301_v61 = vpop.permute.xlu1 %300  ;;  %v346_v62 = vsel %vm328_vm0, %v2120_v32, %v299_v59 }
  0x9e   : > { %1892 = vmatmul.mubr.msk.bf16.vlgmr.msra.gmra.mrb[0].mxu1 %vm473_vm2, %v1773_v56  ;;  %1912 = vmatmul.mubr.msk.bf16.vlgmr.msra.gmra.mrb[0].mxu0 %vm473_vm2, %v1787_v57  ;;  %v349_v3 = vsel %vm328_vm0, %v2117_v31, %v301_v61  ;;  %v856_v56 = vshrl.u32 %v855_v44, 7 }
  0x9f   : > { %1920 = vmatpush3.bf16.msra.mxu0 %v2163_v63  ;;  %1945 = vmatpush3.bf16.msra.mxu1 %v2163_v63 }
  0xa0   : > { %1921 = vmatprep.subr.bf16.mxu0 %v2003_v60  ;;  %1940 = vmatprep.subr.bf16.mxu1 %v2003_v60  ;;  %v303_v11 = vpop.permute.xlu0 %302 }
  0xa1   : > { %v323_v0 = vpop.permute.xlu1 %322  ;;  %v352_v9 = vsel %vm328_vm0, %v2141_v48, %v303_v11 }
  0xa2   : > { %v365_v1 = vsel %vm353_vm1, %v346_v62, %v323_v0 }
  0xa3   : > { %v1788_v2 = vcombine.low %v363_v15, %v365_v1  ;;  %1922 = vmatpush3.bf16.msra.mxu0 %v2003_v60  ;;  %1946 = vmatpush3.bf16.msra.mxu1 %v2003_v60 }
  0xa4   : > { %1923 = vmatprep.subr.bf16.mxu0 %v2004_v17  ;;  %1941 = vmatprep.subr.bf16.mxu1 %v2004_v17  ;;  %v325_v63 = vpop.permute.xlu0 %324 }
  0xa5   : > { %v395_v5 = vpop.permute.xlu1 %394  ;;  %1915 = vmatprep.mubr.msk.bf16.mxu0 %vm473_vm2, %v1788_v2  ;;  %v367_v32 = vsel %vm353_vm1, %v349_v3, %v325_v63 }
  0xa6   : > { %v1774_v7 = vcombine.low %v365_v1, %v367_v32  ;;  %v401_v13 = vsel %vm328_vm0, %v2156_v58, %v395_v5 }
  0xa7   : > { %1924 = vmatpush3.bf16.msra.mxu0 %v2004_v17  ;;  %1947 = vmatpush3.bf16.msra.mxu1 %v2004_v17 }
  0xa8   : > { %1895 = vmatprep.mubr.msk.bf16.mxu1 %vm473_vm2, %v1774_v7  ;;  %1925 = vmatprep.subr.bf16.mxu0 %v2005_v4  ;;  %v327_v31 = vpop.permute.xlu0 %326 }
  0xa9   : > { %v398_v14 = vpop.permute.xlu1 %397  ;;  %1942 = vmatprep.subr.bf16.mxu1 %v2005_v4  ;;  %v369_v16 = vsel %vm353_vm1, %v352_v9, %v327_v31 }
  0xaa   : > { %v403_v18 = vsel %vm353_vm1, %v401_v13, %v398_v14  ;;  %v1789_v19 = vcombine.low %v367_v32, %v369_v16  ;;  %v2251_v32 = vsub.s32 %v854_v54, %v856_v56 }
  0xab   : > { %v1775_v20 = vcombine.low %v369_v16, %v403_v18  ;;  %1926 = vmatpush3.bf16.msra.mxu0 %v2005_v4  ;;  %1948 = vmatpush3.bf16.msra.mxu1 %v2005_v4 }
  0xac   : > { %1916 = vmatmul.mubr.msk.bf16.gmra.mrb[4].mxu0 %vm473_vm2, %v1789_v19  ;;  %1927 = vmatprep.subr.bf16.mxu0 %v2006_v10  ;;  %v683_v48 = vpop.permute.xlu0 %682 }
  0xad   : > { %1896 = vmatmul.mubr.msk.bf16.gmra.mrb[4].mxu1 %vm473_vm2, %v1775_v20  ;;  %1943 = vmatprep.subr.bf16.mxu1 %v2006_v10  ;;  %v689_v58 = vsel %vm328_vm0, %v2172_v12, %v683_v48  ;;  %v686_v22 = vpop.permute.xlu1 %685 }
  0xae   : > { %1931 = vmatprep.mubr.msk.bf16.mxu0 %vm473_vm2, %v1787_v57  ;;  %1935 = vmatprep.mubr.msk.bf16.mxu1 %vm473_vm2, %v1789_v19  ;;  %v691_v23 = vsel %vm353_vm1, %v689_v58, %v686_v22  ;;  %v1225_v57 = vunpack.c.0.s8 %v1224_v46 }
  0xaf   : > { %1928 = vmatpush3.bf16.msra.mxu0 %v2006_v10  ;;  %1949 = vmatpush3.bf16.msra.mxu1 %v2006_v10  ;;  %v1813_v24 = vcombine.low %v403_v18, %v691_v23 }
  0xb0   : > { %1929 = vmatprep.subr.bf16.mxu0 %v2007_v21  ;;  %1944 = vmatprep.subr.bf16.mxu1 %v2007_v21  ;;  %v2253_v7 = vsub.s32 %v1225_v57, %v856_v56 }
  0xb3   : > { %1930 = vmatpush3.bf16.msra.mxu0 %v2007_v21  ;;  %1950 = vmatpush3.bf16.msra.mxu1 %v2007_v21 }
  0xb6   : > { %1932 = vmatmul.mubr.msk.bf16.vlgmr.msra.gmra.mrb[0].mxu0 %vm473_vm2, %v1788_v2  ;;  %1936 = vmatmul.mubr.msk.bf16.vlgmr.msra.gmra.mrb[8].mxu1 %vm473_vm2, %v1813_v24 }
 0x171   : > { %v1893_v25 = vpop.f32.mrb[0].mxu1 }
 0x172   : > { %v520_v12 = vpop.f32.mrb[1].mxu1 }
 0x173   : > { %v1894_v26 = vpop.f32.mrb[2].mxu1 }
 0x174   : > { %v523_v27 = vpop.f32.mrb[3].mxu1 }
 0x17f   : > { %v1917_v28 = vpop.f32.mrb[4].mxu0 }
 0x180   : > { %v1897_v29 = vpop.f32.mrb[4].mxu1  ;;  %v655_v30 = vpop.f32.mrb[5].mxu0 }
 0x181   : > { %v664_v33 = vadd.f32 %v1917_v28, %v1897_v29  ;;  %v536_v34 = vpop.f32.mrb[5].mxu1  ;;  %v1918_v35 = vpop.f32.mrb[6].mxu0 }
 0x182   : > { %v656_v36 = vadd.f32 %v655_v30, %v536_v34  ;;  %v1898_v37 = vpop.f32.mrb[6].mxu1  ;;  %v658_v38 = vpop.f32.mrb[7].mxu0 }
 0x183   : > { %v667_v39 = vadd.f32 %v1918_v35, %v1898_v37  ;;  %v539_v40 = vpop.f32.mrb[7].mxu1 }
 0x184   : > { %v659_v41 = vadd.f32 %v658_v38, %v539_v40 }
 0x189   : > { %v1933_v47 = vpop.f32.mrb[0].mxu0  ;;  %v1937_v50 = vpop.f32.mrb[8].mxu1 }
 0x18a   : > { %v1951_v51 = vadd.f32 %v1933_v47, %v1893_v25  ;;  %v818_v52 = vadd.f32 %v1937_v50, %v664_v33  ;;  %v781_v53 = vpop.f32.mrb[1].mxu0  ;;  %v797_v8 = vpop.f32.mrb[9].mxu1 }
 0x18b   : > { %v1952_v6 = vadd.f32 %v781_v53, %v520_v12  ;;  %v816_v15 = vadd.f32 %v797_v8, %v656_v36  ;;  %v1934_v55 = vpop.f32.mrb[2].mxu0  ;;  %v1938_v59 = vpop.f32.mrb[10].mxu1 }
 0x18c   : > { %v829_v60 = vadd.f32 %v1951_v51, %v1824_v49  ;;  %v833_v61 = vadd.f32 %v1824_v49, %v818_v52  ;;  %v1953_v11 = vadd.f32 %v1934_v55, %v1894_v26  ;;  %v819_v17 = vadd.f32 %v1938_v59, %v667_v39  ;;  %v784_v62 = vpop.f32.mrb[3].mxu0  ;;  %v800_v0 = vpop.f32.mrb[11].mxu1 }
 0x18d   : > { %v827_v1 = vadd.f32 %v1952_v6, %v1824_v49  ;;  %v831_v2 = vadd.f32 %v1824_v49, %v816_v15  ;;  %v1954_v3 = vadd.f32 %v784_v62, %v523_v27  ;;  %v817_v63 = vadd.f32 %v800_v0, %v659_v41 }
 0x18e   : > { %v830_v4 = vadd.f32 %v1953_v11, %v1824_v49  ;;  %v834_v5 = vadd.f32 %v1824_v49, %v819_v17  ;;  %v837_v10 = vmax.f32 %v829_v60, 0.0  ;;  %v841_v13 = vmax.f32 %v833_v61, 0.0 }
 0x18f   : > { %v828_v9 = vadd.f32 %v1954_v3, %v1824_v49  ;;  %v832_v31 = vadd.f32 %v1824_v49, %v817_v63  ;;  %v835_v18 = vmax.f32 %v827_v1, 0.0  ;;  %v839_v19 = vmax.f32 %v831_v2, 0.0 }
 0x190   : > { %v838_v14 = vmax.f32 %v830_v4, 0.0  ;;  %v842_v16 = vmax.f32 %v834_v5, 0.0 }
 0x191   : > { %v836_v20 = vmax.f32 %v828_v9, 0.0  ;;  %v840_v48 = vmax.f32 %v832_v31, 0.0 }
 0x192   : > { %v844_v21 = vpack.c.bf16 %v838_v14, %v837_v10  ;;  %v1826_v58 = vpack.c.bf16 %v838_v14, %v838_v14  ;;  %v846_v22 = vpack.c.bf16 %v842_v16, %v841_v13  ;;  %v1828_v23 = vpack.c.bf16 %v842_v16, %v842_v16 }
 0x193   : > { %v843_v24 = vpack.c.bf16 %v836_v20, %v835_v18  ;;  %v1825_v25 = vpack.c.bf16 %v836_v20, %v836_v20  ;;  %v845_v12 = vpack.c.bf16 %v840_v48, %v839_v19  ;;  %v1827_v26 = vpack.c.bf16 %v840_v48, %v840_v48 }
 0x194   : > { %v907_v27 = vrot.slane %v844_v21, %v2251_v32  ;;  %v914_v28 = vrot.slane %v1826_v58, %v2251_v32  ;;  %v1005_v29 = vrot.slane %v846_v22, %v2251_v32  ;;  %v1012_v30 = vrot.slane %v1828_v23, %v2251_v32 }
 0x195   : > { %v2260_v33 = vrot.slane %v843_v24, %v2251_v32  ;;  %v2263_v34 = vrot.slane %v1825_v25, %v2251_v32  ;;  %v2266_v35 = vrot.slane %v845_v12, %v2251_v32  ;;  %v2269_v36 = vrot.slane %v1827_v26, %v2251_v32 }
 0x196   : > { %v915_v37 = vcombine.high %v907_v27, %v907_v27  ;;  %v916_v38 = vcombine.high %v914_v28, %v914_v28  ;;  %v923_v39 = vrot.slane %v907_v27, %v2251_v32  ;;  %v930_v40 = vrot.slane %v914_v28, %v2251_v32 }
 0x197   : > { %v1013_v41 = vcombine.high %v1005_v29, %v1005_v29  ;;  %v1014_v42 = vcombine.high %v1012_v30, %v1012_v30  ;;  %v1021_v43 = vrot.slane %v1005_v29, %v2251_v32  ;;  %v1028_v44 = vrot.slane %v1012_v30, %v2251_v32 }
 0x198   : > { %v937_v45 = vrot.slane %v915_v37, %v2251_v32  ;;  %v944_v46 = vrot.slane %v916_v38, %v2251_v32  ;;  %v945_v47 = vcombine.high %v923_v39, %v923_v39  ;;  %v946_v49 = vcombine.high %v930_v40, %v930_v40 }
 0x199   : > { %v1083_v50 = vmax.bf16 %v930_v40, %v923_v39  ;;  %v1035_v51 = vrot.slane %v1013_v41, %v2251_v32  ;;  %v1042_v52 = vrot.slane %v1014_v42, %v2251_v32  ;;  %v1043_v53 = vcombine.high %v1021_v43, %v1021_v43 }
 0x19a   : > { %v947_v8 = vcombine.high %v937_v45, %v937_v45  ;;  %v948_v54 = vcombine.high %v944_v46, %v944_v46  ;;  %v1084_v6 = vmax.bf16 %v944_v46, %v937_v45  ;;  %v1085_v15 = vmax.bf16 %v946_v49, %v945_v47 }
 0x19b   : > { %v1116_v55 = vshrl.u32 %v1083_v50, 16  ;;  %v1044_v56 = vcombine.high %v1028_v44, %v1028_v44  ;;  %v1045_v57 = vcombine.high %v1035_v51, %v1035_v51  ;;  %v1046_v59 = vcombine.high %v1042_v52, %v1042_v52 }
 0x19c   : > { %v1086_v60 = vmax.bf16 %v948_v54, %v947_v8  ;;  %v1121_v61 = vshrl.u32 %v1084_v6, 16  ;;  %v1126_v11 = vshrl.u32 %v1085_v15, 16  ;;  %v1091_v17 = vmax.bf16 %v1028_v44, %v1021_v43 }
 0x19d   : > { %v1195_v62 = vmax.bf16 %v1116_v55, %v1083_v50  ;;  %v1092_v0 = vmax.bf16 %v1042_v52, %v1035_v51  ;;  %v1093_v1 = vmax.bf16 %v1044_v56, %v1043_v53  ;;  %v1094_v2 = vmax.bf16 %v1046_v59, %v1045_v57 }
 0x19e   : > { %v1131_v3 = vshrl.u32 %v1086_v60, 16  ;;  %v1196_v63 = vmax.bf16 %v1121_v61, %v1084_v6  ;;  %v1197_v4 = vmax.bf16 %v1126_v11, %v1085_v15  ;;  %v1156_v5 = vshrl.u32 %v1091_v17, 16 }
 0x19f   : > { %v1285_v9 = vrot.slane %v1195_v62, %v2253_v7  ;;  %v1161_v31 = vshrl.u32 %v1092_v0, 16  ;;  %v1166_v10 = vshrl.u32 %v1093_v1, 16  ;;  %v1171_v13 = vshrl.u32 %v1094_v2, 16 }
 0x1a0   : > { %v1198_v14 = vmax.bf16 %v1131_v3, %v1086_v60  ;;  %v1299_v16 = vrot.slane %v1196_v63, %v2253_v7  ;;  %v1313_v18 = vrot.slane %v1197_v4, %v2253_v7  ;;  %v1203_v19 = vmax.bf16 %v1156_v5, %v1091_v17 }
 0x1a1   : > { %v1292_v20 = vrot.slane %v1285_v9, %v2253_v7  ;;  %v1204_v48 = vmax.bf16 %v1161_v31, %v1092_v0  ;;  %v1205_v21 = vmax.bf16 %v1166_v10, %v1093_v1  ;;  %v1206_v58 = vmax.bf16 %v1171_v13, %v1094_v2 }
 0x1a2   : > { %v1306_v22 = vrot.slane %v1299_v16, %v2253_v7  ;;  %v1320_v23 = vrot.slane %v1313_v18, %v2253_v7  ;;  %v1327_v24 = vrot.slane %v1198_v14, %v2253_v7  ;;  %v1397_v25 = vrot.slane %v1203_v19, %v2253_v7 }
 0x1a3   : > { %v1451_v12 = vunpack.c.l.b16 %v1292_v20  ;;  %v1411_v26 = vrot.slane %v1204_v48, %v2253_v7  ;;  %v1425_v27 = vrot.slane %v1205_v21, %v2253_v7  ;;  %v1439_v28 = vrot.slane %v1206_v58, %v2253_v7 }
 0x1a4   : > { %v1334_v29 = vrot.slane %v1327_v24, %v2253_v7  ;;  %v1452_v30 = vunpack.c.l.b16 %v1306_v22  ;;  %v1453_v37 = vunpack.c.l.b16 %v1320_v23  ;;  %v1404_v38 = vrot.slane %v1397_v25, %v2253_v7 }
 0x1a5   : > { %v1418_v39 = vrot.slane %v1411_v26, %v2253_v7  ;;  %v1432_v40 = vrot.slane %v1425_v27, %v2253_v7  ;;  %v1446_v41 = vrot.slane %v1439_v28, %v2253_v7  ;;  %v866_v42 = vcombine.high %v2260_v33, %v2260_v33 }
 0x1a6   : > { %v1454_v43 = vunpack.c.l.b16 %v1334_v29  ;;  %v1472_v44 = vrot.slane %v1452_v30, 7  ;;  %v2297_v45 = vrot.slane %v1453_v37, 6  ;;  %v1459_v46 = vunpack.c.l.b16 %v1404_v38 }
 0x1a7   : > { %v1460_v47 = vunpack.c.l.b16 %v1418_v39  ;;  %v1461_v49 = vunpack.c.l.b16 %v1432_v40  ;;  %v1462_v50 = vunpack.c.l.b16 %v1446_v41  ;;  %v867_v51 = vcombine.high %v2263_v34, %v2263_v34 }
 0x1a8   : > { %v1473_v52 = vsel %vm1464_vm3, %v1472_v44, %v1451_v12  ;;  %v2302_v53 = vrot.slane %v1454_v43, 5  ;;  %v874_v8 = vrot.slane %v2260_v33, %v2251_v32  ;;  %v881_v54 = vrot.slane %v2263_v34, %v2251_v32 }
 0x1a9   : > { %v1484_v6 = vrot.slane %v1460_v47, 7  ;;  %v2308_v15 = vrot.slane %v1461_v49, 6  ;;  %v2310_v55 = vrot.slane %v1462_v50, 5  ;;  %v888_v56 = vrot.slane %v866_v42, %v2251_v32 }
 0x1aa   : > { %v895_v57 = vrot.slane %v867_v51, %v2251_v32  ;;  %v896_v59 = vcombine.high %v874_v8, %v874_v8  ;;  %v897_v60 = vcombine.high %v881_v54, %v881_v54  ;;  %v1079_v61 = vmax.bf16 %v881_v54, %v874_v8 }
 0x1ab   : > { %v2315_v11 = vsel %vm1464_vm3, %v1484_v6, %v1459_v46  ;;  %v898_v17 = vcombine.high %v888_v56, %v888_v56  ;;  %v964_v33 = vcombine.high %v2266_v35, %v2266_v35  ;;  %v965_v34 = vcombine.high %v2269_v36, %v2269_v36 }
 0x1ac   : > { %v899_v62 = vcombine.high %v895_v57, %v895_v57  ;;  %v1080_v0 = vmax.bf16 %v895_v57, %v888_v56  ;;  %v1081_v1 = vmax.bf16 %v897_v60, %v896_v59  ;;  %v1096_v2 = vshrl.u32 %v1079_v61, 16 }
 0x1ad   : > { %v972_v3 = vrot.slane %v2266_v35, %v2251_v32  ;;  %v979_v63 = vrot.slane %v2269_v36, %v2251_v32  ;;  %v986_v4 = vrot.slane %v964_v33, %v2251_v32  ;;  %v993_v5 = vrot.slane %v965_v34, %v2251_v32 }
 0x1ae   : > { %v1082_v9 = vmax.bf16 %v899_v62, %v898_v17  ;;  %v1101_v31 = vshrl.u32 %v1080_v0, 16  ;;  %v1106_v10 = vshrl.u32 %v1081_v1, 16  ;;  %v1191_v13 = vmax.bf16 %v1096_v2, %v1079_v61 }
 0x1af   : > { %v994_v14 = vcombine.high %v972_v3, %v972_v3  ;;  %v995_v16 = vcombine.high %v979_v63, %v979_v63  ;;  %v996_v18 = vcombine.high %v986_v4, %v986_v4  ;;  %v997_v19 = vcombine.high %v993_v5, %v993_v5 }
 0x1b0   : > { %v1111_v20 = vshrl.u32 %v1082_v9, 16  ;;  %v1192_v48 = vmax.bf16 %v1101_v31, %v1080_v0  ;;  %v1193_v21 = vmax.bf16 %v1106_v10, %v1081_v1  ;;  %v1229_v35 = vrot.slane %v1191_v13, %v2253_v7 }
 0x1b1   : > { %v1087_v58 = vmax.bf16 %v979_v63, %v972_v3  ;;  %v1088_v36 = vmax.bf16 %v993_v5, %v986_v4  ;;  %v1089_v22 = vmax.bf16 %v995_v16, %v994_v14  ;;  %v1090_v23 = vmax.bf16 %v997_v19, %v996_v18 }
 0x1b2   : > { %v1194_v24 = vmax.bf16 %v1111_v20, %v1082_v9  ;;  %v1236_v25 = vrot.slane %v1229_v35, %v2253_v7  ;;  %v1243_v12 = vrot.slane %v1192_v48, %v2253_v7  ;;  %v1257_v26 = vrot.slane %v1193_v21, %v2253_v7 }
 0x1b3   : > { %v1136_v27 = vshrl.u32 %v1087_v58, 16  ;;  %v1141_v28 = vshrl.u32 %v1088_v36, 16  ;;  %v1146_v29 = vshrl.u32 %v1089_v22, 16  ;;  %v1151_v30 = vshrl.u32 %v1090_v23, 16 }
 0x1b4   : > { %v1250_v37 = vrot.slane %v1243_v12, %v2253_v7  ;;  %v1264_v38 = vrot.slane %v1257_v26, %v2253_v7  ;;  %v1271_v39 = vrot.slane %v1194_v24, %v2253_v7  ;;  %v1447_v40 = vunpack.c.l.b16 %v1236_v25 }
 0x1b5   : > { %v1199_v41 = vmax.bf16 %v1136_v27, %v1087_v58  ;;  %v1200_v42 = vmax.bf16 %v1141_v28, %v1088_v36  ;;  %v1201_v43 = vmax.bf16 %v1146_v29, %v1089_v22  ;;  %v1202_v44 = vmax.bf16 %v1151_v30, %v1090_v23 }
 0x1b6   : > { %v1278_v46 = vrot.slane %v1271_v39, %v2253_v7  ;;  %v1448_v47 = vunpack.c.l.b16 %v1250_v37  ;;  %v1449_v49 = vunpack.c.l.b16 %v1264_v38  ;;  %v1475_v50 = vsel %vm1467_vm4, %v2297_v45, %v1473_v52 }
 0x1b7   : > { %v1341_v51 = vrot.slane %v1199_v41, %v2253_v7  ;;  %v1355_v8 = vrot.slane %v1200_v42, %v2253_v7  ;;  %v1369_v54 = vrot.slane %v1201_v43, %v2253_v7  ;;  %v1383_v6 = vrot.slane %v1202_v44, %v2253_v7 }
 0x1b8   : > { %v1450_v56 = vunpack.c.l.b16 %v1278_v46  ;;  %v1463_v57 = vrot.slane %v1448_v47, 7  ;;  %v1466_v59 = vrot.slane %v1449_v49, 6  ;;  %v1477_v60 = vsel %vm1470_vm5, %v2302_v53, %v1475_v50 }
 0x1b9   : > { %v1348_v61 = vrot.slane %v1341_v51, %v2253_v7  ;;  %v1362_v17 = vrot.slane %v1355_v8, %v2253_v7  ;;  %v1376_v45 = vrot.slane %v1369_v54, %v2253_v7  ;;  %v1390_v52 = vrot.slane %v1383_v6, %v2253_v7 }
 0x1ba   : > { %v1465_v33 = vsel %vm1464_vm3, %v1463_v57, %v1447_v40  ;;  %v1469_v34 = vrot.slane %v1450_v56, 5  ;;  %v1487_v62 = vsel %vm1467_vm4, %v2308_v15, %v2315_v11  ;;  %v1491_v0 = vpack.c.b16 %v1477_v60, %v1477_v60 }
 0x1bb   : > { %v1456_v1 = vunpack.c.l.b16 %v1362_v17  ;;  %v1457_v2 = vunpack.c.l.b16 %v1376_v45  ;;  %v1458_v3 = vunpack.c.l.b16 %v1390_v52  ;;  %v1455_v53 = vunpack.c.l.b16 %v1348_v61 }
 0x1bc   : > { %v1468_v63 = vsel %vm1467_vm4, %v1466_v59, %v1465_v33  ;;  %v1489_v4 = vsel %vm1470_vm5, %v2310_v55, %v1487_v62  ;;  %v1522_v5 = vrot.slane %v1491_v0, %v2251_v32 }
 0x1bd   : > { %v1478_v7 = vrot.slane %v1456_v1, 7  ;;  %v1480_v9 = vrot.slane %v1457_v2, 6  ;;  %v1482_v31 = vrot.slane %v1458_v3, 5  ;;  %v1471_v10 = vsel %vm1470_vm5, %v1469_v34, %v1468_v63 }
 0x1be   : > { %v1490_v13 = vpack.c.b16 %v1471_v10, %v1471_v10  ;;  %v1493_v14 = vpack.c.b16 %v1489_v4, %v1489_v4  ;;  %v1530_v15 = vrot.slane %v1522_v5, %v2251_v32  ;;  %v1523_v11 = vcombine.high %v1522_v5, %v1522_v5 }
 0x1bf   : > { %v1479_v16 = vsel %vm1464_vm3, %v1478_v7, %v1455_v53 }
 0x1c0   : > { %v1481_v18 = vsel %vm1467_vm4, %v1480_v9, %v1479_v16  ;;  %v1500_v19 = vrot.slane %v1490_v13, %v2251_v32  ;;  %v1566_v55 = vrot.slane %v1493_v14, %v2251_v32  ;;  %v1586_v48 = vshrl.u32 %v1530_v15, 16 }
 0x1c1   : > { %v1483_v20 = vsel %vm1470_vm5, %v1482_v31, %v1481_v18  ;;  %v1537_v21 = vrot.slane %v1523_v11, %v2251_v32 }
 0x1c2   : > { %v1492_v35 = vpack.c.b16 %v1483_v20, %v1483_v20  ;;  %v1508_v58 = vrot.slane %v1500_v19, %v2251_v32  ;;  %v1574_v36 = vrot.slane %v1566_v55, %v2251_v32  ;;  %v1501_v22 = vcombine.high %v1500_v19, %v1500_v19 }
 0x1c3   : > { %v1567_v23 = vcombine.high %v1566_v55, %v1566_v55  ;;  %v1592_v26 = vshrl.u32 %v1537_v21, 16 }
 0x1c4   : > { %v1544_v24 = vrot.slane %v1492_v35, %v2251_v32  ;;  %v1585_v25 = vshrl.u32 %v1508_v58, 16  ;;  %v1515_v12 = vrot.slane %v1501_v22, %v2251_v32  ;;  %v1598_v27 = vshrl.u32 %v1574_v36, 16 }
 0x1c5   : > { %v1581_v28 = vrot.slane %v1567_v23, %v2251_v32  ;;  %v1584_v29 = vpack.i.b16 %v1530_v15, %v1508_v58 }
 0x1c6   : > { %v1552_v30 = vrot.slane %v1544_v24, %v2251_v32  ;;  %v1587_v37 = vpack.i.b16 %v1586_v48, %v1585_v25  ;;  %v1545_v38 = vcombine.high %v1544_v24, %v1544_v24  ;;  %v1591_v39 = vshrl.u32 %v1515_v12, 16 }
 0x1c7   : > { %v1604_v40 = vshrl.u32 %v1581_v28, 16  ;;  %v1590_v41 = vpack.i.b16 %v1537_v21, %v1515_v12 }
 0x1c8   : > { %v1597_v42 = vshrl.u32 %v1552_v30, 16  ;;  %v1559_v43 = vrot.slane %v1545_v38, %v2251_v32  ;;  %v1593_v44 = vpack.i.b16 %v1592_v26, %v1591_v39  ;;  %v1596_v46 = vpack.i.b16 %v1574_v36, %v1552_v30 }
 0x1ca   : > { %v1599_v47 = vpack.i.b16 %v1598_v27, %v1597_v42  ;;  %v1603_v49 = vshrl.u32 %v1559_v43, 16  ;;  %v1606_v50 = vcombine.low %v1584_v29, %v1596_v46  ;;  %v1602_v51 = vpack.i.b16 %v1581_v28, %v1559_v43 }
 0x1cc   : > { %v1621_v8 = vcombine.low %v1587_v37, %v1599_v47  ;;  %v1605_v54 = vpack.i.b16 %v1604_v40, %v1603_v49  ;;  %v1613_v6 = vrot.slane %v1606_v50, %v2251_v32  ;;  %v1638_v56 = vcombine.low %v1590_v41, %v1602_v51 }
 0x1ce   : > { %v1628_v57 = vrot.slane %v1621_v8, %v2251_v32  ;;  %v1653_v59 = vcombine.low %v1593_v44, %v1605_v54  ;;  %v1620_v60 = vrot.slane %v1613_v6, %v2251_v32  ;;  %v1645_v61 = vrot.slane %v1638_v56, %v2251_v32 }
 0x1d0   : > { %v1635_v17 = vrot.slane %v1628_v57, %v2251_v32  ;;  %v1660_v45 = vrot.slane %v1653_v59, %v2251_v32  ;;  %v1652_v52 = vrot.slane %v1645_v61, %v2251_v32 }
 0x1d2   : > { %1636 = vrot.lane.b32.xlu0 %v1635_v17, %s2016_s7  ;;  %v1667_v33 = vrot.slane %v1660_v45, %v2251_v32 }
 0x1d4   : > { %1668 = vrot.lane.b32.xlu1 %v1667_v33, %s2016_s7 }
 0x244   : > { %v1637_v34 = vpop.permute.xlu0 %1636 }
 0x245   : > { %v1672_v0 = vsel %vm353_vm1, %v1620_v60, %v1637_v34 }
 0x246   : > { %v1669_v62 = vpop.permute.xlu1 %1668 }
 0x247   : > { %v1675_v1 = vsel %vm353_vm1, %v1652_v52, %v1669_v62 }
 0x248   : > { %v1678_v2 = vcombine.low %v1672_v0, %v1675_v1 }
 0x24a   : > { %1845 = vst.sshfl [vmem:[%s170_s10] sm:$0x33 pattern:$0x76325410] %v1678_v2 }
 0x24b PF: > { %s13_s12 = sadd.s32 1, %s2014_s12  }
 0x24c   : > { %p10_p4 = scmp.ge.s32.totalorder %s13_s12, 4  }
 0x24e   :  { %12 = sbr.rel (!%p10_p4) target bundleno = 1 (0x1), region = 64 }

// kernel: simpler_segmentation_forward.5
= control target key start
LH: loop header
LB: loop body
LE: loop exit
PB: predicated region body
PF: predicated region fallthrough
CT: control target
= control target key end

     0   :  { %s629_s18 = smov 0   ;;  %s692_s0 = inlined_call_operand.vmem [shape: bf16[32,64], index: 0, kind: input, shape index: {}]   ;;  %s693_s1 = inlined_call_operand.vmem [shape: bf16[64,128], index: 1, kind: input, shape index: {}]   ;;  %s694_s2 = inlined_call_operand.vmem [shape: f32[1,128], index: 2, kind: input, shape index: {}]   ;;  %s695_s3 = inlined_call_operand.vmem [shape: bf16[128,128], index: 3, kind: input, shape index: {}]   ;;  %s696_s4 = inlined_call_operand.vmem [shape: f32[1,128], index: 4, kind: input, shape index: {}]   ;;  %s697_s5 = inlined_call_operand.vmem [shape: f32[32,128], index: 5, kind: output, shape index: {}]  }
   0x1 LB: > { %s493_s19 = sadd.s32 4294967295, %s595_s18   ;;  %p497_p0 = scmp.ge.s32.totalorder %s595_s18, 1  ;;  %s595_s18 = sphi %s629_s18, %s15_s18  }
   0x2   : > { %p188_p1 = scmp.lt.s32.totalorder %s595_s18, 3 }
   0x4   : > { %p189_p2 = pnand %p497_p0, %p188_p1 }
   0x5   : > { %v576_v0 = vld [vmem:[%s693_s1] sm:$0xff] (!%p189_p2)   ;;  %v597_v1 = vmov (!%p189_p2), 0.0   ;;  %v577_v2 = vld [vmem:[%s693_s1 + $0x8] sm:$0xff] (!%p189_p2)   ;;  %vm598_vm0 = vmmov (!%p189_p2), 0   ;;  %s498_s24 = sshll.u32 (!%p189_p2), %s493_s19, 1  ;;  %v578_v4 = vld [vmem:[%s693_s1 + $0x10] sm:$0xff] (!%p189_p2)  }
   0x6   : > { %192 = sbr.rel (%p189_p2) target bundleno = 459 (0x1cb), region = 40  ;;  %534 = vmatprep.subr.bf16.mxu0 (!%p189_p2), %v597_v1  ;;  %546 = vmatprep.subr.bf16.mxu1 (!%p189_p2), %v597_v1  ;;  %p217_p3 = scmp.lt.s32.totalorder (!%p189_p2), %s498_s24, 3  ;;  %v581_v3 = vld [vmem:[%s695_s3] sm:$0xff] (!%p189_p2)   ;;  %v582_v5 = vld [vmem:[%s695_s3 + $0x8] sm:$0xff] (!%p189_p2)   ;;  %v579_v6 = vld [vmem:[%s693_s1 + $0x18] sm:$0xff] (!%p189_p2)   ;;  %vm275_vm1 = vcmask (!%p189_p2), 523264  }
   0x7   : > { %535 = vmatpush3.bf16.msra.mxu0 (!%p189_p2), %v576_v0  ;;  %542 = vmatprep.mubr.msk.bf16.mxu0 (!%p189_p2), %vm598_vm0, %v597_v1  ;;  %v583_v7 = vld [vmem:[%s695_s3 + $0x10] sm:$0xff] (!%p189_p2)   ;;  %v584_v9 = vld [vmem:[%s695_s3 + $0x18] sm:$0xff] (!%p189_p2)   ;;  %v585_v10 = vld [vmem:[%s695_s3 + $0x20] sm:$0xff] (!%p189_p2)  }
   0x8   : > { %536 = vmatprep.subr.bf16.mxu0 (!%p189_p2), %v597_v1  ;;  %562 = vmatprep.mubr.msk.bf16.mxu1 (!%p189_p2), %vm598_vm0, %v597_v1  ;;  %v586_v11 = vld [vmem:[%s695_s3 + $0x28] sm:$0xff] (!%p189_p2)   ;;  %v587_v12 = vld [vmem:[%s695_s3 + $0x30] sm:$0xff] (!%p189_p2)   ;;  %v588_v13 = vld [vmem:[%s695_s3 + $0x38] sm:$0xff] (!%p189_p2)  }
   0x9   : > { %547 = vmatpush3.bf16.msra.mxu1 (!%p189_p2), %v581_v3  ;;  %v502_v14 = vld [vmem:[%s694_s2] ss:$0 sm:$0xff] (!%p189_p2) }
   0xa   : > { %548 = vmatprep.subr.bf16.mxu1 (!%p189_p2), %v597_v1  ;;  %v509_v24 = vld [vmem:[%s696_s4] ss:$0 sm:$0xff] (!%p189_p2) }
   0xb   : > { %537 = vmatpush3.bf16.msra.mxu0 (!%p189_p2), %v577_v2 }
   0xc   : > { %538 = vmatprep.subr.bf16.mxu0 (!%p189_p2), %v597_v1 }
   0xd   : > { %s699_s24 = smov (!%p217_p3, %s498_s24), 3  ;;  %549 = vmatpush3.bf16.msra.mxu1 %v582_v5 }
   0xe   : > { %s499_s6 = sshll.u32 %s699_s24, 2  ;;  %550 = vmatprep.subr.bf16.mxu1 %v597_v1  ;;  %s501_s28 = sshll.u32 %s699_s24, 3 }
   0xf   : > { %s220_s9 = scalar_lea.vmem %s692_s0, %s499_s6  ;;  %539 = vmatpush3.bf16.msra.mxu0 %v578_v4  ;;  %s226_s8 = scalar_lea.vmem %s697_s5, %s501_s28 }
  0x10   : > { %540 = vmatprep.subr.bf16.mxu0 %v597_v1  ;;  %v580_v8 = vld [vmem:[%s220_s9] sm:$0xff]  }
  0x11   : > { %551 = vmatpush3.bf16.msra.mxu1 %v583_v7 }
  0x12   : > { %552 = vmatprep.subr.bf16.mxu1 %v597_v1 }
  0x13   : > { %541 = vmatpush3.bf16.msra.mxu0 %v579_v6 }
  0x15   : > { %553 = vmatpush3.bf16.msra.mxu1 %v584_v9 }
  0x16   : > { %543 = vmatmul.mubr.msk.bf16.vlgmr.msra.gmra.mrb[0].mxu0 %vm275_vm1, %v580_v8  ;;  %554 = vmatprep.subr.bf16.mxu1 %v597_v1 }
  0x19   : > { %555 = vmatpush3.bf16.msra.mxu1 %v585_v10 }
  0x1a   : > { %556 = vmatprep.subr.bf16.mxu1 %v597_v1 }
  0x1d   : > { %557 = vmatpush3.bf16.msra.mxu1 %v586_v11 }
  0x1e   : > { %558 = vmatprep.subr.bf16.mxu1 %v597_v1 }
  0x21   : > { %559 = vmatpush3.bf16.msra.mxu1 %v587_v12 }
  0x22   : > { %560 = vmatprep.subr.bf16.mxu1 %v597_v1 }
  0x25   : > { %561 = vmatpush3.bf16.msra.mxu1 %v588_v13 }
  0xe9   : > { %v313_v15 = vpop.f32.mrb[0].mxu0 }
  0xea   : > { %v314_v16 = vadd.f32 %v502_v14, %v313_v15  ;;  %v544_v17 = vpop.f32.mrb[1].mxu0 }
  0xeb   : > { %v316_v18 = vpop.f32.mrb[2].mxu0 }
  0xec   : > { %v317_v19 = vadd.f32 %v502_v14, %v316_v18  ;;  %v545_v20 = vpop.f32.mrb[3].mxu0  ;;  %v320_v21 = vmax.f32 %v314_v16, 0.0 }
  0xee   : > { %v321_v22 = vmax.f32 %v317_v19, 0.0 }
  0xf0   : > { %v322_v23 = vpack.c.bf16 %v321_v22, %v320_v21 }
  0xf2   : > { %563 = vmatmul.mubr.bf16.vlgmr.msra.gmra.mrb[0].mxu1 %v322_v23 }
 0x1c5   : > { %v428_v25 = vpop.f32.mrb[0].mxu1 }
 0x1c6   : > { %v429_v26 = vadd.f32 %v509_v24, %v428_v25  ;;  %v564_v27 = vpop.f32.mrb[1].mxu1 }
 0x1c7   : > { %v431_v28 = vpop.f32.mrb[2].mxu1 }
 0x1c8   : > { %435 = vst [vmem:[%s226_s8] sm:$0xff] %v429_v26  ;;  %v432_v29 = vadd.f32 %v509_v24, %v431_v28  ;;  %v565_v30 = vpop.f32.mrb[3].mxu1 }
 0x1ca   : > { %436 = vst [vmem:[%s226_s8 + $0x8] sm:$0xff] %v432_v29 }
 0x1cb PF: > { %s15_s18 = sadd.s32 1, %s595_s18  }
 0x1cc   : > { %p12_p4 = scmp.ge.s32.totalorder %s15_s18, 4  }
 0x1ce   :  { %14 = sbr.rel (!%p12_p4) target bundleno = 1 (0x1), region = 70 }

// kernel: simpler_segmentation_forward.3
= control target key start
LH: loop header
LB: loop body
LE: loop exit
PB: predicated region body
PF: predicated region fallthrough
CT: control target
= control target key end

     0   :  { %s3993_s12 = smov 0   ;;  %s4891_s0 = inlined_call_operand.vmem [shape: bf16[32,16,27], index: 0, kind: input, shape index: {}]   ;;  %s4892_s1 = inlined_call_operand.vmem [shape: bf16[27,32], index: 1, kind: input, shape index: {}]   ;;  %s4893_s2 = inlined_call_operand.vmem [shape: f32[1,32], index: 2, kind: input, shape index: {}]   ;;  %s4894_s3 = inlined_call_operand.vmem [shape: bf16[16,256], index: 3, kind: output, shape index: {}]  }
   0x1 LB: > { %s3999_s13 = sadd.s32 4294967295, %s3965_s12   ;;  %p3742_p0 = scmp.ge.s32.totalorder %s3965_s12, 1  ;;  %s3965_s12 = sphi %s3993_s12, %s13_s12  }
   0x2   : > { %p139_p1 = scmp.lt.s32.totalorder %s3965_s12, 3 }
   0x4   : > { %p140_p2 = pnand %p3742_p0, %p139_p1 }
   0x6   : > { %143 = sbr.rel (%p140_p2) target bundleno = 600 (0x258), region = 32 }
   0xd   : > { %v3940_v0 = vld [vmem:[%s4892_s1] sm:$0xff]   ;;  %vm360_vm0 = vcmask 1044480   ;;  %v3941_v1 = vld [vmem:[%s4892_s1 + $0x8] sm:$0x3f]   ;;  %vm361_vm1 = vcmask 1045504   ;;  %s3743_s18 = sshll.u32 %s3999_s13, 4  ;;  %v596_v24 = vlaneseq }
   0xe   : > { %3886 = vmatprep.subr.bf16.mxu0 %v3940_v0  ;;  %3922 = vmatprep.subr.bf16.mxu1 %v3940_v0  ;;  %v3967_v2 = vmov 65535   ;;  %p165_p3 = scmp.lt.s32.totalorder %s3743_s18, 31  ;;  %vm311_vm2 = vcmask 220160   ;;  %v3968_v22 = vmov 1966171168   ;;  %vm3041_vm3 = vcmask 1041409  }
   0xf   : > { %3887 = vmatpush3.bf16.msra.mxu0 %v3940_v0  ;;  %3924 = vmatpush3.bf16.msra.mxu1 %v3940_v0  ;;  %v362_v3 = vsel %vm360_vm0, 4294967295, %v3967_v2  ;;  %v594_v23 = vunpack.c.l.s4 %v3968_v22  ;;  %v4050_v25 = vld [vmem:[%s4893_s2] ss:$0 sm:$0xff]  ;;  %v597_v28 = vshrl.u32 %v596_v24, 7  ;;  %v3969_v46 = vmov 1935823168  }
  0x10   : > { %v363_v4 = vsel %vm361_vm1, %v362_v3, 0  ;;  %s4905_s18 = smov (!%p165_p3, %s3743_s18), 31  ;;  %v2081_v47 = vunpack.c.l.s4 %v3969_v46  ;;  %vm3044_vm4 = vcmask 1042434   ;;  %vm3047_vm5 = vcmask 1043459   ;;  %s3970_s27 = smov 32  }
  0x11   : > { %v365_v5 = vand.u32 %v3941_v1, %v363_v4  ;;  %s3866_s19 = sshll.u32 %s4905_s18, 3  ;;  %v595_v27 = vunpack.c.0.s8 %v594_v23  ;;  %vm3050_vm6 = vcmask 1044484   ;;  %vm3053_vm7 = vcmask 1045509   ;;  %s3971_s28 = smov 64  }
  0x12   : > { %s4013_s22 = scalar_lea.vmem %s4891_s0, %s3866_s19  ;;  %v2082_v0 = vunpack.c.0.s8 %v2081_v47  ;;  %vm3056_vm8 = vcmask 1046534   ;;  %vm3059_vm9 = vcmask 1047559   ;;  %s3972_s29 = smov 96   ;;  %vm3659_vm10 = vcmask 261120  }
  0x13   : > { %3888 = vmatprep.subr.bf16.mxu0 %v365_v5  ;;  %3923 = vmatprep.subr.bf16.mxu1 %v365_v5  ;;  %v3942_v6 = vld [vmem:[%s4013_s22] sm:$0xff]   ;;  %v3944_v8 = vld [vmem:[%s4013_s22 + $0x8] sm:$0xff]   ;;  %v3946_v10 = vld [vmem:[%s4013_s22 + $0x10] sm:$0xff]   ;;  %v4057_v40 = vsub.s32 %v595_v27, %v597_v28  ;;  %p171_p4 = scmp.lt.s32.totalorder %s3999_s13, 1  ;;  %vm3663_vm11 = vcmask 523264   ;;  %vm3666_vm12 = vcmask 785408  }
  0x14   : > { %3889 = vmatpush3.bf16.msra.mxu0 %v365_v5  ;;  %3925 = vmatpush3.bf16.msra.mxu1 %v365_v5  ;;  %v3943_v7 = vld [vmem:[%s4013_s22 + $0x40] sm:$0xff]   ;;  %v3945_v9 = vld [vmem:[%s4013_s22 + $0x48] sm:$0xff]   ;;  %v3947_v11 = vld [vmem:[%s4013_s22 + $0x50] sm:$0xff]   ;;  %v4097_v23 = vsub.s32 %v2082_v0, %v597_v28 }
  0x15   : > { %3890 = vmatprep.mubr.msk.bf16.mxu0 %vm311_vm2, %v3942_v6  ;;  %3906 = vmatprep.mubr.msk.bf16.mxu1 %vm311_vm2, %v3943_v7  ;;  %v3948_v12 = vld [vmem:[%s4013_s22 + $0x18] sm:$0xff]   ;;  %v3950_v14 = vld [vmem:[%s4013_s22 + $0x20] sm:$0xff]   ;;  %v3952_v16 = vld [vmem:[%s4013_s22 + $0x28] sm:$0xff]   ;;  %s4907_s13 = smov (!%p171_p4, %s3999_s13), 1 }
  0x16   : > { %v3949_v13 = vld [vmem:[%s4013_s22 + $0x58] sm:$0xff]   ;;  %v3951_v15 = vld [vmem:[%s4013_s22 + $0x60] sm:$0xff]   ;;  %v3953_v17 = vld [vmem:[%s4013_s22 + $0x68] sm:$0xff]   ;;  %s3867_s30 = sshll.u32 %s4907_s13, 3 }
  0x17   : > { %3891 = vmatmul.mubr.msk.bf16.vlgmr.msra.gmra.mrb[0].mxu0 %vm311_vm2, %v3944_v8  ;;  %3907 = vmatmul.mubr.msk.bf16.vlgmr.msra.gmra.mrb[0].mxu1 %vm311_vm2, %v3945_v9  ;;  %v3954_v18 = vld [vmem:[%s4013_s22 + $0x30] sm:$0xff]   ;;  %v3956_v20 = vld [vmem:[%s4013_s22 + $0x38] sm:$0xff]   ;;  %s175_s6 = scalar_lea.vmem %s4894_s3, %s3867_s30 }
  0x18   : > { %3894 = vmatprep.mubr.msk.bf16.mxu0 %vm311_vm2, %v3946_v10  ;;  %3910 = vmatprep.mubr.msk.bf16.mxu1 %vm311_vm2, %v3947_v11  ;;  %v3955_v19 = vld [vmem:[%s4013_s22 + $0x70] sm:$0xff]   ;;  %v3957_v21 = vld [vmem:[%s4013_s22 + $0x78] sm:$0xff]  }
  0x1f   : > { %3895 = vmatmul.mubr.msk.bf16.gmra.mrb[4].mxu0 %vm311_vm2, %v3948_v12  ;;  %3911 = vmatmul.mubr.msk.bf16.gmra.mrb[4].mxu1 %vm311_vm2, %v3949_v13 }
  0x20   : > { %3898 = vmatprep.mubr.msk.bf16.mxu0 %vm311_vm2, %v3950_v14  ;;  %3914 = vmatprep.mubr.msk.bf16.mxu1 %vm311_vm2, %v3951_v15 }
  0x27   : > { %3899 = vmatmul.mubr.msk.bf16.gmra.mrb[8].mxu0 %vm311_vm2, %v3952_v16  ;;  %3915 = vmatmul.mubr.msk.bf16.gmra.mrb[8].mxu1 %vm311_vm2, %v3953_v17 }
  0x28   : > { %3902 = vmatprep.mubr.msk.bf16.mxu0 %vm311_vm2, %v3954_v18  ;;  %3918 = vmatprep.mubr.msk.bf16.mxu1 %vm311_vm2, %v3955_v19 }
  0x2f   : > { %3903 = vmatmul.mubr.msk.bf16.gmra.mrb[12].mxu0 %vm311_vm2, %v3956_v20  ;;  %3919 = vmatmul.mubr.msk.bf16.gmra.mrb[12].mxu1 %vm311_vm2, %v3957_v21 }
  0xea   : > { %v3892_v26 = vpop.f32.mrb[0].mxu0  ;;  %v3908_v30 = vpop.f32.mrb[0].mxu1 }
  0xeb   : > { %v410_v29 = vadd.f32 %v3892_v26, %v4050_v25  ;;  %v401_v31 = vpop.f32.mrb[1].mxu0  ;;  %v474_v32 = vadd.f32 %v3908_v30, %v4050_v25  ;;  %v465_v34 = vpop.f32.mrb[1].mxu1 }
  0xec   : > { %v402_v33 = vadd.f32 %v4050_v25, %v401_v31  ;;  %v3893_v35 = vpop.f32.mrb[2].mxu0  ;;  %v466_v36 = vadd.f32 %v4050_v25, %v465_v34  ;;  %v3909_v38 = vpop.f32.mrb[2].mxu1 }
  0xed   : > { %v413_v37 = vadd.f32 %v3893_v35, %v4050_v25  ;;  %v404_v39 = vpop.f32.mrb[3].mxu0  ;;  %v477_v41 = vadd.f32 %v3909_v38, %v4050_v25  ;;  %v468_v43 = vpop.f32.mrb[3].mxu1  ;;  %v530_v44 = vmax.f32 %v410_v29, 0.0  ;;  %v546_v49 = vmax.f32 %v474_v32, 0.0 }
  0xee   : > { %v405_v42 = vadd.f32 %v4050_v25, %v404_v39  ;;  %v469_v48 = vadd.f32 %v4050_v25, %v468_v43  ;;  %v528_v50 = vmax.f32 %v402_v33, 0.0  ;;  %v544_v53 = vmax.f32 %v466_v36, 0.0 }
  0xef   : > { %v531_v45 = vmax.f32 %v413_v37, 0.0  ;;  %v547_v51 = vmax.f32 %v477_v41, 0.0 }
  0xf0   : > { %v529_v52 = vmax.f32 %v405_v42, 0.0  ;;  %v4062_v56 = vmax.f32 %v469_v48, 0.0 }
  0xf1   : > { %v561_v54 = vpack.c.bf16 %v531_v45, %v530_v44  ;;  %v3784_v55 = vpack.c.bf16 %v531_v45, %v531_v45  ;;  %v569_v57 = vpack.c.bf16 %v547_v51, %v546_v49  ;;  %v3792_v58 = vpack.c.bf16 %v547_v51, %v547_v51 }
  0xf2   : > { %v560_v59 = vpack.c.bf16 %v529_v52, %v528_v50  ;;  %v3783_v60 = vpack.c.bf16 %v529_v52, %v529_v52  ;;  %v4064_v61 = vpop.f32.mrb[4].mxu0  ;;  %v568_v1 = vpack.c.bf16 %v4062_v56, %v544_v53  ;;  %v4069_v2 = vpop.f32.mrb[4].mxu1  ;;  %v3791_v24 = vpack.c.bf16 %v4062_v56, %v4062_v56 }
  0xf3   : > { %v648_v62 = vrot.slane %v561_v54, %v4057_v40  ;;  %v655_v63 = vrot.slane %v3784_v55, %v4057_v40  ;;  %v4071_v3 = vpop.f32.mrb[5].mxu0  ;;  %v1040_v4 = vrot.slane %v569_v57, %v4057_v40  ;;  %v1047_v5 = vrot.slane %v3792_v58, %v4057_v40  ;;  %v4077_v8 = vpop.f32.mrb[5].mxu1 }
  0xf4   : > { %v599_v6 = vrot.slane %v560_v59, %v4057_v40  ;;  %v606_v7 = vrot.slane %v3783_v60, %v4057_v40  ;;  %v4079_v9 = vpop.f32.mrb[6].mxu0  ;;  %v4083_v14 = vpop.f32.mrb[6].mxu1  ;;  %v4120_v43 = vrot.slane %v568_v1, %v4057_v40 }
  0xf5   : > { %v656_v10 = vcombine.high %v648_v62, %v648_v62  ;;  %v657_v11 = vcombine.high %v655_v63, %v655_v63  ;;  %v664_v12 = vrot.slane %v648_v62, %v4057_v40  ;;  %v671_v13 = vrot.slane %v655_v63, %v4057_v40  ;;  %v4085_v15 = vpop.f32.mrb[7].mxu0  ;;  %v4093_v20 = vpop.f32.mrb[7].mxu1 }
  0xf6   : > { %v1048_v16 = vcombine.high %v1040_v4, %v1040_v4  ;;  %v1049_v17 = vcombine.high %v1047_v5, %v1047_v5  ;;  %v4088_v18 = vrot.slane %v1040_v4, %v4057_v40  ;;  %v4091_v19 = vrot.slane %v1047_v5, %v4057_v40 }
  0xf7   : > { %v678_v21 = vrot.slane %v656_v10, %v4057_v40  ;;  %v685_v22 = vrot.slane %v657_v11, %v4057_v40  ;;  %v686_v26 = vcombine.high %v664_v12, %v664_v12  ;;  %v687_v27 = vcombine.high %v671_v13, %v671_v13 }
  0xf8   : > { %v4102_v29 = vrot.slane %v1048_v16, %v4057_v40  ;;  %v4105_v30 = vrot.slane %v1049_v17, %v4057_v40  ;;  %v1078_v31 = vcombine.high %v4088_v18, %v4088_v18  ;;  %v1079_v32 = vcombine.high %v4091_v19, %v4091_v19 }
  0xf9   : > { %v607_v33 = vcombine.high %v599_v6, %v599_v6  ;;  %v608_v28 = vcombine.high %v606_v7, %v606_v7  ;;  %v688_v34 = vcombine.high %v678_v21, %v678_v21  ;;  %v689_v35 = vcombine.high %v685_v22, %v685_v22 }
  0xfa   : > { %v615_v36 = vrot.slane %v599_v6, %v4057_v40  ;;  %v622_v37 = vrot.slane %v606_v7, %v4057_v40  ;;  %v4113_v38 = vpop.f32.mrb[8].mxu0  ;;  %v1080_v39 = vcombine.high %v4102_v29, %v4102_v29  ;;  %v4122_v44 = vpop.f32.mrb[8].mxu1 }
  0xfb   : > { %v629_v41 = vrot.slane %v607_v33, %v4057_v40  ;;  %v636_v42 = vrot.slane %v608_v28, %v4057_v40  ;;  %v4124_v45 = vpop.f32.mrb[9].mxu0  ;;  %v4126_v50 = vpop.f32.mrb[9].mxu1 }
  0xfc   : > { %v637_v46 = vcombine.high %v615_v36, %v615_v36  ;;  %v638_v47 = vcombine.high %v622_v37, %v622_v37  ;;  %v1504_v48 = vmax.bf16 %v664_v12, %v615_v36  ;;  %v1508_v49 = vmax.bf16 %v671_v13, %v622_v37  ;;  %v4128_v51 = vpop.f32.mrb[10].mxu0  ;;  %v4130_v57 = vpop.f32.mrb[10].mxu1 }
  0xfd   : > { %v639_v52 = vcombine.high %v629_v41, %v629_v41  ;;  %v640_v53 = vcombine.high %v636_v42, %v636_v42  ;;  %v1505_v54 = vmax.bf16 %v678_v21, %v629_v41  ;;  %v1509_v55 = vmax.bf16 %v685_v22, %v636_v42  ;;  %v4132_v58 = vpop.f32.mrb[11].mxu0  ;;  %v4134_v0 = vpop.f32.mrb[11].mxu1 }
  0xfe   : > { %v1506_v59 = vmax.bf16 %v686_v26, %v637_v46  ;;  %v1510_v60 = vmax.bf16 %v687_v27, %v638_v47  ;;  %v1569_v62 = vshrl.u32 %v1504_v48, 16  ;;  %v1589_v63 = vshrl.u32 %v1508_v49, 16 }
  0xff   : > { %v1507_v1 = vmax.bf16 %v688_v34, %v639_v52  ;;  %v1511_v4 = vmax.bf16 %v689_v35, %v640_v53  ;;  %v1574_v5 = vshrl.u32 %v1505_v54, 16  ;;  %v1594_v6 = vshrl.u32 %v1509_v55, 16 }
 0x100   : > { %v1579_v7 = vshrl.u32 %v1506_v59, 16  ;;  %v1599_v10 = vshrl.u32 %v1510_v60, 16  ;;  %v1952_v11 = vmax.bf16 %v1569_v62, %v1504_v48  ;;  %v1956_v12 = vmax.bf16 %v1589_v63, %v1508_v49 }
 0x101   : > { %v1584_v13 = vshrl.u32 %v1507_v1, 16  ;;  %v1604_v16 = vshrl.u32 %v1511_v4, 16  ;;  %v1953_v17 = vmax.bf16 %v1574_v5, %v1505_v54  ;;  %v1957_v21 = vmax.bf16 %v1594_v6, %v1509_v55 }
 0x102   : > { %v1954_v22 = vmax.bf16 %v1579_v7, %v1506_v59  ;;  %v1958_v26 = vmax.bf16 %v1599_v10, %v1510_v60  ;;  %v2086_v27 = vrot.slane %v1952_v11, %v4097_v23  ;;  %v2142_v33 = vrot.slane %v1956_v12, %v4097_v23  ;;  %v4138_v28 = vpop.f32.mrb[12].mxu0  ;;  %v4142_v41 = vpop.f32.mrb[12].mxu1 }
 0x103   : > { %v1955_v34 = vmax.bf16 %v1584_v13, %v1507_v1  ;;  %v1959_v35 = vmax.bf16 %v1604_v16, %v1511_v4  ;;  %v2100_v36 = vrot.slane %v1953_v17, %v4097_v23  ;;  %v2156_v37 = vrot.slane %v1957_v21, %v4097_v23  ;;  %v4144_v42 = vpop.f32.mrb[13].mxu0  ;;  %v4150_v52 = vpop.f32.mrb[13].mxu1 }
 0x104   : > { %v2093_v46 = vrot.slane %v2086_v27, %v4097_v23  ;;  %v2114_v47 = vrot.slane %v1954_v22, %v4097_v23  ;;  %v2149_v48 = vrot.slane %v2142_v33, %v4097_v23  ;;  %v2170_v49 = vrot.slane %v1958_v26, %v4097_v23  ;;  %v4152_v53 = vpop.f32.mrb[14].mxu0  ;;  %v4158_v62 = vpop.f32.mrb[14].mxu1 }
 0x105   : > { %v2107_v54 = vrot.slane %v2100_v36, %v4097_v23  ;;  %v2128_v55 = vrot.slane %v1955_v34, %v4097_v23  ;;  %v2163_v59 = vrot.slane %v2156_v37, %v4097_v23  ;;  %v2184_v60 = vrot.slane %v1959_v35, %v4097_v23  ;;  %v4160_v63 = vpop.f32.mrb[15].mxu0  ;;  %v4170_v7 = vpop.f32.mrb[15].mxu1 }
 0x106   : > { %v2121_v1 = vrot.slane %v2114_v47, %v4097_v23  ;;  %v4164_v4 = vrot.slane %v2170_v49, %v4097_v23  ;;  %v2980_v5 = vunpack.c.l.b16 %v2149_v48  ;;  %v998_v6 = vrot.slane %v3791_v24, %v4057_v40 }
 0x107   : > { %v2135_v10 = vrot.slane %v2128_v55, %v4097_v23  ;;  %v4174_v11 = vrot.slane %v2184_v60, %v4097_v23  ;;  %v2977_v12 = vunpack.c.l.b16 %v2107_v54  ;;  %v2981_v13 = vunpack.c.l.b16 %v2163_v59 }
 0x108   : > { %v1081_v16 = vcombine.high %v4105_v30, %v4105_v30  ;;  %v2976_v17 = vunpack.c.l.b16 %v2093_v46  ;;  %v2978_v21 = vunpack.c.l.b16 %v2121_v1  ;;  %v999_v22 = vcombine.high %v4120_v43, %v4120_v43 }
 0x109   : > { %v2979_v26 = vunpack.c.l.b16 %v2135_v10  ;;  %v2982_v56 = vunpack.c.l.b16 %v4164_v4  ;;  %v3040_v24 = vrot.slane %v2977_v12, 7  ;;  %v3049_v27 = vrot.slane %v2980_v5, 4 }
 0x10a   : > { %v2983_v33 = vunpack.c.l.b16 %v4174_v11  ;;  %v3043_v34 = vrot.slane %v2978_v21, 6  ;;  %v1000_v35 = vcombine.high %v998_v6, %v998_v6  ;;  %v1007_v36 = vrot.slane %v4120_v43, %v4057_v40 }
 0x10b   : > { %v3042_v37 = vsel %vm3041_vm3, %v3040_v24, %v2976_v17  ;;  %v3046_v47 = vrot.slane %v2979_v26, 5  ;;  %v3052_v46 = vrot.slane %v2981_v13, 3  ;;  %v1014_v48 = vrot.slane %v998_v6, %v4057_v40 }
 0x10c   : > { %v3045_v49 = vsel %vm3044_vm4, %v3043_v34, %v3042_v37  ;;  %v1021_v54 = vrot.slane %v999_v22, %v4057_v40  ;;  %v1028_v55 = vrot.slane %v1000_v35, %v4057_v40  ;;  %v1029_v59 = vcombine.high %v1007_v36, %v1007_v36 }
 0x10d   : > { %v3048_v60 = vsel %vm3047_vm5, %v3046_v47, %v3045_v49  ;;  %v1030_v1 = vcombine.high %v1014_v48, %v1014_v48  ;;  %v1536_v4 = vmax.bf16 %v4088_v18, %v1007_v36  ;;  %v1540_v43 = vmax.bf16 %v4091_v19, %v1014_v48 }
 0x10e   : > { %v3051_v5 = vsel %vm3050_vm6, %v3049_v27, %v3048_v60  ;;  %v1031_v10 = vcombine.high %v1021_v54, %v1021_v54  ;;  %v1032_v12 = vcombine.high %v1028_v55, %v1028_v55  ;;  %v1537_v6 = vmax.bf16 %v4102_v29, %v1021_v54 }
 0x10f   : > { %v4195_v13 = vsel %vm3053_vm7, %v3052_v46, %v3051_v5  ;;  %v1538_v17 = vmax.bf16 %v1078_v31, %v1029_v59  ;;  %v1541_v21 = vmax.bf16 %v4105_v30, %v1028_v55  ;;  %v1542_v22 = vmax.bf16 %v1079_v32, %v1030_v1 }
 0x110   : > { %v1539_v26 = vmax.bf16 %v1080_v39, %v1031_v10  ;;  %v1543_v24 = vmax.bf16 %v1081_v16, %v1032_v12  ;;  %v1729_v27 = vshrl.u32 %v1536_v4, 16  ;;  %v1734_v34 = vshrl.u32 %v1537_v6, 16 }
 0x111   : > { %v1739_v35 = vshrl.u32 %v1538_v17, 16  ;;  %v1749_v36 = vshrl.u32 %v1540_v43, 16  ;;  %v1754_v37 = vshrl.u32 %v1541_v21, 16  ;;  %v1759_v47 = vshrl.u32 %v1542_v22, 16 }
 0x112   : > { %v1744_v46 = vshrl.u32 %v1539_v26, 16  ;;  %v1764_v18 = vshrl.u32 %v1543_v24, 16  ;;  %v1984_v31 = vmax.bf16 %v1729_v27, %v1536_v4  ;;  %v1985_v48 = vmax.bf16 %v1734_v34, %v1537_v6 }
 0x113   : > { %v1986_v30 = vmax.bf16 %v1739_v35, %v1538_v17  ;;  %v1988_v49 = vmax.bf16 %v1749_v36, %v1540_v43  ;;  %v1989_v54 = vmax.bf16 %v1754_v37, %v1541_v21  ;;  %v1990_v19 = vmax.bf16 %v1759_v47, %v1542_v22 }
 0x114   : > { %v1987_v32 = vmax.bf16 %v1744_v46, %v1539_v26  ;;  %v1991_v55 = vmax.bf16 %v1764_v18, %v1543_v24  ;;  %v2534_v29 = vrot.slane %v1984_v31, %v4097_v23  ;;  %v2548_v39 = vrot.slane %v1985_v48, %v4097_v23 }
 0x115   : > { %v2562_v16 = vrot.slane %v1986_v30, %v4097_v23  ;;  %v2590_v59 = vrot.slane %v1988_v49, %v4097_v23  ;;  %v2604_v60 = vrot.slane %v1989_v54, %v4097_v23  ;;  %v2618_v1 = vrot.slane %v1990_v19, %v4097_v23 }
 0x116   : > { %v2541_v4 = vrot.slane %v2534_v29, %v4097_v23  ;;  %v2555_v43 = vrot.slane %v2548_v39, %v4097_v23  ;;  %v2576_v5 = vrot.slane %v1987_v32, %v4097_v23  ;;  %v2632_v10 = vrot.slane %v1991_v55, %v4097_v23 }
 0x117   : > { %v2569_v12 = vrot.slane %v2562_v16, %v4097_v23  ;;  %v2597_v6 = vrot.slane %v2590_v59, %v4097_v23  ;;  %v2611_v17 = vrot.slane %v2604_v60, %v4097_v23  ;;  %v2625_v21 = vrot.slane %v2618_v1, %v4097_v23 }
 0x118   : > { %v4221_v22 = vrot.slane %v2982_v56, 2  ;;  %v2583_v26 = vrot.slane %v2576_v5, %v4097_v23  ;;  %v2639_v24 = vrot.slane %v2632_v10, %v4097_v23  ;;  %v3009_v27 = vunpack.c.l.b16 %v2555_v43 }
 0x119   : > { %v3010_v34 = vunpack.c.l.b16 %v2569_v12  ;;  %v3012_v35 = vunpack.c.l.b16 %v2597_v6  ;;  %v3013_v36 = vunpack.c.l.b16 %v2611_v17  ;;  %v3014_v37 = vunpack.c.l.b16 %v2625_v21 }
 0x11a   : > { %v4227_v47 = vrot.slane %v2983_v33, 1  ;;  %v3008_v46 = vunpack.c.l.b16 %v2541_v4  ;;  %v3011_v18 = vunpack.c.l.b16 %v2583_v26  ;;  %v3103_v31 = vrot.slane %v3009_v27, 7 }
 0x11b   : > { %v3015_v48 = vunpack.c.l.b16 %v2639_v24  ;;  %v3105_v30 = vrot.slane %v3010_v34, 6  ;;  %v3109_v56 = vrot.slane %v3012_v35, 4  ;;  %v426_v49 = vadd.f32 %v4064_v61, %v4050_v25 }
 0x11c   : > { %v3104_v54 = vsel %vm3041_vm3, %v3103_v31, %v3008_v46  ;;  %v3107_v19 = vrot.slane %v3011_v18, 5  ;;  %v3111_v32 = vrot.slane %v3013_v36, 3  ;;  %v4232_v55 = vrot.slane %v3014_v37, 2 }
 0x11d   : > { %v3106_v29 = vsel %vm3044_vm4, %v3105_v30, %v3104_v54  ;;  %v490_v11 = vadd.f32 %v4069_v2, %v4050_v25  ;;  %v418_v33 = vadd.f32 %v4050_v25, %v4071_v3  ;;  %v482_v39 = vadd.f32 %v4050_v25, %v4077_v8 }
 0x11e   : > { %v3108_v16 = vsel %vm3047_vm5, %v3107_v19, %v3106_v29  ;;  %v429_v61 = vadd.f32 %v4079_v9, %v4050_v25  ;;  %v493_v59 = vadd.f32 %v4083_v14, %v4050_v25  ;;  %v421_v60 = vadd.f32 %v4050_v25, %v4085_v15 }
 0x11f   : > { %v3110_v1 = vsel %vm3050_vm6, %v3109_v56, %v3108_v16  ;;  %v4249_v2 = vrot.slane %v3015_v48, 1  ;;  %v534_v4 = vmax.f32 %v426_v49, 0.0  ;;  %v550_v3 = vmax.f32 %v490_v11, 0.0 }
 0x120   : > { %v4252_v43 = vsel %vm3053_vm7, %v3111_v32, %v3110_v1  ;;  %v535_v8 = vmax.f32 %v429_v61, 0.0  ;;  %v551_v5 = vmax.f32 %v493_v59, 0.0  ;;  %v533_v10 = vmax.f32 %v421_v60, 0.0 }
 0x121   : > { %4895 = vst [vmem:[#allocation2_spill] sm:$0xff] %v4249_v2  ;;  %v532_v12 = vmax.f32 %v418_v33, 0.0  ;;  %v548_v9 = vmax.f32 %v482_v39, 0.0  ;;  %v485_v14 = vadd.f32 %v4050_v25, %v4093_v20  ;;  %v4258_v15 = vadd.f32 %v4113_v38, %v4050_v25 }
 0x122   : > { %v563_v6 = vpack.c.bf16 %v535_v8, %v534_v4  ;;  %v3786_v17 = vpack.c.bf16 %v535_v8, %v535_v8  ;;  %v571_v21 = vpack.c.bf16 %v551_v5, %v550_v3  ;;  %v3794_v26 = vpack.c.bf16 %v551_v5, %v551_v5 }
 0x123   : > { %v562_v24 = vpack.c.bf16 %v533_v10, %v532_v12  ;;  %v3785_v27 = vpack.c.bf16 %v533_v10, %v533_v10  ;;  %v4260_v34 = vmax.f32 %v485_v14, 0.0  ;;  %v4264_v35 = vadd.f32 %v4122_v44, %v4050_v25 }
 0x124   : > { %v746_v36 = vrot.slane %v563_v6, %v4057_v40  ;;  %v753_v20 = vrot.slane %v3786_v17, %v4057_v40  ;;  %v1138_v37 = vrot.slane %v571_v21, %v4057_v40  ;;  %v1145_v38 = vrot.slane %v3794_v26, %v4057_v40 }
 0x125   : > { %v697_v46 = vrot.slane %v562_v24, %v4057_v40  ;;  %v704_v18 = vrot.slane %v3785_v27, %v4057_v40  ;;  %v570_v31 = vpack.c.bf16 %v4260_v34, %v548_v9  ;;  %v4275_v48 = vadd.f32 %v4050_v25, %v4124_v45 }
 0x126   : > { %v754_v44 = vcombine.high %v746_v36, %v746_v36  ;;  %v755_v30 = vcombine.high %v753_v20, %v753_v20  ;;  %v762_v56 = vrot.slane %v746_v36, %v4057_v40  ;;  %v769_v49 = vrot.slane %v753_v20, %v4057_v40 }
 0x127   : > { %v1146_v54 = vcombine.high %v1138_v37, %v1138_v37  ;;  %v1147_v19 = vcombine.high %v1145_v38, %v1145_v38  ;;  %v4280_v32 = vrot.slane %v1138_v37, %v4057_v40  ;;  %v4283_v29 = vrot.slane %v1145_v38, %v4057_v40 }
 0x128   : > { %v776_v11 = vrot.slane %v754_v44, %v4057_v40  ;;  %v783_v33 = vrot.slane %v755_v30, %v4057_v40  ;;  %v3793_v45 = vpack.c.bf16 %v4260_v34, %v4260_v34  ;;  %v784_v16 = vcombine.high %v762_v56, %v762_v56 }
 0x129   : > { %v785_v61 = vcombine.high %v769_v49, %v769_v49  ;;  %v4291_v59 = vrot.slane %v1146_v54, %v4057_v40  ;;  %v4294_v60 = vrot.slane %v1147_v19, %v4057_v40  ;;  %v705_v3 = vcombine.high %v697_v46, %v697_v46 }
 0x12a   : > { %v706_v8 = vcombine.high %v704_v18, %v704_v18  ;;  %v786_v5 = vcombine.high %v776_v11, %v776_v11  ;;  %v787_v10 = vcombine.high %v783_v33, %v783_v33  ;;  %v713_v12 = vrot.slane %v697_v46, %v4057_v40 }
 0x12b   : > { %v720_v9 = vrot.slane %v704_v18, %v4057_v40  ;;  %v727_v6 = vrot.slane %v705_v3, %v4057_v40  ;;  %v4307_v21 = vrot.slane %v570_v31, %v4057_v40 }
 0x12c   : > { %v734_v17 = vrot.slane %v706_v8, %v4057_v40  ;;  %v735_v26 = vcombine.high %v713_v12, %v713_v12  ;;  %v1512_v27 = vmax.bf16 %v762_v56, %v713_v12 }
 0x12d   : > { %v736_v24 = vcombine.high %v720_v9, %v720_v9  ;;  %v1516_v34 = vmax.bf16 %v769_v49, %v720_v9  ;;  %v737_v36 = vcombine.high %v727_v6, %v727_v6  ;;  %v1513_v37 = vmax.bf16 %v776_v11, %v727_v6 }
 0x12e   : > { %v738_v20 = vcombine.high %v734_v17, %v734_v17  ;;  %v1517_v38 = vmax.bf16 %v783_v33, %v734_v17  ;;  %v1514_v46 = vmax.bf16 %v784_v16, %v735_v26  ;;  %v1609_v44 = vshrl.u32 %v1512_v27, 16 }
 0x12f   : > { %v1518_v18 = vmax.bf16 %v785_v61, %v736_v24  ;;  %v1629_v30 = vshrl.u32 %v1516_v34, 16  ;;  %v1515_v54 = vmax.bf16 %v786_v5, %v737_v36  ;;  %v1614_v3 = vshrl.u32 %v1513_v37, 16 }
 0x130   : > { %v1519_v19 = vmax.bf16 %v787_v10, %v738_v20  ;;  %v1634_v39 = vshrl.u32 %v1517_v38, 16  ;;  %v1619_v8 = vshrl.u32 %v1514_v46, 16  ;;  %v1960_v31 = vmax.bf16 %v1609_v44, %v1512_v27 }
 0x131   : > { %v1639_v14 = vshrl.u32 %v1518_v18, 16  ;;  %v1964_v4 = vmax.bf16 %v1629_v30, %v1516_v34  ;;  %v1624_v1 = vshrl.u32 %v1515_v54, 16  ;;  %v1961_v56 = vmax.bf16 %v1614_v3, %v1513_v37 }
 0x132   : > { %v1644_v2 = vshrl.u32 %v1519_v19, 16  ;;  %v1965_v49 = vmax.bf16 %v1634_v39, %v1517_v38  ;;  %v1962_v12 = vmax.bf16 %v1619_v8, %v1514_v46  ;;  %v2198_v11 = vrot.slane %v1960_v31, %v4097_v23 }
 0x133   : > { %v1966_v9 = vmax.bf16 %v1639_v14, %v1518_v18  ;;  %v2254_v33 = vrot.slane %v1964_v4, %v4097_v23  ;;  %v1963_v16 = vmax.bf16 %v1624_v1, %v1515_v54  ;;  %v2212_v5 = vrot.slane %v1961_v56, %v4097_v23 }
 0x134   : > { %v1967_v61 = vmax.bf16 %v1644_v2, %v1519_v19  ;;  %v2268_v10 = vrot.slane %v1965_v49, %v4097_v23  ;;  %v2205_v6 = vrot.slane %v2198_v11, %v4097_v23  ;;  %v2226_v17 = vrot.slane %v1962_v12, %v4097_v23 }
 0x135   : > { %v2261_v26 = vrot.slane %v2254_v33, %v4097_v23  ;;  %v2282_v39 = vrot.slane %v1966_v9, %v4097_v23  ;;  %v2219_v14 = vrot.slane %v2212_v5, %v4097_v23  ;;  %v2240_v24 = vrot.slane %v1963_v16, %v4097_v23 }
 0x136   : > { %v2275_v4 = vrot.slane %v2268_v10, %v4097_v23  ;;  %v2296_v2 = vrot.slane %v1967_v61, %v4097_v23  ;;  %v2233_v1 = vrot.slane %v2226_v17, %v4097_v23  ;;  %v1096_v36 = vrot.slane %v3793_v45, %v4057_v40 }
 0x137   : > { %v4323_v27 = vrot.slane %v2282_v39, %v4097_v23  ;;  %v2988_v34 = vunpack.c.l.b16 %v2261_v26  ;;  %v2247_v20 = vrot.slane %v2240_v24, %v4097_v23  ;;  %v2985_v38 = vunpack.c.l.b16 %v2219_v14 }
 0x138   : > { %v4328_v37 = vrot.slane %v2296_v2, %v4097_v23  ;;  %v2989_v46 = vunpack.c.l.b16 %v2275_v4  ;;  %v1179_v18 = vcombine.high %v4294_v60, %v4294_v60  ;;  %v2984_v44 = vunpack.c.l.b16 %v2205_v6 }
 0x139   : > { %v2986_v30 = vunpack.c.l.b16 %v2233_v1  ;;  %v1097_v54 = vcombine.high %v4307_v21, %v4307_v21  ;;  %v2987_v19 = vunpack.c.l.b16 %v2247_v20  ;;  %v2990_v3 = vunpack.c.l.b16 %v4323_v27 }
 0x13a   : > { %v3061_v8 = vrot.slane %v2985_v38, 7  ;;  %v3067_v45 = vrot.slane %v2988_v34, 4  ;;  %v2991_v31 = vunpack.c.l.b16 %v4328_v37  ;;  %v1098_v49 = vcombine.high %v1096_v36, %v1096_v36 }
 0x13b   : > { %v3063_v56 = vrot.slane %v2986_v30, 6  ;;  %v1105_v12 = vrot.slane %v4307_v21, %v4057_v40  ;;  %v3065_v11 = vrot.slane %v2987_v19, 5  ;;  %v3069_v33 = vrot.slane %v2989_v46, 3 }
 0x13c   : > { %v3062_v9 = vsel %vm3041_vm3, %v3061_v8, %v2984_v44  ;;  %v1112_v16 = vrot.slane %v1096_v36, %v4057_v40  ;;  %v1119_v5 = vrot.slane %v1097_v54, %v4057_v40  ;;  %v1126_v10 = vrot.slane %v1098_v49, %v4057_v40 }
 0x13d   : > { %v3064_v61 = vsel %vm3044_vm4, %v3063_v56, %v3062_v9  ;;  %v1127_v6 = vcombine.high %v1105_v12, %v1105_v12  ;;  %v1544_v39 = vmax.bf16 %v4280_v32, %v1105_v12  ;;  %v4896_v27 = vcombine.high %v4280_v32, %v4280_v32 }
 0x13e   : > { %v3066_v17 = vsel %vm3047_vm5, %v3065_v11, %v3064_v61  ;;  %v1128_v26 = vcombine.high %v1112_v16, %v1112_v16  ;;  %v1548_v21 = vmax.bf16 %v4283_v29, %v1112_v16  ;;  %v1129_v24 = vcombine.high %v1119_v5, %v1119_v5 }
 0x13f   : > { %v3068_v14 = vsel %vm3050_vm6, %v3067_v45, %v3066_v17  ;;  %v1130_v4 = vcombine.high %v1126_v10, %v1126_v10  ;;  %v1545_v2 = vmax.bf16 %v4291_v59, %v1119_v5  ;;  %v1546_v34 = vmax.bf16 %v4896_v27, %v1127_v6 }
 0x140   : > { %v4349_v1 = vsel %vm3053_vm7, %v3069_v33, %v3068_v14  ;;  %v1549_v36 = vmax.bf16 %v4294_v60, %v1126_v10  ;;  %v4897_v20 = vcombine.high %v4283_v29, %v4283_v29  ;;  %v4898_v46 = vcombine.high %v4291_v59, %v4291_v59 }
 0x141   : > { %v1551_v30 = vmax.bf16 %v1179_v18, %v1130_v4  ;;  %v1769_v54 = vshrl.u32 %v1544_v39, 16  ;;  %v1774_v19 = vshrl.u32 %v1545_v2, 16  ;;  %v1779_v8 = vshrl.u32 %v1546_v34, 16 }
 0x142   : > { %v1550_v38 = vmax.bf16 %v4897_v20, %v1128_v26  ;;  %v1547_v44 = vmax.bf16 %v4898_v46, %v1129_v24  ;;  %v1789_v45 = vshrl.u32 %v1548_v21, 16  ;;  %v1794_v56 = vshrl.u32 %v1549_v36, 16 }
 0x143   : > { %v1804_v32 = vshrl.u32 %v1551_v30, 16  ;;  %v1992_v9 = vmax.bf16 %v1769_v54, %v1544_v39  ;;  %v1993_v11 = vmax.bf16 %v1774_v19, %v1545_v2  ;;  %v1994_v60 = vmax.bf16 %v1779_v8, %v1546_v34 }
 0x144   : > { %v1799_v49 = vshrl.u32 %v1550_v38, 16  ;;  %v1784_v12 = vshrl.u32 %v1547_v44, 16  ;;  %v1996_v33 = vmax.bf16 %v1789_v45, %v1548_v21  ;;  %v1997_v16 = vmax.bf16 %v1794_v56, %v1549_v36 }
 0x145   : > { %v1999_v5 = vmax.bf16 %v1804_v32, %v1551_v30  ;;  %v2646_v59 = vrot.slane %v1992_v9, %v4097_v23  ;;  %v2660_v18 = vrot.slane %v1993_v11, %v4097_v23  ;;  %v2674_v10 = vrot.slane %v1994_v60, %v4097_v23 }
 0x146   : > { %v1998_v29 = vmax.bf16 %v1799_v49, %v1550_v38  ;;  %v1995_v61 = vmax.bf16 %v1784_v12, %v1547_v44  ;;  %v2702_v6 = vrot.slane %v1996_v33, %v4097_v23  ;;  %v2716_v17 = vrot.slane %v1997_v16, %v4097_v23 }
 0x147   : > { %v2653_v39 = vrot.slane %v2646_v59, %v4097_v23  ;;  %v2667_v21 = vrot.slane %v2660_v18, %v4097_v23  ;;  %v2744_v24 = vrot.slane %v1999_v5, %v4097_v23  ;;  %v2681_v4 = vrot.slane %v2674_v10, %v4097_v23 }
 0x148   : > { %v2730_v26 = vrot.slane %v1998_v29, %v4097_v23  ;;  %v2688_v14 = vrot.slane %v1995_v61, %v4097_v23  ;;  %v2709_v2 = vrot.slane %v2702_v6, %v4097_v23  ;;  %v2723_v27 = vrot.slane %v2716_v17, %v4097_v23 }
 0x149   : > { %v4375_v36 = vrot.slane %v2990_v3, 2  ;;  %v2751_v38 = vrot.slane %v2744_v24, %v4097_v23  ;;  %v3017_v46 = vunpack.c.l.b16 %v2667_v21  ;;  %v3018_v44 = vunpack.c.l.b16 %v2681_v4 }
 0x14a   : > { %v2737_v34 = vrot.slane %v2730_v26, %v4097_v23  ;;  %v2695_v20 = vrot.slane %v2688_v14, %v4097_v23  ;;  %v3020_v30 = vunpack.c.l.b16 %v2709_v2  ;;  %v3021_v54 = vunpack.c.l.b16 %v2723_v27 }
 0x14b   : > { %v4381_v8 = vrot.slane %v2991_v31, 1  ;;  %v3016_v45 = vunpack.c.l.b16 %v2653_v39  ;;  %v3117_v49 = vrot.slane %v3017_v46, 7  ;;  %v3023_v12 = vunpack.c.l.b16 %v2751_v38 }
 0x14c   : > { %v3022_v19 = vunpack.c.l.b16 %v2737_v34  ;;  %v3019_v56 = vunpack.c.l.b16 %v2695_v20  ;;  %v3119_v32 = vrot.slane %v3018_v44, 6  ;;  %v3123_v3 = vrot.slane %v3020_v30, 4 }
 0x14d   : > { %v554_v9 = vmax.f32 %v4264_v35, 0.0  ;;  %v3118_v11 = vsel %vm3041_vm3, %v3117_v49, %v3016_v45  ;;  %v3125_v33 = vrot.slane %v3021_v54, 3  ;;  %v498_v37 = vadd.f32 %v4050_v25, %v4126_v50 }
 0x14e   : > { %v3121_v60 = vrot.slane %v3019_v56, 5  ;;  %v4385_v16 = vrot.slane %v3022_v19, 2  ;;  %v3120_v29 = vsel %vm3044_vm4, %v3119_v32, %v3118_v11  ;;  %v445_v31 = vadd.f32 %v4128_v51, %v4050_v25 }
 0x14f   : > { %v509_v61 = vadd.f32 %v4130_v57, %v4050_v25  ;;  %v536_v35 = vmax.f32 %v4275_v48, 0.0  ;;  %v437_v59 = vadd.f32 %v4050_v25, %v4132_v58  ;;  %v501_v18 = vadd.f32 %v4050_v25, %v4134_v0 }
 0x150   : > { %v3122_v5 = vsel %vm3047_vm5, %v3121_v60, %v3120_v29  ;;  %v539_v6 = vmax.f32 %v445_v31, 0.0  ;;  %v4403_v51 = vadd.f32 %v4138_v28, %v4050_v25  ;;  %v552_v17 = vmax.f32 %v498_v37, 0.0 }
 0x151   : > { %v3124_v10 = vsel %vm3050_vm6, %v3123_v3, %v3122_v5  ;;  %v555_v50 = vmax.f32 %v509_v61, 0.0  ;;  %v537_v26 = vmax.f32 %v437_v59, 0.0  ;;  %v553_v48 = vmax.f32 %v501_v18, 0.0 }
 0x152   : > { %v4406_v57 = vsel %vm3053_vm7, %v3125_v33, %v3124_v10  ;;  %v4899_v39 = vmax.f32 %v4258_v15, 0.0  ;;  %v3788_v21 = vpack.c.bf16 %v539_v6, %v539_v6  ;;  %v4414_v38 = vrot.slane %v3023_v12, 1 }
 0x153   : > { %v573_v14 = vpack.c.bf16 %v555_v50, %v554_v9  ;;  %v3796_v0 = vpack.c.bf16 %v555_v50, %v555_v50  ;;  %v564_v24 = vpack.c.bf16 %v537_v26, %v536_v35  ;;  %v3787_v4 = vpack.c.bf16 %v537_v26, %v537_v26 }
 0x154   : > { %v565_v58 = vpack.c.bf16 %v539_v6, %v4899_v39  ;;  %v572_v2 = vpack.c.bf16 %v553_v48, %v552_v17  ;;  %v3795_v27 = vpack.c.bf16 %v553_v48, %v553_v48  ;;  %v851_v25 = vrot.slane %v3788_v21, %v4057_v40 }
 0x155   : > { %v1236_v28 = vrot.slane %v573_v14, %v4057_v40  ;;  %v1243_v20 = vrot.slane %v3796_v0, %v4057_v40  ;;  %v795_v15 = vrot.slane %v564_v24, %v4057_v40  ;;  %v802_v46 = vrot.slane %v3787_v4, %v4057_v40 }
 0x156   : > { %v844_v34 = vrot.slane %v565_v58, %v4057_v40  ;;  %v853_v54 = vcombine.high %v851_v25, %v851_v25  ;;  %v867_v45 = vrot.slane %v851_v25, %v4057_v40  ;;  %v4430_v11 = vrot.slane %v572_v2, %v4057_v40 }
 0x157   : > { %v1244_v56 = vcombine.high %v1236_v28, %v1236_v28  ;;  %v1245_v49 = vcombine.high %v1243_v20, %v1243_v20  ;;  %v4422_v32 = vrot.slane %v1236_v28, %v4057_v40  ;;  %v4425_v12 = vrot.slane %v1243_v20, %v4057_v40 }
 0x158   : > { %v852_v30 = vcombine.high %v844_v34, %v844_v34  ;;  %v860_v19 = vrot.slane %v844_v34, %v4057_v40  ;;  %v881_v9 = vrot.slane %v853_v54, %v4057_v40  ;;  %v4433_v60 = vrot.slane %v3795_v27, %v4057_v40 }
 0x159   : > { %v883_v29 = vcombine.high %v867_v45, %v867_v45  ;;  %v4436_v37 = vrot.slane %v1244_v56, %v4057_v40  ;;  %v4439_v31 = vrot.slane %v1245_v49, %v4057_v40  ;;  %v1274_v61 = vcombine.high %v4422_v32, %v4422_v32 }
 0x15a   : > { %v874_v3 = vrot.slane %v852_v30, %v4057_v40  ;;  %v882_v33 = vcombine.high %v860_v19, %v860_v19  ;;  %v803_v35 = vcombine.high %v795_v15, %v795_v15  ;;  %v804_v59 = vcombine.high %v802_v46, %v802_v46 }
 0x15b   : > { %v885_v10 = vcombine.high %v881_v9, %v881_v9  ;;  %v811_v6 = vrot.slane %v795_v15, %v4057_v40  ;;  %v818_v50 = vrot.slane %v802_v46, %v4057_v40  ;;  %v1276_v17 = vcombine.high %v4436_v37, %v4436_v37 }
 0x15c   : > { %v884_v18 = vcombine.high %v874_v3, %v874_v3  ;;  %v825_v26 = vrot.slane %v803_v35, %v4057_v40  ;;  %v832_v48 = vrot.slane %v804_v59, %v4057_v40  ;;  %v1195_v39 = vcombine.high %v4430_v11, %v4430_v11 }
 0x15d   : > { %v833_v58 = vcombine.high %v811_v6, %v811_v6  ;;  %v834_v21 = vcombine.high %v818_v50, %v818_v50  ;;  %v1520_v14 = vmax.bf16 %v860_v19, %v811_v6  ;;  %v1524_v0 = vmax.bf16 %v867_v45, %v818_v50 }
 0x15e   : > { %v835_v24 = vcombine.high %v825_v26, %v825_v26  ;;  %v836_v4 = vcombine.high %v832_v48, %v832_v48  ;;  %v1521_v2 = vmax.bf16 %v874_v3, %v825_v26  ;;  %v1525_v27 = vmax.bf16 %v881_v9, %v832_v48 }
 0x15f   : > { %v1522_v34 = vmax.bf16 %v882_v33, %v833_v58  ;;  %v1526_v25 = vmax.bf16 %v883_v29, %v834_v21  ;;  %v1649_v28 = vshrl.u32 %v1520_v14, 16  ;;  %v1669_v20 = vshrl.u32 %v1524_v0, 16 }
 0x160   : > { %v1523_v15 = vmax.bf16 %v884_v18, %v835_v24  ;;  %v1527_v46 = vmax.bf16 %v885_v10, %v836_v4  ;;  %v1654_v30 = vshrl.u32 %v1521_v2, 16  ;;  %v1674_v54 = vshrl.u32 %v1525_v27, 16 }
 0x161   : > { %v1659_v56 = vshrl.u32 %v1522_v34, 16  ;;  %v1679_v49 = vshrl.u32 %v1526_v25, 16  ;;  %v1968_v35 = vmax.bf16 %v1649_v28, %v1520_v14  ;;  %v1972_v59 = vmax.bf16 %v1669_v20, %v1524_v0 }
 0x162   : > { %v1664_v44 = vshrl.u32 %v1523_v15, 16  ;;  %v1684_v5 = vshrl.u32 %v1527_v46, 16  ;;  %v1969_v19 = vmax.bf16 %v1654_v30, %v1521_v2  ;;  %v1973_v45 = vmax.bf16 %v1674_v54, %v1525_v27 }
 0x163   : > { %v1970_v6 = vmax.bf16 %v1659_v56, %v1522_v34  ;;  %v1974_v50 = vmax.bf16 %v1679_v49, %v1526_v25  ;;  %v2310_v3 = vrot.slane %v1968_v35, %v4097_v23  ;;  %v2366_v9 = vrot.slane %v1972_v59, %v4097_v23 }
 0x164   : > { %v1971_v33 = vmax.bf16 %v1664_v44, %v1523_v15  ;;  %v1975_v29 = vmax.bf16 %v1684_v5, %v1527_v46  ;;  %v2324_v18 = vrot.slane %v1969_v19, %v4097_v23  ;;  %v2380_v10 = vrot.slane %v1973_v45, %v4097_v23 }
 0x165   : > { %v2317_v26 = vrot.slane %v2310_v3, %v4097_v23  ;;  %v2338_v48 = vrot.slane %v1970_v6, %v4097_v23  ;;  %v2373_v58 = vrot.slane %v2366_v9, %v4097_v23  ;;  %v2394_v21 = vrot.slane %v1974_v50, %v4097_v23 }
 0x166   : > { %v2331_v14 = vrot.slane %v2324_v18, %v4097_v23  ;;  %v2352_v0 = vrot.slane %v1971_v33, %v4097_v23  ;;  %v2387_v24 = vrot.slane %v2380_v10, %v4097_v23  ;;  %v2408_v44 = vrot.slane %v1975_v29, %v4097_v23 }
 0x167   : > { %v2345_v5 = vrot.slane %v2338_v48, %v4097_v23  ;;  %v4467_v4 = vrot.slane %v2394_v21, %v4097_v23  ;;  %v2996_v2 = vunpack.c.l.b16 %v2373_v58  ;;  %v1196_v27 = vcombine.high %v4433_v60, %v4433_v60 }
 0x168   : > { %v2359_v34 = vrot.slane %v2352_v0, %v4097_v23  ;;  %v4473_v25 = vrot.slane %v2408_v44, %v4097_v23  ;;  %v2993_v28 = vunpack.c.l.b16 %v2331_v14  ;;  %v2997_v20 = vunpack.c.l.b16 %v2387_v24 }
 0x169   : > { %v1277_v15 = vcombine.high %v4439_v31, %v4439_v31  ;;  %v2992_v46 = vunpack.c.l.b16 %v2317_v26  ;;  %v2994_v30 = vunpack.c.l.b16 %v2345_v5  ;;  %v1203_v54 = vrot.slane %v4430_v11, %v4057_v40 }
 0x16a   : > { %v2995_v56 = vunpack.c.l.b16 %v2359_v34  ;;  %v2998_v49 = vunpack.c.l.b16 %v4467_v4  ;;  %v3075_v35 = vrot.slane %v2993_v28, 7  ;;  %v3081_v59 = vrot.slane %v2996_v2, 4 }
 0x16b   : > { %v2999_v19 = vunpack.c.l.b16 %v4473_v25  ;;  %v3077_v45 = vrot.slane %v2994_v30, 6  ;;  %v1210_v6 = vrot.slane %v4433_v60, %v4057_v40  ;;  %v1217_v50 = vrot.slane %v1195_v39, %v4057_v40 }
 0x16c   : > { %v3076_v3 = vsel %vm3041_vm3, %v3075_v35, %v2992_v46  ;;  %v3079_v9 = vrot.slane %v2995_v56, 5  ;;  %v3083_v33 = vrot.slane %v2997_v20, 3  ;;  %v1224_v29 = vrot.slane %v1196_v27, %v4057_v40 }
 0x16d   : > { %v3078_v11 = vsel %vm3044_vm4, %v3077_v45, %v3076_v3  ;;  %v1225_v18 = vcombine.high %v1203_v54, %v1203_v54  ;;  %v1226_v10 = vcombine.high %v1210_v6, %v1210_v6  ;;  %v1227_v26 = vcombine.high %v1217_v50, %v1217_v50 }
 0x16e   : > { %v3080_v48 = vsel %vm3047_vm5, %v3079_v9, %v3078_v11  ;;  %v1228_v58 = vcombine.high %v1224_v29, %v1224_v29  ;;  %v1552_v21 = vmax.bf16 %v4422_v32, %v1203_v54  ;;  %v1553_v60 = vmax.bf16 %v4436_v37, %v1217_v50 }
 0x16f   : > { %v3082_v39 = vsel %vm3050_vm6, %v3081_v59, %v3080_v48  ;;  %v1554_v14 = vmax.bf16 %v1274_v61, %v1225_v18  ;;  %v1555_v0 = vmax.bf16 %v1276_v17, %v1227_v26  ;;  %v1556_v24 = vmax.bf16 %v4425_v12, %v1210_v6 }
 0x170   : > { %v4499_v44 = vsel %vm3053_vm7, %v3083_v33, %v3082_v39  ;;  %v1557_v5 = vmax.bf16 %v4439_v31, %v1224_v29  ;;  %v4900_v2 = vcombine.high %v4425_v12, %v4425_v12  ;;  %v1559_v34 = vmax.bf16 %v1277_v15, %v1228_v58 }
 0x171   : > { %v1809_v28 = vshrl.u32 %v1552_v21, 16  ;;  %v1814_v20 = vshrl.u32 %v1553_v60, 16  ;;  %v1819_v32 = vshrl.u32 %v1554_v14, 16  ;;  %v1824_v61 = vshrl.u32 %v1555_v0, 16 }
 0x172   : > { %v1558_v27 = vmax.bf16 %v4900_v2, %v1226_v10  ;;  %v1829_v46 = vshrl.u32 %v1556_v24, 16  ;;  %v1834_v30 = vshrl.u32 %v1557_v5, 16  ;;  %v1844_v17 = vshrl.u32 %v1559_v34, 16 }
 0x173   : > { %v2000_v54 = vmax.bf16 %v1809_v28, %v1552_v21  ;;  %v2001_v56 = vmax.bf16 %v1814_v20, %v1553_v60  ;;  %v2002_v35 = vmax.bf16 %v1819_v32, %v1554_v14  ;;  %v2003_v59 = vmax.bf16 %v1824_v61, %v1555_v0 }
 0x174   : > { %v1839_v37 = vshrl.u32 %v1558_v27, 16  ;;  %v2004_v45 = vmax.bf16 %v1829_v46, %v1556_v24  ;;  %v2005_v6 = vmax.bf16 %v1834_v30, %v1557_v5  ;;  %v2007_v50 = vmax.bf16 %v1844_v17, %v1559_v34  ;;  %v3958_v30 = vld [vmem:[%s4893_s2] ss:$0 sm:$0xff] }
 0x175   : > { %v2758_v12 = vrot.slane %v2000_v54, %v4097_v23  ;;  %v2772_v15 = vrot.slane %v2001_v56, %v4097_v23  ;;  %v2786_v3 = vrot.slane %v2002_v35, %v4097_v23  ;;  %v2800_v9 = vrot.slane %v2003_v59, %v4097_v23 }
 0x176   : > { %v2006_v31 = vmax.bf16 %v1839_v37, %v1558_v27  ;;  %v2814_v33 = vrot.slane %v2004_v45, %v4097_v23  ;;  %v2828_v29 = vrot.slane %v2005_v6, %v4097_v23  ;;  %v2856_v18 = vrot.slane %v2007_v50, %v4097_v23 }
 0x177   : > { %v2765_v10 = vrot.slane %v2758_v12, %v4097_v23  ;;  %v2779_v26 = vrot.slane %v2772_v15, %v4097_v23  ;;  %v2793_v48 = vrot.slane %v2786_v3, %v4097_v23  ;;  %v2807_v58 = vrot.slane %v2800_v9, %v4097_v23 }
 0x178   : > { %v2842_v11 = vrot.slane %v2006_v31, %v4097_v23  ;;  %v2821_v21 = vrot.slane %v2814_v33, %v4097_v23  ;;  %v2835_v60 = vrot.slane %v2828_v29, %v4097_v23  ;;  %v2863_v14 = vrot.slane %v2856_v18, %v4097_v23 }
 0x179   : > { %v3024_v0 = vunpack.c.l.b16 %v2765_v10  ;;  %v3025_v24 = vunpack.c.l.b16 %v2779_v26  ;;  %v3026_v5 = vunpack.c.l.b16 %v2793_v48  ;;  %v3027_v2 = vunpack.c.l.b16 %v2807_v58 }
 0x17a   : > { %v2849_v39 = vrot.slane %v2842_v11, %v4097_v23  ;;  %v3028_v27 = vunpack.c.l.b16 %v2821_v21  ;;  %v3029_v34 = vunpack.c.l.b16 %v2835_v60  ;;  %v3031_v20 = vunpack.c.l.b16 %v2863_v14 }
 0x17b   : > { %v3131_v32 = vrot.slane %v3025_v24, 7  ;;  %v3133_v61 = vrot.slane %v3026_v5, 6  ;;  %v3135_v46 = vrot.slane %v3027_v2, 5  ;;  %v522_v37 = vadd.f32 %v3958_v30, %v4142_v41 }
 0x17c   : > { %v3030_v28 = vunpack.c.l.b16 %v2849_v39  ;;  %v4527_v17 = vrot.slane %v2998_v49, 2  ;;  %v4531_v54 = vrot.slane %v2999_v19, 1  ;;  %v3137_v56 = vrot.slane %v3028_v27, 4 }
 0x17d   : > { %v3139_v35 = vrot.slane %v3029_v34, 3  ;;  %v3132_v59 = vsel %vm3041_vm3, %v3131_v32, %v3024_v0  ;;  %v450_v6 = vadd.f32 %v3958_v30, %v4144_v42  ;;  %v514_v31 = vadd.f32 %v3958_v30, %v4150_v52 }
 0x17e   : > { %v4534_v45 = vrot.slane %v3030_v28, 2  ;;  %v3134_v41 = vsel %vm3044_vm4, %v3133_v61, %v3132_v59  ;;  %v461_v4 = vadd.f32 %v3958_v30, %v4152_v53  ;;  %v525_v49 = vadd.f32 %v3958_v30, %v4158_v62 }
 0x17f   : > { %v453_v25 = vadd.f32 %v3958_v30, %v4160_v63  ;;  %v3136_v19 = vsel %vm3047_vm5, %v3135_v46, %v3134_v41  ;;  %v4543_v50 = vrot.slane %v3031_v20, 1  ;;  %v558_v12 = vmax.f32 %v522_v37, 0.0 }
 0x180   : > { %v517_v15 = vadd.f32 %v3958_v30, %v4170_v7  ;;  %v3138_v3 = vsel %vm3050_vm6, %v3137_v56, %v3136_v19  ;;  %v543_v42 = vmax.f32 %v461_v4, 0.0  ;;  %v559_v9 = vmax.f32 %v525_v49, 0.0 }
 0x181   : > { %v541_v52 = vmax.f32 %v453_v25, 0.0  ;;  %v4548_v33 = vsel %vm3053_vm7, %v3139_v35, %v3138_v3  ;;  %v540_v53 = vmax.f32 %v450_v6, 0.0  ;;  %v556_v29 = vmax.f32 %v514_v31, 0.0 }
 0x182   : > { %v557_v62 = vmax.f32 %v517_v15, 0.0  ;;  %v4901_v63 = vmax.f32 %v4403_v51, 0.0  ;;  %v3790_v18 = vpack.c.bf16 %v543_v42, %v543_v42  ;;  %v575_v10 = vpack.c.bf16 %v559_v9, %v558_v12 }
 0x183   : > { %v3798_v26 = vpack.c.bf16 %v559_v9, %v559_v9  ;;  %v566_v48 = vpack.c.bf16 %v541_v52, %v540_v53  ;;  %v3789_v58 = vpack.c.bf16 %v541_v52, %v541_v52 }
 0x184   : > { %v567_v11 = vpack.c.bf16 %v543_v42, %v4901_v63  ;;  %v574_v7 = vpack.c.bf16 %v557_v62, %v556_v29  ;;  %v3797_v21 = vpack.c.bf16 %v557_v62, %v557_v62  ;;  %v949_v39 = vrot.slane %v3790_v18, %v4057_v40 }
 0x185   : > { %v1334_v14 = vrot.slane %v575_v10, %v4057_v40  ;;  %v1341_v0 = vrot.slane %v3798_v26, %v4057_v40  ;;  %v893_v24 = vrot.slane %v566_v48, %v4057_v40  ;;  %v900_v51 = vrot.slane %v3789_v58, %v4057_v40 }
 0x186   : > { %v942_v60 = vrot.slane %v567_v11, %v4057_v40  ;;  %v4559_v5 = vrot.slane %v574_v7, %v4057_v40  ;;  %v4562_v2 = vrot.slane %v3797_v21, %v4057_v40  ;;  %v951_v34 = vcombine.high %v949_v39, %v949_v39 }
 0x187   : > { %v965_v20 = vrot.slane %v949_v39, %v4057_v40  ;;  %v1342_v32 = vcombine.high %v1334_v14, %v1334_v14  ;;  %v1343_v61 = vcombine.high %v1341_v0, %v1341_v0  ;;  %v4567_v46 = vrot.slane %v1334_v14, %v4057_v40 }
 0x188   : > { %v950_v27 = vcombine.high %v942_v60, %v942_v60  ;;  %v958_v28 = vrot.slane %v942_v60, %v4057_v40  ;;  %v4570_v30 = vrot.slane %v1341_v0, %v4057_v40  ;;  %v979_v56 = vrot.slane %v951_v34, %v4057_v40 }
 0x189   : > { %v981_v59 = vcombine.high %v965_v20, %v965_v20  ;;  %v4575_v6 = vrot.slane %v1342_v32, %v4057_v40  ;;  %v4578_v31 = vrot.slane %v1343_v61, %v4057_v40  ;;  %v1372_v41 = vcombine.high %v4567_v46, %v4567_v46 }
 0x18a   : > { %v972_v37 = vrot.slane %v950_v27, %v4057_v40  ;;  %v980_v35 = vcombine.high %v958_v28, %v958_v28  ;;  %v1373_v4 = vcombine.high %v4570_v30, %v4570_v30  ;;  %v983_v25 = vcombine.high %v979_v56, %v979_v56 }
 0x18b   : > { %v901_v19 = vcombine.high %v893_v24, %v893_v24  ;;  %v902_v12 = vcombine.high %v900_v51, %v900_v51  ;;  %v1374_v15 = vcombine.high %v4575_v6, %v4575_v6  ;;  %v909_v42 = vrot.slane %v893_v24, %v4057_v40 }
 0x18c   : > { %v982_v49 = vcombine.high %v972_v37, %v972_v37  ;;  %v916_v9 = vrot.slane %v900_v51, %v4057_v40  ;;  %v1293_v29 = vcombine.high %v4559_v5, %v4559_v5  ;;  %v1294_v62 = vcombine.high %v4562_v2, %v4562_v2 }
 0x18d   : > { %v923_v52 = vrot.slane %v901_v19, %v4057_v40  ;;  %v930_v53 = vrot.slane %v902_v12, %v4057_v40  ;;  %v931_v63 = vcombine.high %v909_v42, %v909_v42  ;;  %v1528_v18 = vmax.bf16 %v958_v28, %v909_v42 }
 0x18e   : > { %v932_v11 = vcombine.high %v916_v9, %v916_v9  ;;  %v1532_v10 = vmax.bf16 %v965_v20, %v916_v9 }
 0x18f   : > { %v933_v26 = vcombine.high %v923_v52, %v923_v52  ;;  %v934_v48 = vcombine.high %v930_v53, %v930_v53  ;;  %v1529_v58 = vmax.bf16 %v972_v37, %v923_v52  ;;  %v1533_v7 = vmax.bf16 %v979_v56, %v930_v53 }
 0x190   : > { %v1530_v21 = vmax.bf16 %v980_v35, %v931_v63  ;;  %v1534_v60 = vmax.bf16 %v981_v59, %v932_v11  ;;  %v1689_v39 = vshrl.u32 %v1528_v18, 16  ;;  %v1709_v14 = vshrl.u32 %v1532_v10, 16 }
 0x191   : > { %v1531_v0 = vmax.bf16 %v982_v49, %v933_v26  ;;  %v1535_v24 = vmax.bf16 %v983_v25, %v934_v48  ;;  %v1694_v51 = vshrl.u32 %v1529_v58, 16  ;;  %v1714_v27 = vshrl.u32 %v1533_v7, 16 }
 0x192   : > { %v1699_v34 = vshrl.u32 %v1530_v21, 16  ;;  %v1719_v32 = vshrl.u32 %v1534_v60, 16  ;;  %v1976_v61 = vmax.bf16 %v1689_v39, %v1528_v18  ;;  %v1980_v19 = vmax.bf16 %v1709_v14, %v1532_v10 }
 0x193   : > { %v1704_v12 = vshrl.u32 %v1531_v0, 16  ;;  %v1724_v3 = vshrl.u32 %v1535_v24, 16  ;;  %v1977_v28 = vmax.bf16 %v1694_v51, %v1529_v58  ;;  %v1981_v20 = vmax.bf16 %v1714_v27, %v1533_v7 }
 0x194   : > { %v1978_v42 = vmax.bf16 %v1699_v34, %v1530_v21  ;;  %v1982_v9 = vmax.bf16 %v1719_v32, %v1534_v60  ;;  %v2422_v37 = vrot.slane %v1976_v61, %v4097_v23  ;;  %v2478_v56 = vrot.slane %v1980_v19, %v4097_v23 }
 0x195   : > { %v1979_v35 = vmax.bf16 %v1704_v12, %v1531_v0  ;;  %v1983_v59 = vmax.bf16 %v1724_v3, %v1535_v24  ;;  %v2436_v49 = vrot.slane %v1977_v28, %v4097_v23  ;;  %v2492_v25 = vrot.slane %v1981_v20, %v4097_v23 }
 0x196   : > { %v2429_v52 = vrot.slane %v2422_v37, %v4097_v23  ;;  %v2450_v53 = vrot.slane %v1978_v42, %v4097_v23  ;;  %v2485_v63 = vrot.slane %v2478_v56, %v4097_v23  ;;  %v2506_v11 = vrot.slane %v1982_v9, %v4097_v23 }
 0x197   : > { %v2443_v18 = vrot.slane %v2436_v49, %v4097_v23  ;;  %v2464_v10 = vrot.slane %v1979_v35, %v4097_v23  ;;  %v2499_v26 = vrot.slane %v2492_v25, %v4097_v23  ;;  %v2520_v3 = vrot.slane %v1983_v59, %v4097_v23 }
 0x198   : > { %v2457_v48 = vrot.slane %v2450_v53, %v4097_v23  ;;  %v2513_v58 = vrot.slane %v2506_v11, %v4097_v23  ;;  %v3000_v7 = vunpack.c.l.b16 %v2429_v52  ;;  %v3004_v21 = vunpack.c.l.b16 %v2485_v63 }
 0x199   : > { %v2471_v60 = vrot.slane %v2464_v10, %v4097_v23  ;;  %v2527_v39 = vrot.slane %v2520_v3, %v4097_v23  ;;  %v3001_v14 = vunpack.c.l.b16 %v2443_v18  ;;  %v3005_v0 = vunpack.c.l.b16 %v2499_v26 }
 0x19a   : > { %v3002_v24 = vunpack.c.l.b16 %v2457_v48  ;;  %v3006_v51 = vunpack.c.l.b16 %v2513_v58  ;;  %v3095_v27 = vrot.slane %v3004_v21, 4  ;;  %v1301_v34 = vrot.slane %v4559_v5, %v4057_v40 }
 0x19b   : > { %v3003_v32 = vunpack.c.l.b16 %v2471_v60  ;;  %v3007_v61 = vunpack.c.l.b16 %v2527_v39  ;;  %v3089_v19 = vrot.slane %v3001_v14, 7  ;;  %v3097_v12 = vrot.slane %v3005_v0, 3 }
 0x19c   : > { %v3091_v28 = vrot.slane %v3002_v24, 6  ;;  %v4614_v20 = vrot.slane %v3006_v51, 2  ;;  %v1308_v42 = vrot.slane %v4562_v2, %v4057_v40  ;;  %v1315_v9 = vrot.slane %v1293_v29, %v4057_v40 }
 0x19d   : > { %v3090_v37 = vsel %vm3041_vm3, %v3089_v19, %v3000_v7  ;;  %v3093_v56 = vrot.slane %v3003_v32, 5  ;;  %v4620_v35 = vrot.slane %v3007_v61, 1  ;;  %v1322_v5 = vrot.slane %v1294_v62, %v4057_v40 }
 0x19e   : > { %v3092_v59 = vsel %vm3044_vm4, %v3091_v28, %v3090_v37  ;;  %v1323_v49 = vcombine.high %v1301_v34, %v1301_v34  ;;  %v1324_v25 = vcombine.high %v1308_v42, %v1308_v42  ;;  %v1325_v52 = vcombine.high %v1315_v9, %v1315_v9 }
 0x19f   : > { %v3094_v53 = vsel %vm3047_vm5, %v3093_v56, %v3092_v59  ;;  %v1326_v63 = vcombine.high %v1322_v5, %v1322_v5  ;;  %v1560_v29 = vmax.bf16 %v4567_v46, %v1301_v34  ;;  %v1561_v11 = vmax.bf16 %v4575_v6, %v1315_v9 }
 0x1a0   : > { %v3096_v18 = vsel %vm3050_vm6, %v3095_v27, %v3094_v53  ;;  %v1562_v10 = vmax.bf16 %v1372_v41, %v1323_v49  ;;  %v1563_v2 = vmax.bf16 %v1374_v15, %v1325_v52  ;;  %v1564_v62 = vmax.bf16 %v4570_v30, %v1308_v42 }
 0x1a1   : > { %v3098_v26 = vsel %vm3053_vm7, %v3097_v12, %v3096_v18  ;;  %v1565_v3 = vmax.bf16 %v4578_v31, %v1322_v5  ;;  %v1566_v48 = vmax.bf16 %v1373_v4, %v1324_v25  ;;  %v4902_v58 = vcombine.high %v4578_v31, %v4578_v31 }
 0x1a2   : > { %v1849_v46 = vshrl.u32 %v1560_v29, 16  ;;  %v1854_v41 = vshrl.u32 %v1561_v11, 16  ;;  %v1859_v21 = vshrl.u32 %v1562_v10, 16  ;;  %v1864_v6 = vshrl.u32 %v1563_v2, 16 }
 0x1a3   : > { %v1567_v7 = vmax.bf16 %v4902_v58, %v1326_v63  ;;  %v1869_v15 = vshrl.u32 %v1564_v62, 16  ;;  %v1874_v60 = vshrl.u32 %v1565_v3, 16  ;;  %v1879_v39 = vshrl.u32 %v1566_v48, 16 }
 0x1a4   : > { %v2008_v0 = vmax.bf16 %v1849_v46, %v1560_v29  ;;  %v2009_v24 = vmax.bf16 %v1854_v41, %v1561_v11  ;;  %v2010_v51 = vmax.bf16 %v1859_v21, %v1562_v10  ;;  %v2011_v27 = vmax.bf16 %v1864_v6, %v1563_v2 }
 0x1a5   : > { %v1884_v14 = vshrl.u32 %v1567_v7, 16  ;;  %v2012_v30 = vmax.bf16 %v1869_v15, %v1564_v62  ;;  %v2013_v4 = vmax.bf16 %v1874_v60, %v1565_v3  ;;  %v2014_v34 = vmax.bf16 %v1879_v39, %v1566_v48 }
 0x1a6   : > { %v2870_v31 = vrot.slane %v2008_v0, %v4097_v23  ;;  %v2884_v61 = vrot.slane %v2009_v24, %v4097_v23  ;;  %v2898_v19 = vrot.slane %v2010_v51, %v4097_v23  ;;  %v2912_v12 = vrot.slane %v2011_v27, %v4097_v23 }
 0x1a7   : > { %v2015_v32 = vmax.bf16 %v1884_v14, %v1567_v7  ;;  %v2926_v28 = vrot.slane %v2012_v30, %v4097_v23  ;;  %v2940_v42 = vrot.slane %v2013_v4, %v4097_v23  ;;  %v2954_v9 = vrot.slane %v2014_v34, %v4097_v23 }
 0x1a8   : > { %v2877_v56 = vrot.slane %v2870_v31, %v4097_v23  ;;  %v2891_v5 = vrot.slane %v2884_v61, %v4097_v23  ;;  %v2905_v59 = vrot.slane %v2898_v19, %v4097_v23  ;;  %v2919_v49 = vrot.slane %v2912_v12, %v4097_v23 }
 0x1a9   : > { %v2968_v37 = vrot.slane %v2015_v32, %v4097_v23  ;;  %v2933_v25 = vrot.slane %v2926_v28, %v4097_v23  ;;  %v2947_v52 = vrot.slane %v2940_v42, %v4097_v23  ;;  %v2961_v53 = vrot.slane %v2954_v9, %v4097_v23 }
 0x1aa   : > { %v3032_v29 = vunpack.c.l.b16 %v2877_v56  ;;  %v3033_v11 = vunpack.c.l.b16 %v2891_v5  ;;  %v3034_v18 = vunpack.c.l.b16 %v2905_v59  ;;  %v3035_v10 = vunpack.c.l.b16 %v2919_v49 }
 0x1ab   : > { %v2975_v63 = vrot.slane %v2968_v37, %v4097_v23  ;;  %v3036_v2 = vunpack.c.l.b16 %v2933_v25  ;;  %v3037_v62 = vunpack.c.l.b16 %v2947_v52  ;;  %v3038_v3 = vunpack.c.l.b16 %v2961_v53 }
 0x1ac   : > { %v3145_v58 = vrot.slane %v3033_v11, 7  ;;  %v3147_v7 = vrot.slane %v3034_v18, 6  ;;  %v3149_v46 = vrot.slane %v3035_v10, 5  ;;  %v3057_v41 = vsel %vm3056_vm8, %v4221_v22, %v4195_v13 }
 0x1ad   : > { %v3039_v48 = vunpack.c.l.b16 %v2975_v63  ;;  %v3151_v21 = vrot.slane %v3036_v2, 4  ;;  %v3153_v6 = vrot.slane %v3037_v62, 3  ;;  %v3155_v15 = vrot.slane %v3038_v3, 2 }
 0x1ae   : > { %v3146_v23 = vsel %vm3041_vm3, %v3145_v58, %v3032_v29  ;;  %v3060_v39 = vsel %vm3059_vm9, %v4227_v47, %v3057_v41  ;;  %v3072_v14 = vsel %vm3056_vm8, %v4375_v36, %v4349_v1  ;;  %v3086_v0 = vsel %vm3056_vm8, %v4527_v17, %v4499_v44  ;;  %v4903_v17 = vld [vmem:[#allocation2_spill] sm:$0xff] }
 0x1af   : > { %v3157_v60 = vrot.slane %v3039_v48, 1  ;;  %v3148_v24 = vsel %vm3044_vm4, %v3147_v7, %v3146_v23  ;;  %v3074_v13 = vsel %vm3059_vm9, %v4381_v8, %v3072_v14  ;;  %v3088_v22 = vsel %vm3059_vm9, %v4531_v54, %v3086_v0 }
 0x1b0   : > { %v3100_v51 = vsel %vm3056_vm8, %v4614_v20, %v3098_v26  ;;  %v3150_v47 = vsel %vm3047_vm5, %v3149_v46, %v3148_v24  ;;  %v3114_v36 = vsel %vm3056_vm8, %v4232_v55, %v4252_v43  ;;  %v3128_v44 = vsel %vm3056_vm8, %v4385_v16, %v4406_v57 }
 0x1b1   : > { %v3102_v1 = vsel %vm3059_vm9, %v4620_v35, %v3100_v51  ;;  %v3152_v8 = vsel %vm3050_vm6, %v3151_v21, %v3150_v47  ;;  %v3116_v54 = vsel %vm3059_vm9, %v4903_v17, %v3114_v36  ;;  %v3130_v20 = vsel %vm3059_vm9, %v4414_v38, %v3128_v44 }
 0x1b2   : > { %v3142_v35 = vsel %vm3056_vm8, %v4534_v45, %v4548_v33  ;;  %v3154_v26 = vsel %vm3053_vm7, %v3153_v6, %v3152_v8  ;;  %v3159_v43 = vpack.c.b16 %v3060_v39, %v3060_v39  ;;  %v3160_v27 = vpack.c.b16 %v3074_v13, %v3074_v13 }
 0x1b3   : > { %v3144_v55 = vsel %vm3059_vm9, %v4543_v50, %v3142_v35  ;;  %v3156_v16 = vsel %vm3056_vm8, %v3155_v15, %v3154_v26  ;;  %v3161_v57 = vpack.c.b16 %v3088_v22, %v3088_v22  ;;  %v3162_v30 = vpack.c.b16 %v3102_v1, %v3102_v1 }
 0x1b4   : > { %v3163_v4 = vpack.c.b16 %v3116_v54, %v3116_v54  ;;  %v3158_v34 = vsel %vm3059_vm9, %v3157_v60, %v3156_v16  ;;  %v3164_v32 = vpack.c.b16 %v3130_v20, %v3130_v20  ;;  %v3165_v38 = vpack.c.b16 %v3144_v55, %v3144_v55 }
 0x1b5   : > { %v3173_v31 = vrot.slane %v3159_v43, %v4057_v40  ;;  %v3166_v61 = vpack.c.b16 %v3158_v34, %v3158_v34  ;;  %v3197_v45 = vrot.slane %v3160_v27, %v4057_v40  ;;  %v3221_v33 = vrot.slane %v3161_v57, %v4057_v40 }
 0x1b6   : > { %v3245_v50 = vrot.slane %v3162_v30, %v4057_v40  ;;  %v3269_v12 = vrot.slane %v3163_v4, %v4057_v40  ;;  %v3293_v28 = vrot.slane %v3164_v32, %v4057_v40  ;;  %v3317_v42 = vrot.slane %v3165_v38, %v4057_v40 }
 0x1b7   : > { %v4708_v19 = vrot.slane %v3173_v31, %v4057_v40  ;;  %v4714_v9 = vrot.slane %v3197_v45, %v4057_v40  ;;  %v4717_v37 = vrot.slane %v3221_v33, %v4057_v40  ;;  %v3341_v5 = vrot.slane %v3166_v61, %v4057_v40 }
 0x1b8   : > { %v4720_v56 = vrot.slane %v3245_v50, %v4057_v40  ;;  %v4724_v59 = vrot.slane %v3269_v12, %v4057_v40  ;;  %v4727_v49 = vrot.slane %v3293_v28, %v4057_v40  ;;  %v4730_v25 = vrot.slane %v3317_v42, %v4057_v40 }
 0x1b9   : > { %v3362_v52 = vshrl.u32 %v4708_v19, 16  ;;  %v4734_v53 = vrot.slane %v3341_v5, %v4057_v40  ;;  %v3363_v63 = vshrl.u32 %v4714_v9, 16  ;;  %v3386_v29 = vshrl.u32 %v4717_v37, 16 }
 0x1ba   : > { %v3387_v11 = vshrl.u32 %v4720_v56, 16  ;;  %v3410_v18 = vshrl.u32 %v4724_v59, 16  ;;  %v3411_v10 = vshrl.u32 %v4727_v49, 16  ;;  %v3434_v2 = vshrl.u32 %v4730_v25, 16 }
 0x1bb   : > { %v3174_v62 = vcombine.high %v3173_v31, %v3173_v31  ;;  %v3364_v3 = vpack.i.b16 %v3363_v63, %v3362_v52  ;;  %v3435_v58 = vshrl.u32 %v4734_v53, 16  ;;  %v3198_v7 = vcombine.high %v3197_v45, %v3197_v45 }
 0x1bc   : > { %v3388_v48 = vpack.i.b16 %v3387_v11, %v3386_v29  ;;  %v3412_v46 = vpack.i.b16 %v3411_v10, %v3410_v18  ;;  %v3222_v21 = vcombine.high %v3221_v33, %v3221_v33  ;;  %v3246_v6 = vcombine.high %v3245_v50, %v3245_v50 }
 0x1bd   : > { %v4744_v41 = vrot.slane %v3174_v62, %v4057_v40  ;;  %v3436_v15 = vpack.i.b16 %v3435_v58, %v3434_v2  ;;  %v4747_v23 = vrot.slane %v3198_v7, %v4057_v40  ;;  %v3270_v39 = vcombine.high %v3269_v12, %v3269_v12 }
 0x1be   : > { %v3479_v60 = vcombine.low %v3364_v3, %v3388_v48  ;;  %v4750_v14 = vrot.slane %v3222_v21, %v4057_v40  ;;  %v4753_v0 = vrot.slane %v3246_v6, %v4057_v40  ;;  %v3294_v24 = vcombine.high %v3293_v28, %v3293_v28 }
 0x1bf   : > { %v3318_v13 = vcombine.high %v3317_v42, %v3317_v42  ;;  %v3480_v22 = vcombine.low %v3412_v46, %v3436_v15  ;;  %v4757_v47 = vrot.slane %v3270_v39, %v4057_v40  ;;  %v3342_v1 = vcombine.high %v3341_v5, %v3341_v5 }
 0x1c0   : > { %v3487_v51 = vrot.slane %v3479_v60, %v4057_v40  ;;  %v4760_v36 = vrot.slane %v3294_v24, %v4057_v40  ;;  %v3367_v8 = vpack.i.b16 %v4747_v23, %v4744_v41  ;;  %v3391_v17 = vpack.i.b16 %v4753_v0, %v4750_v14 }
 0x1c1   : > { %v4763_v44 = vrot.slane %v3318_v13, %v4057_v40  ;;  %v3494_v54 = vrot.slane %v3480_v22, %v4057_v40  ;;  %v4771_v20 = vrot.slane %v3342_v1, %v4057_v40  ;;  %v4775_v35 = vcombine.high %v4708_v19, %v4708_v19 }
 0x1c2   : > { %v4779_v26 = vcombine.high %v4714_v9, %v4714_v9  ;;  %v3415_v55 = vpack.i.b16 %v4760_v36, %v4757_v47  ;;  %v3505_v43 = vcombine.low %v3367_v8, %v3391_v17  ;;  %v4785_v27 = vcombine.high %v4717_v37, %v4717_v37 }
 0x1c3   : > { %v4789_v16 = vcombine.high %v4720_v56, %v4720_v56  ;;  %v3495_v57 = vcombine.low %v3487_v51, %v3494_v54  ;;  %v3439_v30 = vpack.i.b16 %v4771_v20, %v4763_v44  ;;  %v4795_v4 = vcombine.high %v4724_v59, %v4724_v59 }
 0x1c4   : > { %v4799_v34 = vcombine.high %v4727_v49, %v4727_v49  ;;  %v3513_v32 = vrot.slane %v3505_v43, %v4057_v40  ;;  %v4804_v38 = vcombine.high %v4730_v25, %v4730_v25  ;;  %v4808_v31 = vcombine.high %v4734_v53, %v4734_v53 }
 0x1c5   : > { %v3374_v61 = vshrl.u32 %v4775_v35, 16  ;;  %v3502_v45 = vrot.slane %v3495_v57, %v4057_v40  ;;  %v3506_v33 = vcombine.low %v3415_v55, %v3439_v30  ;;  %v3375_v50 = vshrl.u32 %v4779_v26, 16 }
 0x1c6   : > { %v3398_v12 = vshrl.u32 %v4785_v27, 16  ;;  %v3399_v28 = vshrl.u32 %v4789_v16, 16  ;;  %v3422_v42 = vshrl.u32 %v4795_v4, 16  ;;  %v3423_v5 = vshrl.u32 %v4799_v34, 16 }
 0x1c7   : > { %v3446_v52 = vshrl.u32 %v4804_v38, 16  ;;  %3503 = vrot.lane.b32.xlu0 %v3502_v45, %s3970_s27  ;;  %v3520_v63 = vrot.slane %v3506_v33, %v4057_v40  ;;  %v3376_v29 = vpack.i.b16 %v3375_v50, %v3374_v61  ;;  %v3447_v11 = vshrl.u32 %v4808_v31, 16 }
 0x1c8   : > { %v3190_v18 = vcombine.high %v4744_v41, %v4744_v41  ;;  %v3400_v10 = vpack.i.b16 %v3399_v28, %v3398_v12  ;;  %v3424_v2 = vpack.i.b16 %v3423_v5, %v3422_v42  ;;  %v3214_v62 = vcombine.high %v4747_v23, %v4747_v23 }
 0x1c9   : > { %v3238_v3 = vcombine.high %v4750_v14, %v4750_v14  ;;  %v3521_v48 = vcombine.low %v3513_v32, %v3520_v63  ;;  %v3448_v58 = vpack.i.b16 %v3447_v11, %v3446_v52  ;;  %v3262_v7 = vcombine.high %v4753_v0, %v4753_v0 }
 0x1ca   : > { %v3286_v46 = vcombine.high %v4757_v47, %v4757_v47  ;;  %v3581_v21 = vcombine.low %v3376_v29, %v3400_v10  ;;  %v3310_v6 = vcombine.high %v4760_v36, %v4760_v36  ;;  %v3334_v15 = vcombine.high %v4763_v44, %v4763_v44 }
 0x1cb   : > { %v3358_v60 = vcombine.high %v4771_v20, %v4771_v20  ;;  %v3528_v39 = vrot.slane %v3521_v48, %v4057_v40  ;;  %v3582_v24 = vcombine.low %v3424_v2, %v3448_v58  ;;  %v3379_v13 = vpack.i.b16 %v3214_v62, %v3190_v18 }
 0x1cc   : > { %v3403_v22 = vpack.i.b16 %v3262_v7, %v3238_v3  ;;  %v3589_v51 = vrot.slane %v3581_v21, %v4057_v40  ;;  %v3427_v1 = vpack.i.b16 %v3310_v6, %v3286_v46  ;;  %v3368_v17 = vshrl.u32 %v4744_v41, 16 }
 0x1cd   : > { %v3451_v8 = vpack.i.b16 %v3358_v60, %v3334_v15  ;;  %3529 = vrot.lane.b32.xlu1 %v3528_v39, %s3971_s28  ;;  %v3596_v54 = vrot.slane %v3582_v24, %v4057_v40  ;;  %v3369_v43 = vshrl.u32 %v4747_v23, 16  ;;  %v3392_v57 = vshrl.u32 %v4750_v14, 16 }
 0x1ce   : > { %v3607_v55 = vcombine.low %v3379_v13, %v3403_v22  ;;  %v3393_v32 = vshrl.u32 %v4753_v0, 16  ;;  %v3416_v61 = vshrl.u32 %v4757_v47, 16  ;;  %v3417_v45 = vshrl.u32 %v4760_v36, 16 }
 0x1cf   : > { %v3608_v30 = vcombine.low %v3427_v1, %v3451_v8  ;;  %v3597_v33 = vcombine.low %v3589_v51, %v3596_v54  ;;  %v3370_v50 = vpack.i.b16 %v3369_v43, %v3368_v17  ;;  %v3440_v12 = vshrl.u32 %v4763_v44, 16 }
 0x1d0   : > { %v3615_v41 = vrot.slane %v3607_v55, %v4057_v40  ;;  %v3394_v42 = vpack.i.b16 %v3393_v32, %v3392_v57  ;;  %v3418_v5 = vpack.i.b16 %v3417_v45, %v3416_v61  ;;  %v3441_v23 = vshrl.u32 %v4771_v20, 16 }
 0x1d1   : > { %v3622_v28 = vrot.slane %v3608_v30, %v4057_v40  ;;  %v3604_v14 = vrot.slane %v3597_v33, %v4057_v40  ;;  %v3380_v52 = vshrl.u32 %v3190_v18, 16  ;;  %v3381_v0 = vshrl.u32 %v3214_v62, 16 }
 0x1d2   : > { %v3404_v63 = vshrl.u32 %v3238_v3, 16  ;;  %v3442_v29 = vpack.i.b16 %v3441_v23, %v3440_v12  ;;  %v3531_v36 = vcombine.low %v3370_v50, %v3394_v42  ;;  %v3405_v11 = vshrl.u32 %v3262_v7, 16 }
 0x1d3   : > { %v3623_v47 = vcombine.low %v3615_v41, %v3622_v28  ;;  %3605 = vrot.lane.b32.xlu0 %v3604_v14, %s3970_s27  ;;  %v3382_v10 = vpack.i.b16 %v3381_v0, %v3380_v52  ;;  %v3428_v2 = vshrl.u32 %v3286_v46, 16  ;;  %v3429_v44 = vshrl.u32 %v3310_v6, 16 }
 0x1d4   : > { %v3452_v48 = vshrl.u32 %v3334_v15, 16  ;;  %v3532_v21 = vcombine.low %v3418_v5, %v3442_v29  ;;  %v3539_v20 = vrot.slane %v3531_v36, %v4057_v40  ;;  %v3406_v39 = vpack.i.b16 %v3405_v11, %v3404_v63 }
 0x1d5   : > { %v3630_v58 = vrot.slane %v3623_v47, %v4057_v40  ;;  %v3430_v24 = vpack.i.b16 %v3429_v44, %v3428_v2  ;;  %v3453_v18 = vshrl.u32 %v3358_v60, 16  ;;  %v3385_v62 = vpack.i.b16 %v4720_v56, %v4717_v37 }
 0x1d6   : > { %v3409_v3 = vpack.i.b16 %v4727_v49, %v4724_v59  ;;  %v3546_v7 = vrot.slane %v3532_v21, %v4057_v40  ;;  %v3633_v46 = vcombine.low %v3382_v10, %v3406_v39  ;;  %v3433_v6 = vpack.i.b16 %v4734_v53, %v4730_v25 }
 0x1d7   : > { %3631 = vrot.lane.b32.xlu1 %v3630_v58, %s3971_s28  ;;  %v3454_v15 = vpack.i.b16 %v3453_v18, %v3452_v48  ;;  %v3361_v13 = vpack.i.b16 %v4714_v9, %v4708_v19  ;;  %v3397_v60 = vpack.i.b16 %v4789_v16, %v4785_v27  ;;  %v3421_v59 = vpack.i.b16 %v4799_v34, %v4795_v4 }
 0x1d8   : > { %v3547_v22 = vcombine.low %v3539_v20, %v3546_v7  ;;  %v3641_v37 = vrot.slane %v3633_v46, %v4057_v40  ;;  %v3456_v56 = vcombine.low %v3409_v3, %v3433_v6  ;;  %v3445_v1 = vpack.i.b16 %v4808_v31, %v4804_v38 }
 0x1d9   : > { %v3634_v49 = vcombine.low %v3430_v24, %v3454_v15  ;;  %v3455_v51 = vcombine.low %v3361_v13, %v3385_v62  ;;  %v3373_v25 = vpack.i.b16 %v4779_v26, %v4775_v35 }
 0x1da   : > { %v3554_v19 = vrot.slane %v3547_v22, %v4057_v40  ;;  %v3470_v9 = vrot.slane %v3456_v56, %v4057_v40  ;;  %v3558_v16 = vcombine.low %v3421_v59, %v3445_v1 }
 0x1db   : > { %v3648_v53 = vrot.slane %v3634_v49, %v4057_v40  ;;  %v3463_v27 = vrot.slane %v3455_v51, %v4057_v40  ;;  %v3557_v8 = vcombine.low %v3373_v25, %v3397_v60 }
 0x1dc   : > { %3555 = vrot.lane.b32.xlu0 %v3554_v19, %s3972_s29  ;;  %v3572_v38 = vrot.slane %v3558_v16, %v4057_v40 }
 0x1dd   : > { %v3649_v4 = vcombine.low %v3641_v37, %v3648_v53  ;;  %v3471_v34 = vcombine.low %v3463_v27, %v3470_v9  ;;  %v3565_v35 = vrot.slane %v3557_v8, %v4057_v40 }
 0x1df   : > { %v3656_v26 = vrot.slane %v3649_v4, %v4057_v40  ;;  %v3573_v31 = vcombine.low %v3565_v35, %v3572_v38  ;;  %v3478_v43 = vrot.slane %v3471_v34, %v4057_v40 }
 0x1e1   : > { %3657 = vrot.lane.b32.xlu1 %v3656_v26, %s3972_s29  ;;  %v3580_v32 = vrot.slane %v3573_v31, %v4057_v40 }
 0x239   : > { %v3504_v17 = vpop.permute.xlu0 %3503 }
 0x23a   : > { %v3662_v30 = vsel %vm3659_vm10, %v3478_v43, %v3504_v17 }
 0x23f   : > { %v3530_v54 = vpop.permute.xlu1 %3529 }
 0x240   : > { %v3665_v33 = vsel %vm3663_vm11, %v3662_v30, %v3530_v54 }
 0x245   : > { %v3606_v55 = vpop.permute.xlu0 %3605 }
 0x246   : > { %v3671_v45 = vsel %vm3659_vm10, %v3580_v32, %v3606_v55 }
 0x249   : > { %v3632_v57 = vpop.permute.xlu1 %3631 }
 0x24a   : > { %v3673_v50 = vsel %vm3663_vm11, %v3671_v45, %v3632_v57 }
 0x24e   : > { %v3556_v61 = vpop.permute.xlu0 %3555 }
 0x24f   : > { %v3668_v41 = vsel %vm3666_vm12, %v3665_v33, %v3556_v61 }
 0x253   : > { %v3658_v12 = vpop.permute.xlu1 %3657 }
 0x254   : > { %v3675_v28 = vsel %vm3666_vm12, %v3673_v50, %v3658_v12 }
 0x255   : > { %v3863_v42 = vcombine.low %v3668_v41, %v3675_v28 }
 0x257   : > { %3682 = vst [vmem:[%s175_s6] sm:$0xff] %v3863_v42 }
 0x258 PF: > { %s13_s12 = sadd.s32 1, %s3965_s12  }
 0x259   : > { %p10_p5 = scmp.ge.s32.totalorder %s13_s12, 4  }
 0x25b   :  { %12 = sbr.rel (!%p10_p5) target bundleno = 1 (0x1), region = 62 }

</bundles_post_ra>
